<compile_context>
chip_gen: v5e
topology: v5e:2x2
jax: 0.10.0
libtpu: 0.0.40
codegen_flags: <defaults>
</compile_context>

<pallas_src>
import functools

import jax
import jax.numpy as jnp
from jax import lax
from jax.experimental import pallas as pl
from jax.experimental.pallas import tpu as pltpu


# ----------------------------------------------------------------------------
# Fused Pallas kernel: the whole Deshadow_netS4 forward for one image.
# ----------------------------------------------------------------------------
def _deshadow_kernel(x_ref, m_ref,
                     iw1_ref, ib1_ref, iw2_ref, ib2_ref, iw3_ref, ib3_ref,
                     tw1_ref, tb1_ref, tw2_ref, tb2_ref, tw3_ref, tb3_ref,
                     a_out_ref, j_out_ref,
                     p1_ref, ph_ref,
                     *, H, W, C, h1, h2):
    """One image per grid step, channel-major (HW on the 128-lane axis).

    x_ref:  (1, C, HW)       flattened NCHW image
    m_ref:  (1, 1, HW)       flattened mask
    *w:     (Cout, 9*Cin)    channel-major im2col weights;  *b: (Cout, 1) biases
    a_out_ref / j_out_ref: (5, 1, C, HW)  step-major, lane-dense outputs
    p1_ref: (9*(3C+1), HW)   layer-1 patch rows, blocks [x | mask | J | A]
    ph_ref: (9*max(h1,h2), HW) hidden-layer patch rows
    """
    HW = H * W

    x = x_ref[0]                                   # (C, HW)
    m = m_ref[0]                                   # (1, HW)

    # --- 3x3 'same' zero-padding masks, one per tap (depend only on (y, x)). ---
    pos = lax.broadcasted_iota(jnp.int32, (1, HW), 1)
    if (W & (W - 1)) == 0:                         # power-of-two width: shift/and
        yy = pos >> (W.bit_length() - 1)
        xx = pos & (W - 1)
    else:                                          # generic (not hit in the demo)
        yy = pos // W
        xx = pos - yy * W
    masks = []
    for dy in range(3):
        for dx in range(3):
            conds = []
            if dy == 0:
                conds.append(yy >= 1)
            if dy == 2:
                conds.append(yy <= H - 2)
            if dx == 0:
                conds.append(xx >= 1)
            if dx == 2:
                conds.append(xx <= W - 2)
            mk = None
            for cnd in conds:
                mk = cnd if mk is None else jnp.logical_and(mk, cnd)
            masks.append(mk)                       # None == all-valid (center tap)

    def write_taps(dst_ref, row_off, v):
        """Write the 9 'same'-padded 3x3 taps of v:(Cin, HW) as sublane slabs
        dst_ref[row_off + t*Cin : row_off + (t+1)*Cin, :],  t = dy*3 + dx."""
        cin = v.shape[0]
        for t in range(9):
            dy, dx = t // 3, t % 3
            delta = (dy - 1) * W + (dx - 1)        # flattened source offset
            s = v if delta == 0 else pltpu.roll(v, shift=(-delta) % HW, axis=1)
            if masks[t] is not None:
                s = jnp.where(masks[t], s, 0.0)    # zero out-of-image taps
            dst_ref[row_off + t * cin:row_off + (t + 1) * cin, :] = s

    def conv(src_ref, nrows, w_ref, b_ref, relu):
        """(Cout, K) @ (K, HW) MXU matmul over the patch buffer; lane-dense out."""
        acc = jnp.dot(w_ref[...], src_ref[0:nrows, :],
                      preferred_element_type=jnp.float32)
        acc = acc + b_ref[...]                     # (Cout, 1) lane-broadcast bias
        if relu:
            acc = jnp.maximum(acc, 0.0)
        return acc                                 # (Cout, HW)

    # inputs / mask taps are loop-invariant: build once, reused by all 5
    # layer-1 convs (this replaces the per-iteration channel concat entirely).
    write_taps(p1_ref, 0, x)                       # rows [0, 9C)
    write_taps(p1_ref, 9 * C, m)                   # rows [9C, 9C+9)

    # ---- init net: A0 = conv3(relu(conv2(relu(conv1([x, m]))))) ----
    h = conv(p1_ref, 9 * (C + 1), iw1_ref, ib1_ref, relu=True)      # (h1, HW)
    write_taps(ph_ref, 0, h)
    h = conv(ph_ref, 9 * h1, iw2_ref, ib2_ref, relu=True)           # (h1, HW)
    write_taps(ph_ref, 0, h)
    a = conv(ph_ref, 9 * h1, iw3_ref, ib3_ref, relu=False)          # (C, HW)
    j = (1.0 + a) * x                              # fused J = (1 + A) * inputs
    a_out_ref[0] = a[None]
    j_out_ref[0] = j[None]

    # ---- 4 shared-weight refinement steps: A_{k+1} = iter_net(x, J_k, A_k, m) ----
    def step(k, carry):
        a_prev, j_prev = carry
        write_taps(p1_ref, 9 * (C + 1), j_prev)    # rows [9(C+1), 9(2C+1))
        write_taps(p1_ref, 9 * (2 * C + 1), a_prev)  # rows [9(2C+1), 9(3C+1))
        h = conv(p1_ref, 9 * (3 * C + 1), tw1_ref, tb1_ref, relu=True)  # (h2, HW)
        write_taps(ph_ref, 0, h)
        h = conv(ph_ref, 9 * h2, tw2_ref, tb2_ref, relu=True)
        write_taps(ph_ref, 0, h)
        a_new = conv(ph_ref, 9 * h2, tw3_ref, tb3_ref, relu=False)   # (C, HW)
        j_new = (1.0 + a_new) * x
        a_out_ref[k] = a_new[None]                 # dynamic leading-axis store
        j_out_ref[k] = j_new[None]
        return (a_new, j_new)

    lax.fori_loop(1, 5, step, (a, j))


# ----------------------------------------------------------------------------
# Parameters (deterministic, in-script).  Conv weights are HWIO (kh, kw, cin, cout).
# ----------------------------------------------------------------------------
def _init_conv(key, cin, cout, scale=0.05):
    w = scale * jax.random.normal(key, (3, 3, cin, cout), jnp.float32)
    b = 0.01 * jnp.ones((cout,), jnp.float32)
    return w, b


def make_params(key, in_ch=3, mask_ch=1, ex1=6, ex2=4):
    keys = jax.random.split(key, 6)
    h1 = 4 * ex1   # init-net hidden width (expansion ex1 = 6 -> 24)
    h2 = 4 * ex2   # iter-net hidden width (expansion ex2 = 4 -> 16)
    p = {}
    p["init_w1"], p["init_b1"] = _init_conv(keys[0], in_ch + mask_ch, h1)
    p["init_w2"], p["init_b2"] = _init_conv(keys[1], h1, h1)
    p["init_w3"], p["init_b3"] = _init_conv(keys[2], h1, in_ch)
    p["iter_w1"], p["iter_b1"] = _init_conv(keys[3], 3 * in_ch + mask_ch, h2)
    p["iter_w2"], p["iter_b2"] = _init_conv(keys[4], h2, h2)
    p["iter_w3"], p["iter_b3"] = _init_conv(keys[5], h2, in_ch)
    return p


# ----------------------------------------------------------------------------
# Wrapper: pack weights channel-major and call the fused kernel.
# ----------------------------------------------------------------------------
def _w_to_mat(w_hwio):
    """(3, 3, Cin, Cout) -> (Cout, 9*Cin); column order = (tap=(dy,dx), cin),
    matching the in-kernel patch-row order."""
    kh, kw, cin, cout = w_hwio.shape
    return w_hwio.reshape(kh * kw * cin, cout).T


def deshadow_net_s4(params, inputs_nchw, mask_nchw):
    N, C, H, W = inputs_nchw.shape
    HW = H * W
    h1 = params["init_b1"].shape[0]
    h2 = params["iter_b1"].shape[0]

    # Free reshapes: NCHW-major stays put, HW becomes the lane axis.
    x = inputs_nchw.reshape(N, C, HW)
    m = mask_nchw.reshape(N, 1, HW)

    # Layer-1 weights are split per source and re-stacked along K to match the
    # in-kernel patch-row order (x | mask | J | A) — replaces the channel concat.
    w1 = params["init_w1"]
    iw1 = jnp.concatenate([_w_to_mat(w1[:, :, :C, :]),                # x
                           _w_to_mat(w1[:, :, C:, :])], axis=1)       # mask
    iw2 = _w_to_mat(params["init_w2"])
    iw3 = _w_to_mat(params["init_w3"])
    wi = params["iter_w1"]                   # param cin order: (x, J, A, mask)
    tw1 = jnp.concatenate([_w_to_mat(wi[:, :, 0:C, :]),               # x
                           _w_to_mat(wi[:, :, 3 * C:3 * C + 1, :]),   # mask
                           _w_to_mat(wi[:, :, C:2 * C, :]),           # J
                           _w_to_mat(wi[:, :, 2 * C:3 * C, :])],      # A
                          axis=1)
    tw2 = _w_to_mat(params["iter_w2"])
    tw3 = _w_to_mat(params["iter_w3"])
    ib1 = params["init_b1"].reshape(h1, 1)
    ib2 = params["init_b2"].reshape(h1, 1)
    ib3 = params["init_b3"].reshape(C, 1)
    tb1 = params["iter_b1"].reshape(h2, 1)
    tb2 = params["iter_b2"].reshape(h2, 1)
    tb3 = params["iter_b3"].reshape(C, 1)

    weights = (iw1, ib1, iw2, ib2, iw3, ib3, tw1, tb1, tw2, tb2, tw3, tb3)

    flops = N * (2 * HW * (9 * (C + 1)) * h1
                 + 2 * HW * (9 * h1) * h1
                 + 2 * HW * (9 * h1) * C
                 + 4 * (2 * HW * (9 * (3 * C + 1)) * h2
                        + 2 * HW * (9 * h2) * h2
                        + 2 * HW * (9 * h2) * C))
    bytes_accessed = 4 * (x.size + m.size + sum(w.size for w in weights)
                          + 2 * 5 * N * C * HW)

    kernel = functools.partial(_deshadow_kernel, H=H, W=W, C=C, h1=h1, h2=h2)

    a_all, j_all = pl.pallas_call(
        kernel,
        out_shape=(jax.ShapeDtypeStruct((5, N, C, HW), jnp.float32),
                   jax.ShapeDtypeStruct((5, N, C, HW), jnp.float32)),
        grid=(N,),
        in_specs=[pl.BlockSpec((1, C, HW), lambda n: (n, 0, 0)),
                  pl.BlockSpec((1, 1, HW), lambda n: (n, 0, 0))]
                 + [pl.BlockSpec(w.shape, lambda n: (0, 0)) for w in weights],
        out_specs=(pl.BlockSpec((5, 1, C, HW), lambda n: (0, n, 0, 0)),
                   pl.BlockSpec((5, 1, C, HW), lambda n: (0, n, 0, 0))),
        scratch_shapes=[pltpu.VMEM((9 * (3 * C + 1), HW), jnp.float32),
                        pltpu.VMEM((9 * max(h1, h2), HW), jnp.float32)],
        compiler_params=pltpu.CompilerParams(
            dimension_semantics=("parallel",)),
        cost_estimate=pl.CostEstimate(flops=flops, transcendentals=0,
                                      bytes_accessed=bytes_accessed),
    )(x, m, *weights)

    a_all = a_all.reshape(5, N, C, H, W)
    j_all = j_all.reshape(5, N, C, H, W)
    listA = [a_all[k] for k in range(5)]          # NCHW tensors, like PyTorch
    listJ = [j_all[k] for k in range(5)]
    return listA, listA[-1], listJ, listJ[-1]


# ----------------------------------------------------------------------------
# Pure-JAX reference (lax.conv) for a correctness check of the fused kernel.
# ----------------------------------------------------------------------------
def _conv3x3_ref(x_nhwc, w_hwio, b):
    y = jax.lax.conv_general_dilated(
        x_nhwc, w_hwio, window_strides=(1, 1), padding="SAME",
        dimension_numbers=("NHWC", "HWIO", "NHWC"),
        precision=jax.lax.Precision.HIGHEST)
    return y + b.reshape(1, 1, 1, -1)


def deshadow_ref(params, inputs_nchw, mask_nchw):
    x = jnp.transpose(inputs_nchw, (0, 2, 3, 1))
    m = jnp.transpose(mask_nchw, (0, 2, 3, 1))

    def init_net(x, m):
        t = jnp.concatenate([x, m], axis=-1)
        h = jnp.maximum(_conv3x3_ref(t, params["init_w1"], params["init_b1"]), 0.0)
        h = jnp.maximum(_conv3x3_ref(h, params["init_w2"], params["init_b2"]), 0.0)
        return _conv3x3_ref(h, params["init_w3"], params["init_b3"])

    def iter_net(x, j, a, m):
        t = jnp.concatenate([x, j, a, m], axis=-1)
        h = jnp.maximum(_conv3x3_ref(t, params["iter_w1"], params["iter_b1"]), 0.0)
        h = jnp.maximum(_conv3x3_ref(h, params["iter_w2"], params["iter_b2"]), 0.0)
        return _conv3x3_ref(h, params["iter_w3"], params["iter_b3"])

    listA, listJ = [], []
    a = init_net(x, m)
    j = (1.0 + a) * x
    listA.append(a)
    listJ.append(j)
    for _ in range(4):
        a = iter_net(x, j, a, m)
        j = (1.0 + a) * x
        listA.append(a)
        listJ.append(j)
    to_nchw = lambda t: jnp.transpose(t, (0, 3, 1, 2))
    return [to_nchw(t) for t in listA], [to_nchw(t) for t in listJ]


# ----------------------------------------------------------------------------
# Main
# ----------------------------------------------------------------------------
if __name__ == "__main__":
    key = jax.random.PRNGKey(0)
    k_in, k_mask, k_par = jax.random.split(key, 3)

    # PyTorch-style NCHW example inputs (small shapes).
    N, C, H, W = 2, 3, 16, 16
    inputs = jax.random.uniform(k_in, (N, C, H, W), jnp.float32)
    mask = (jax.random.uniform(k_mask, (N, 1, H, W), jnp.float32) > 0.5
            ).astype(jnp.float32)

    params = make_params(k_par, in_ch=C, mask_ch=1, ex1=6, ex2=4)

    fwd = jax.jit(deshadow_net_s4)
    listA, A_last, listJ, J_last = fwd(params, inputs, mask)
    jax.block_until_ready((listA, A_last, listJ, J_last))

    # Correctness check against a pure-JAX (lax.conv) reference.
    refA, refJ = deshadow_ref(params, inputs, mask)
    for k in range(5):
        err_a = float(jnp.max(jnp.abs(listA[k] - refA[k])))
        err_j = float(jnp.max(jnp.abs(listJ[k] - refJ[k])))
        assert err_a < 3e-2 and err_j < 3e-2, (
            f"mismatch at step {k}: max|dA|={err_a}, max|dJ|={err_j}")

    assert len(listA) == 5 and len(listJ) == 5
    assert A_last.shape == (N, C, H, W) and J_last.shape == (N, C, H, W)
    print("KERNEL_OK")
</pallas_src>

<mosaic_0001>
module attributes {stable_mosaic.version = 11 : i64} {
  func.func @_deshadow_kernel(%arg0: i32, %arg1: memref<1x3x256xf32, #tpu.memory_space<vmem>>, %arg2: memref<1x1x256xf32, #tpu.memory_space<vmem>>, %arg3: memref<24x36xf32, #tpu.memory_space<vmem>>, %arg4: memref<24x1xf32, #tpu.memory_space<vmem>>, %arg5: memref<24x216xf32, #tpu.memory_space<vmem>>, %arg6: memref<24x1xf32, #tpu.memory_space<vmem>>, %arg7: memref<3x216xf32, #tpu.memory_space<vmem>>, %arg8: memref<3x1xf32, #tpu.memory_space<vmem>>, %arg9: memref<16x90xf32, #tpu.memory_space<vmem>>, %arg10: memref<16x1xf32, #tpu.memory_space<vmem>>, %arg11: memref<16x144xf32, #tpu.memory_space<vmem>>, %arg12: memref<16x1xf32, #tpu.memory_space<vmem>>, %arg13: memref<3x144xf32, #tpu.memory_space<vmem>>, %arg14: memref<3x1xf32, #tpu.memory_space<vmem>>, %arg15: memref<5x1x3x256xf32, #tpu.memory_space<vmem>>, %arg16: memref<5x1x3x256xf32, #tpu.memory_space<vmem>>, %arg17: memref<90x256xf32, #tpu.memory_space<vmem>>, %arg18: memref<216x256xf32, #tpu.memory_space<vmem>>) attributes {dimension_semantics = [#tpu.dimension_semantics<parallel>], iteration_bounds = array<i64: 2>, scalar_prefetch = 0 : i64, scratch_operands = 2 : i64, tpu.core_type = #tpu.core_type<tc>, window_params = [{transform_indices = @transform_0, window_bounds = array<i64: 1, 3, 256>}, {transform_indices = @transform_1, window_bounds = array<i64: 1, 1, 256>}, {pipeline_mode = #tpu.pipeline_mode<synchronous>, transform_indices = @transform_2, window_bounds = array<i64: 24, 36>}, {pipeline_mode = #tpu.pipeline_mode<synchronous>, transform_indices = @transform_3, window_bounds = array<i64: 24, 1>}, {pipeline_mode = #tpu.pipeline_mode<synchronous>, transform_indices = @transform_4, window_bounds = array<i64: 24, 216>}, {pipeline_mode = #tpu.pipeline_mode<synchronous>, transform_indices = @transform_5, window_bounds = array<i64: 24, 1>}, {pipeline_mode = #tpu.pipeline_mode<synchronous>, transform_indices = @transform_6, window_bounds = array<i64: 3, 216>}, {pipeline_mode = #tpu.pipeline_mode<synchronous>, transform_indices = @transform_7, window_bounds = array<i64: 3, 1>}, {pipeline_mode = #tpu.pipeline_mode<synchronous>, transform_indices = @transform_8, window_bounds = array<i64: 16, 90>}, {pipeline_mode = #tpu.pipeline_mode<synchronous>, transform_indices = @transform_9, window_bounds = array<i64: 16, 1>}, {pipeline_mode = #tpu.pipeline_mode<synchronous>, transform_indices = @transform_10, window_bounds = array<i64: 16, 144>}, {pipeline_mode = #tpu.pipeline_mode<synchronous>, transform_indices = @transform_11, window_bounds = array<i64: 16, 1>}, {pipeline_mode = #tpu.pipeline_mode<synchronous>, transform_indices = @transform_12, window_bounds = array<i64: 3, 144>}, {pipeline_mode = #tpu.pipeline_mode<synchronous>, transform_indices = @transform_13, window_bounds = array<i64: 3, 1>}, {transform_indices = @transform_14, window_bounds = array<i64: 5, 1, 3, 256>}, {transform_indices = @transform_15, window_bounds = array<i64: 5, 1, 3, 256>}]} {
    %c0 = arith.constant 0 : index
    %c0_0 = arith.constant 0 : index
    %c0_1 = arith.constant 0 : index
    %0 = vector.load %arg1[%c0, %c0_0, %c0_1] : memref<1x3x256xf32, #tpu.memory_space<vmem>>, vector<1x3x256xf32>
    %1 = vector.shape_cast %0 : vector<1x3x256xf32> to vector<3x256xf32>
    %c0_2 = arith.constant 0 : index
    %c0_3 = arith.constant 0 : index
    %c0_4 = arith.constant 0 : index
    %2 = vector.load %arg2[%c0_2, %c0_3, %c0_4] : memref<1x1x256xf32, #tpu.memory_space<vmem>>, vector<1x1x256xf32>
    %3 = vector.shape_cast %2 : vector<1x1x256xf32> to vector<1x256xf32>
    %4 = tpu.iota {dimensions = array<i32: 1>} : vector<1x256xi32>
    %c4_i32 = arith.constant 4 : i32
    %5 = vector.broadcast %c4_i32 : i32 to vector<1x256xi32>
    %6 = arith.shrsi %4, %5 : vector<1x256xi32>
    %c15_i32 = arith.constant 15 : i32
    %7 = vector.broadcast %c15_i32 : i32 to vector<1x256xi32>
    %8 = arith.andi %4, %7 : vector<1x256xi32>
    %c1_i32 = arith.constant 1 : i32
    %9 = vector.broadcast %c1_i32 : i32 to vector<1x256xi32>
    %10 = arith.cmpi sge, %6, %9 : vector<1x256xi32>
    %c1_i32_5 = arith.constant 1 : i32
    %11 = vector.broadcast %c1_i32_5 : i32 to vector<1x256xi32>
    %12 = arith.cmpi sge, %8, %11 : vector<1x256xi32>
    %13 = arith.andi %10, %12 : vector<1x256xi1>
    %c1_i32_6 = arith.constant 1 : i32
    %14 = vector.broadcast %c1_i32_6 : i32 to vector<1x256xi32>
    %15 = arith.cmpi sge, %6, %14 : vector<1x256xi32>
    %c1_i32_7 = arith.constant 1 : i32
    %16 = vector.broadcast %c1_i32_7 : i32 to vector<1x256xi32>
    %17 = arith.cmpi sge, %6, %16 : vector<1x256xi32>
    %c14_i32 = arith.constant 14 : i32
    %18 = vector.broadcast %c14_i32 : i32 to vector<1x256xi32>
    %19 = arith.cmpi sle, %8, %18 : vector<1x256xi32>
    %20 = arith.andi %17, %19 : vector<1x256xi1>
    %c1_i32_8 = arith.constant 1 : i32
    %21 = vector.broadcast %c1_i32_8 : i32 to vector<1x256xi32>
    %22 = arith.cmpi sge, %8, %21 : vector<1x256xi32>
    %c14_i32_9 = arith.constant 14 : i32
    %23 = vector.broadcast %c14_i32_9 : i32 to vector<1x256xi32>
    %24 = arith.cmpi sle, %8, %23 : vector<1x256xi32>
    %c14_i32_10 = arith.constant 14 : i32
    %25 = vector.broadcast %c14_i32_10 : i32 to vector<1x256xi32>
    %26 = arith.cmpi sle, %6, %25 : vector<1x256xi32>
    %c1_i32_11 = arith.constant 1 : i32
    %27 = vector.broadcast %c1_i32_11 : i32 to vector<1x256xi32>
    %28 = arith.cmpi sge, %8, %27 : vector<1x256xi32>
    %29 = arith.andi %26, %28 : vector<1x256xi1>
    %c14_i32_12 = arith.constant 14 : i32
    %30 = vector.broadcast %c14_i32_12 : i32 to vector<1x256xi32>
    %31 = arith.cmpi sle, %6, %30 : vector<1x256xi32>
    %c14_i32_13 = arith.constant 14 : i32
    %32 = vector.broadcast %c14_i32_13 : i32 to vector<1x256xi32>
    %33 = arith.cmpi sle, %6, %32 : vector<1x256xi32>
    %c14_i32_14 = arith.constant 14 : i32
    %34 = vector.broadcast %c14_i32_14 : i32 to vector<1x256xi32>
    %35 = arith.cmpi sle, %8, %34 : vector<1x256xi32>
    %36 = arith.andi %33, %35 : vector<1x256xi1>
    %c17_i32 = arith.constant 17 : i32
    %37 = tpu.dynamic_rotate %1 by %c17_i32 dim 1 : vector<3x256xf32>, i32 -> vector<3x256xf32>
    %cst = arith.constant 0.000000e+00 : f32
    %38 = vector.shape_cast %13 : vector<1x256xi1> to vector<1x256xi1>
    %39 = vector.broadcast %38 : vector<1x256xi1> to vector<3x256xi1>
    %40 = vector.broadcast %cst : f32 to vector<3x256xf32>
    %41 = arith.select %39, %37, %40 : vector<3x256xi1>, vector<3x256xf32>
    %c0_15 = arith.constant 0 : index
    %c0_16 = arith.constant 0 : index
    %42 = vector.load %arg17[%c0_15, %c0_16] : memref<90x256xf32, #tpu.memory_space<vmem>>, vector<3x256xf32>
    tpu.vector_store %arg17[%c0_15, %c0_16], %41 {strides = array<i32>} : memref<90x256xf32, #tpu.memory_space<vmem>>, vector<3x256xf32>,
    %c16_i32 = arith.constant 16 : i32
    %43 = tpu.dynamic_rotate %1 by %c16_i32 dim 1 : vector<3x256xf32>, i32 -> vector<3x256xf32>
    %cst_17 = arith.constant 0.000000e+00 : f32
    %44 = vector.shape_cast %15 : vector<1x256xi1> to vector<1x256xi1>
    %45 = vector.broadcast %44 : vector<1x256xi1> to vector<3x256xi1>
    %46 = vector.broadcast %cst_17 : f32 to vector<3x256xf32>
    %47 = arith.select %45, %43, %46 : vector<3x256xi1>, vector<3x256xf32>
    %c3 = arith.constant 3 : index
    %c0_18 = arith.constant 0 : index
    %48 = vector.load %arg17[%c3, %c0_18] : memref<90x256xf32, #tpu.memory_space<vmem>>, vector<3x256xf32>
    tpu.vector_store %arg17[%c3, %c0_18], %47 {strides = array<i32>} : memref<90x256xf32, #tpu.memory_space<vmem>>, vector<3x256xf32>,
    %c15_i32_19 = arith.constant 15 : i32
    %49 = tpu.dynamic_rotate %1 by %c15_i32_19 dim 1 : vector<3x256xf32>, i32 -> vector<3x256xf32>
    %cst_20 = arith.constant 0.000000e+00 : f32
    %50 = vector.shape_cast %20 : vector<1x256xi1> to vector<1x256xi1>
    %51 = vector.broadcast %50 : vector<1x256xi1> to vector<3x256xi1>
    %52 = vector.broadcast %cst_20 : f32 to vector<3x256xf32>
    %53 = arith.select %51, %49, %52 : vector<3x256xi1>, vector<3x256xf32>
    %c6 = arith.constant 6 : index
    %c0_21 = arith.constant 0 : index
    %54 = vector.load %arg17[%c6, %c0_21] : memref<90x256xf32, #tpu.memory_space<vmem>>, vector<3x256xf32>
    tpu.vector_store %arg17[%c6, %c0_21], %53 {strides = array<i32>} : memref<90x256xf32, #tpu.memory_space<vmem>>, vector<3x256xf32>,
    %c1_i32_22 = arith.constant 1 : i32
    %55 = tpu.dynamic_rotate %1 by %c1_i32_22 dim 1 : vector<3x256xf32>, i32 -> vector<3x256xf32>
    %cst_23 = arith.constant 0.000000e+00 : f32
    %56 = vector.shape_cast %22 : vector<1x256xi1> to vector<1x256xi1>
    %57 = vector.broadcast %56 : vector<1x256xi1> to vector<3x256xi1>
    %58 = vector.broadcast %cst_23 : f32 to vector<3x256xf32>
    %59 = arith.select %57, %55, %58 : vector<3x256xi1>, vector<3x256xf32>
    %c9 = arith.constant 9 : index
    %c0_24 = arith.constant 0 : index
    %60 = vector.load %arg17[%c9, %c0_24] : memref<90x256xf32, #tpu.memory_space<vmem>>, vector<3x256xf32>
    tpu.vector_store %arg17[%c9, %c0_24], %59 {strides = array<i32>} : memref<90x256xf32, #tpu.memory_space<vmem>>, vector<3x256xf32>,
    %c12 = arith.constant 12 : index
    %c0_25 = arith.constant 0 : index
    %61 = vector.load %arg17[%c12, %c0_25] : memref<90x256xf32, #tpu.memory_space<vmem>>, vector<3x256xf32>
    tpu.vector_store %arg17[%c12, %c0_25], %1 {strides = array<i32>} : memref<90x256xf32, #tpu.memory_space<vmem>>, vector<3x256xf32>,
    %c255_i32 = arith.constant 255 : i32
    %62 = tpu.dynamic_rotate %1 by %c255_i32 dim 1 : vector<3x256xf32>, i32 -> vector<3x256xf32>
    %cst_26 = arith.constant 0.000000e+00 : f32
    %63 = vector.shape_cast %24 : vector<1x256xi1> to vector<1x256xi1>
    %64 = vector.broadcast %63 : vector<1x256xi1> to vector<3x256xi1>
    %65 = vector.broadcast %cst_26 : f32 to vector<3x256xf32>
    %66 = arith.select %64, %62, %65 : vector<3x256xi1>, vector<3x256xf32>
    %c15 = arith.constant 15 : index
    %c0_27 = arith.constant 0 : index
    %67 = vector.load %arg17[%c15, %c0_27] : memref<90x256xf32, #tpu.memory_space<vmem>>, vector<3x256xf32>
    tpu.vector_store %arg17[%c15, %c0_27], %66 {strides = array<i32>} : memref<90x256xf32, #tpu.memory_space<vmem>>, vector<3x256xf32>,
    %c241_i32 = arith.constant 241 : i32
    %68 = tpu.dynamic_rotate %1 by %c241_i32 dim 1 : vector<3x256xf32>, i32 -> vector<3x256xf32>
    %cst_28 = arith.constant 0.000000e+00 : f32
    %69 = vector.shape_cast %29 : vector<1x256xi1> to vector<1x256xi1>
    %70 = vector.broadcast %69 : vector<1x256xi1> to vector<3x256xi1>
    %71 = vector.broadcast %cst_28 : f32 to vector<3x256xf32>
    %72 = arith.select %70, %68, %71 : vector<3x256xi1>, vector<3x256xf32>
    %c18 = arith.constant 18 : index
    %c0_29 = arith.constant 0 : index
    %73 = vector.load %arg17[%c18, %c0_29] : memref<90x256xf32, #tpu.memory_space<vmem>>, vector<3x256xf32>
    tpu.vector_store %arg17[%c18, %c0_29], %72 {strides = array<i32>} : memref<90x256xf32, #tpu.memory_space<vmem>>, vector<3x256xf32>,
    %c240_i32 = arith.constant 240 : i32
    %74 = tpu.dynamic_rotate %1 by %c240_i32 dim 1 : vector<3x256xf32>, i32 -> vector<3x256xf32>
    %cst_30 = arith.constant 0.000000e+00 : f32
    %75 = vector.shape_cast %31 : vector<1x256xi1> to vector<1x256xi1>
    %76 = vector.broadcast %75 : vector<1x256xi1> to vector<3x256xi1>
    %77 = vector.broadcast %cst_30 : f32 to vector<3x256xf32>
    %78 = arith.select %76, %74, %77 : vector<3x256xi1>, vector<3x256xf32>
    %c21 = arith.constant 21 : index
    %c0_31 = arith.constant 0 : index
    %79 = vector.load %arg17[%c21, %c0_31] : memref<90x256xf32, #tpu.memory_space<vmem>>, vector<3x256xf32>
    tpu.vector_store %arg17[%c21, %c0_31], %78 {strides = array<i32>} : memref<90x256xf32, #tpu.memory_space<vmem>>, vector<3x256xf32>,
    %c239_i32 = arith.constant 239 : i32
    %80 = tpu.dynamic_rotate %1 by %c239_i32 dim 1 : vector<3x256xf32>, i32 -> vector<3x256xf32>
    %cst_32 = arith.constant 0.000000e+00 : f32
    %81 = vector.shape_cast %36 : vector<1x256xi1> to vector<1x256xi1>
    %82 = vector.broadcast %81 : vector<1x256xi1> to vector<3x256xi1>
    %83 = vector.broadcast %cst_32 : f32 to vector<3x256xf32>
    %84 = arith.select %82, %80, %83 : vector<3x256xi1>, vector<3x256xf32>
    %c24 = arith.constant 24 : index
    %c0_33 = arith.constant 0 : index
    %85 = vector.load %arg17[%c24, %c0_33] : memref<90x256xf32, #tpu.memory_space<vmem>>, vector<3x256xf32>
    tpu.vector_store %arg17[%c24, %c0_33], %84 {strides = array<i32>} : memref<90x256xf32, #tpu.memory_space<vmem>>, vector<3x256xf32>,
    %c17_i32_34 = arith.constant 17 : i32
    %86 = tpu.dynamic_rotate %3 by %c17_i32_34 dim 1 : vector<1x256xf32>, i32 -> vector<1x256xf32>
    %cst_35 = arith.constant 0.000000e+00 : f32
    %87 = vector.broadcast %cst_35 : f32 to vector<1x256xf32>
    %88 = arith.select %13, %86, %87 : vector<1x256xi1>, vector<1x256xf32>
    %c27 = arith.constant 27 : index
    %c0_36 = arith.constant 0 : index
    %89 = vector.load %arg17[%c27, %c0_36] : memref<90x256xf32, #tpu.memory_space<vmem>>, vector<1x256xf32>
    tpu.vector_store %arg17[%c27, %c0_36], %88 {strides = array<i32>} : memref<90x256xf32, #tpu.memory_space<vmem>>, vector<1x256xf32>,
    %c16_i32_37 = arith.constant 16 : i32
    %90 = tpu.dynamic_rotate %3 by %c16_i32_37 dim 1 : vector<1x256xf32>, i32 -> vector<1x256xf32>
    %cst_38 = arith.constant 0.000000e+00 : f32
    %91 = vector.broadcast %cst_38 : f32 to vector<1x256xf32>
    %92 = arith.select %15, %90, %91 : vector<1x256xi1>, vector<1x256xf32>
    %c28 = arith.constant 28 : index
    %c0_39 = arith.constant 0 : index
    %93 = vector.load %arg17[%c28, %c0_39] : memref<90x256xf32, #tpu.memory_space<vmem>>, vector<1x256xf32>
    tpu.vector_store %arg17[%c28, %c0_39], %92 {strides = array<i32>} : memref<90x256xf32, #tpu.memory_space<vmem>>, vector<1x256xf32>,
    %c15_i32_40 = arith.constant 15 : i32
    %94 = tpu.dynamic_rotate %3 by %c15_i32_40 dim 1 : vector<1x256xf32>, i32 -> vector<1x256xf32>
    %cst_41 = arith.constant 0.000000e+00 : f32
    %95 = vector.broadcast %cst_41 : f32 to vector<1x256xf32>
    %96 = arith.select %20, %94, %95 : vector<1x256xi1>, vector<1x256xf32>
    %c29 = arith.constant 29 : index
    %c0_42 = arith.constant 0 : index
    %97 = vector.load %arg17[%c29, %c0_42] : memref<90x256xf32, #tpu.memory_space<vmem>>, vector<1x256xf32>
    tpu.vector_store %arg17[%c29, %c0_42], %96 {strides = array<i32>} : memref<90x256xf32, #tpu.memory_space<vmem>>, vector<1x256xf32>,
    %c1_i32_43 = arith.constant 1 : i32
    %98 = tpu.dynamic_rotate %3 by %c1_i32_43 dim 1 : vector<1x256xf32>, i32 -> vector<1x256xf32>
    %cst_44 = arith.constant 0.000000e+00 : f32
    %99 = vector.broadcast %cst_44 : f32 to vector<1x256xf32>
    %100 = arith.select %22, %98, %99 : vector<1x256xi1>, vector<1x256xf32>
    %c30 = arith.constant 30 : index
    %c0_45 = arith.constant 0 : index
    %101 = vector.load %arg17[%c30, %c0_45] : memref<90x256xf32, #tpu.memory_space<vmem>>, vector<1x256xf32>
    tpu.vector_store %arg17[%c30, %c0_45], %100 {strides = array<i32>} : memref<90x256xf32, #tpu.memory_space<vmem>>, vector<1x256xf32>,
    %c31 = arith.constant 31 : index
    %c0_46 = arith.constant 0 : index
    %102 = vector.load %arg17[%c31, %c0_46] : memref<90x256xf32, #tpu.memory_space<vmem>>, vector<1x256xf32>
    tpu.vector_store %arg17[%c31, %c0_46], %3 {strides = array<i32>} : memref<90x256xf32, #tpu.memory_space<vmem>>, vector<1x256xf32>,
    %c255_i32_47 = arith.constant 255 : i32
    %103 = tpu.dynamic_rotate %3 by %c255_i32_47 dim 1 : vector<1x256xf32>, i32 -> vector<1x256xf32>
    %cst_48 = arith.constant 0.000000e+00 : f32
    %104 = vector.broadcast %cst_48 : f32 to vector<1x256xf32>
    %105 = arith.select %24, %103, %104 : vector<1x256xi1>, vector<1x256xf32>
    %c32 = arith.constant 32 : index
    %c0_49 = arith.constant 0 : index
    %106 = vector.load %arg17[%c32, %c0_49] : memref<90x256xf32, #tpu.memory_space<vmem>>, vector<1x256xf32>
    tpu.vector_store %arg17[%c32, %c0_49], %105 {strides = array<i32>} : memref<90x256xf32, #tpu.memory_space<vmem>>, vector<1x256xf32>,
    %c241_i32_50 = arith.constant 241 : i32
    %107 = tpu.dynamic_rotate %3 by %c241_i32_50 dim 1 : vector<1x256xf32>, i32 -> vector<1x256xf32>
    %cst_51 = arith.constant 0.000000e+00 : f32
    %108 = vector.broadcast %cst_51 : f32 to vector<1x256xf32>
    %109 = arith.select %29, %107, %108 : vector<1x256xi1>, vector<1x256xf32>
    %c33 = arith.constant 33 : index
    %c0_52 = arith.constant 0 : index
    %110 = vector.load %arg17[%c33, %c0_52] : memref<90x256xf32, #tpu.memory_space<vmem>>, vector<1x256xf32>
    tpu.vector_store %arg17[%c33, %c0_52], %109 {strides = array<i32>} : memref<90x256xf32, #tpu.memory_space<vmem>>, vector<1x256xf32>,
    %c240_i32_53 = arith.constant 240 : i32
    %111 = tpu.dynamic_rotate %3 by %c240_i32_53 dim 1 : vector<1x256xf32>, i32 -> vector<1x256xf32>
    %cst_54 = arith.constant 0.000000e+00 : f32
    %112 = vector.broadcast %cst_54 : f32 to vector<1x256xf32>
    %113 = arith.select %31, %111, %112 : vector<1x256xi1>, vector<1x256xf32>
    %c34 = arith.constant 34 : index
    %c0_55 = arith.constant 0 : index
    %114 = vector.load %arg17[%c34, %c0_55] : memref<90x256xf32, #tpu.memory_space<vmem>>, vector<1x256xf32>
    tpu.vector_store %arg17[%c34, %c0_55], %113 {strides = array<i32>} : memref<90x256xf32, #tpu.memory_space<vmem>>, vector<1x256xf32>,
    %c239_i32_56 = arith.constant 239 : i32
    %115 = tpu.dynamic_rotate %3 by %c239_i32_56 dim 1 : vector<1x256xf32>, i32 -> vector<1x256xf32>
    %cst_57 = arith.constant 0.000000e+00 : f32
    %116 = vector.broadcast %cst_57 : f32 to vector<1x256xf32>
    %117 = arith.select %36, %115, %116 : vector<1x256xi1>, vector<1x256xf32>
    %c35 = arith.constant 35 : index
    %c0_58 = arith.constant 0 : index
    %118 = vector.load %arg17[%c35, %c0_58] : memref<90x256xf32, #tpu.memory_space<vmem>>, vector<1x256xf32>
    tpu.vector_store %arg17[%c35, %c0_58], %117 {strides = array<i32>} : memref<90x256xf32, #tpu.memory_space<vmem>>, vector<1x256xf32>,
    %c0_59 = arith.constant 0 : index
    %c0_60 = arith.constant 0 : index
    %119 = vector.load %arg3[%c0_59, %c0_60] : memref<24x36xf32, #tpu.memory_space<vmem>>, vector<24x36xf32>
    %c0_61 = arith.constant 0 : index
    %c0_62 = arith.constant 0 : index
    %120 = vector.load %arg17[%c0_61, %c0_62] : memref<90x256xf32, #tpu.memory_space<vmem>>, vector<36x256xf32>
    %cst_63 = arith.constant dense<0.000000e+00> : vector<24x256xf32>
    %121 = tpu.matmul %119, %120, %cst_63 {dimension_numbers = #tpu.dot_dimension_numbers<[1], [0], [0], [1], [0, 0, 1, 1], [], []>} : vector<24x36xf32>, vector<36x256xf32>, vector<24x256xf32> -> vector<24x256xf32>
    %c0_64 = arith.constant 0 : index
    %c0_65 = arith.constant 0 : index
    %122 = vector.load %arg4[%c0_64, %c0_65] : memref<24x1xf32, #tpu.memory_space<vmem>>, vector<24x1xf32>
    %123 = vector.broadcast %122 : vector<24x1xf32> to vector<24x256xf32>
    %124 = arith.addf %121, %123 : vector<24x256xf32>
    %cst_66 = arith.constant 0.000000e+00 : f32
    %125 = vector.broadcast %cst_66 : f32 to vector<24x256xf32>
    %126 = arith.maximumf %124, %125 : vector<24x256xf32>
    %c17_i32_67 = arith.constant 17 : i32
    %127 = tpu.dynamic_rotate %126 by %c17_i32_67 dim 1 : vector<24x256xf32>, i32 -> vector<24x256xf32>
    %cst_68 = arith.constant 0.000000e+00 : f32
    %128 = vector.shape_cast %13 : vector<1x256xi1> to vector<1x256xi1>
    %129 = vector.broadcast %128 : vector<1x256xi1> to vector<24x256xi1>
    %130 = vector.broadcast %cst_68 : f32 to vector<24x256xf32>
    %131 = arith.select %129, %127, %130 : vector<24x256xi1>, vector<24x256xf32>
    %c0_69 = arith.constant 0 : index
    %c0_70 = arith.constant 0 : index
    %132 = vector.load %arg18[%c0_69, %c0_70] : memref<216x256xf32, #tpu.memory_space<vmem>>, vector<24x256xf32>
    tpu.vector_store %arg18[%c0_69, %c0_70], %131 {strides = array<i32>} : memref<216x256xf32, #tpu.memory_space<vmem>>, vector<24x256xf32>,
    %c16_i32_71 = arith.constant 16 : i32
    %133 = tpu.dynamic_rotate %126 by %c16_i32_71 dim 1 : vector<24x256xf32>, i32 -> vector<24x256xf32>
    %cst_72 = arith.constant 0.000000e+00 : f32
    %134 = vector.shape_cast %15 : vector<1x256xi1> to vector<1x256xi1>
    %135 = vector.broadcast %134 : vector<1x256xi1> to vector<24x256xi1>
    %136 = vector.broadcast %cst_72 : f32 to vector<24x256xf32>
    %137 = arith.select %135, %133, %136 : vector<24x256xi1>, vector<24x256xf32>
    %c24_73 = arith.constant 24 : index
    %c0_74 = arith.constant 0 : index
    %138 = vector.load %arg18[%c24_73, %c0_74] : memref<216x256xf32, #tpu.memory_space<vmem>>, vector<24x256xf32>
    tpu.vector_store %arg18[%c24_73, %c0_74], %137 {strides = array<i32>} : memref<216x256xf32, #tpu.memory_space<vmem>>, vector<24x256xf32>,
    %c15_i32_75 = arith.constant 15 : i32
    %139 = tpu.dynamic_rotate %126 by %c15_i32_75 dim 1 : vector<24x256xf32>, i32 -> vector<24x256xf32>
    %cst_76 = arith.constant 0.000000e+00 : f32
    %140 = vector.shape_cast %20 : vector<1x256xi1> to vector<1x256xi1>
    %141 = vector.broadcast %140 : vector<1x256xi1> to vector<24x256xi1>
    %142 = vector.broadcast %cst_76 : f32 to vector<24x256xf32>
    %143 = arith.select %141, %139, %142 : vector<24x256xi1>, vector<24x256xf32>
    %c48 = arith.constant 48 : index
    %c0_77 = arith.constant 0 : index
    %144 = vector.load %arg18[%c48, %c0_77] : memref<216x256xf32, #tpu.memory_space<vmem>>, vector<24x256xf32>
    tpu.vector_store %arg18[%c48, %c0_77], %143 {strides = array<i32>} : memref<216x256xf32, #tpu.memory_space<vmem>>, vector<24x256xf32>,
    %c1_i32_78 = arith.constant 1 : i32
    %145 = tpu.dynamic_rotate %126 by %c1_i32_78 dim 1 : vector<24x256xf32>, i32 -> vector<24x256xf32>
    %cst_79 = arith.constant 0.000000e+00 : f32
    %146 = vector.shape_cast %22 : vector<1x256xi1> to vector<1x256xi1>
    %147 = vector.broadcast %146 : vector<1x256xi1> to vector<24x256xi1>
    %148 = vector.broadcast %cst_79 : f32 to vector<24x256xf32>
    %149 = arith.select %147, %145, %148 : vector<24x256xi1>, vector<24x256xf32>
    %c72 = arith.constant 72 : index
    %c0_80 = arith.constant 0 : index
    %150 = vector.load %arg18[%c72, %c0_80] : memref<216x256xf32, #tpu.memory_space<vmem>>, vector<24x256xf32>
    tpu.vector_store %arg18[%c72, %c0_80], %149 {strides = array<i32>} : memref<216x256xf32, #tpu.memory_space<vmem>>, vector<24x256xf32>,
    %c96 = arith.constant 96 : index
    %c0_81 = arith.constant 0 : index
    %151 = vector.load %arg18[%c96, %c0_81] : memref<216x256xf32, #tpu.memory_space<vmem>>, vector<24x256xf32>
    tpu.vector_store %arg18[%c96, %c0_81], %126 {strides = array<i32>} : memref<216x256xf32, #tpu.memory_space<vmem>>, vector<24x256xf32>,
    %c255_i32_82 = arith.constant 255 : i32
    %152 = tpu.dynamic_rotate %126 by %c255_i32_82 dim 1 : vector<24x256xf32>, i32 -> vector<24x256xf32>
    %cst_83 = arith.constant 0.000000e+00 : f32
    %153 = vector.shape_cast %24 : vector<1x256xi1> to vector<1x256xi1>
    %154 = vector.broadcast %153 : vector<1x256xi1> to vector<24x256xi1>
    %155 = vector.broadcast %cst_83 : f32 to vector<24x256xf32>
    %156 = arith.select %154, %152, %155 : vector<24x256xi1>, vector<24x256xf32>
    %c120 = arith.constant 120 : index
    %c0_84 = arith.constant 0 : index
    %157 = vector.load %arg18[%c120, %c0_84] : memref<216x256xf32, #tpu.memory_space<vmem>>, vector<24x256xf32>
    tpu.vector_store %arg18[%c120, %c0_84], %156 {strides = array<i32>} : memref<216x256xf32, #tpu.memory_space<vmem>>, vector<24x256xf32>,
    %c241_i32_85 = arith.constant 241 : i32
    %158 = tpu.dynamic_rotate %126 by %c241_i32_85 dim 1 : vector<24x256xf32>, i32 -> vector<24x256xf32>
    %cst_86 = arith.constant 0.000000e+00 : f32
    %159 = vector.shape_cast %29 : vector<1x256xi1> to vector<1x256xi1>
    %160 = vector.broadcast %159 : vector<1x256xi1> to vector<24x256xi1>
    %161 = vector.broadcast %cst_86 : f32 to vector<24x256xf32>
    %162 = arith.select %160, %158, %161 : vector<24x256xi1>, vector<24x256xf32>
    %c144 = arith.constant 144 : index
    %c0_87 = arith.constant 0 : index
    %163 = vector.load %arg18[%c144, %c0_87] : memref<216x256xf32, #tpu.memory_space<vmem>>, vector<24x256xf32>
    tpu.vector_store %arg18[%c144, %c0_87], %162 {strides = array<i32>} : memref<216x256xf32, #tpu.memory_space<vmem>>, vector<24x256xf32>,
    %c240_i32_88 = arith.constant 240 : i32
    %164 = tpu.dynamic_rotate %126 by %c240_i32_88 dim 1 : vector<24x256xf32>, i32 -> vector<24x256xf32>
    %cst_89 = arith.constant 0.000000e+00 : f32
    %165 = vector.shape_cast %31 : vector<1x256xi1> to vector<1x256xi1>
    %166 = vector.broadcast %165 : vector<1x256xi1> to vector<24x256xi1>
    %167 = vector.broadcast %cst_89 : f32 to vector<24x256xf32>
    %168 = arith.select %166, %164, %167 : vector<24x256xi1>, vector<24x256xf32>
    %c168 = arith.constant 168 : index
    %c0_90 = arith.constant 0 : index
    %169 = vector.load %arg18[%c168, %c0_90] : memref<216x256xf32, #tpu.memory_space<vmem>>, vector<24x256xf32>
    tpu.vector_store %arg18[%c168, %c0_90], %168 {strides = array<i32>} : memref<216x256xf32, #tpu.memory_space<vmem>>, vector<24x256xf32>,
    %c239_i32_91 = arith.constant 239 : i32
    %170 = tpu.dynamic_rotate %126 by %c239_i32_91 dim 1 : vector<24x256xf32>, i32 -> vector<24x256xf32>
    %cst_92 = arith.constant 0.000000e+00 : f32
    %171 = vector.shape_cast %36 : vector<1x256xi1> to vector<1x256xi1>
    %172 = vector.broadcast %171 : vector<1x256xi1> to vector<24x256xi1>
    %173 = vector.broadcast %cst_92 : f32 to vector<24x256xf32>
    %174 = arith.select %172, %170, %173 : vector<24x256xi1>, vector<24x256xf32>
    %c192 = arith.constant 192 : index
    %c0_93 = arith.constant 0 : index
    %175 = vector.load %arg18[%c192, %c0_93] : memref<216x256xf32, #tpu.memory_space<vmem>>, vector<24x256xf32>
    tpu.vector_store %arg18[%c192, %c0_93], %174 {strides = array<i32>} : memref<216x256xf32, #tpu.memory_space<vmem>>, vector<24x256xf32>,
    %c0_94 = arith.constant 0 : index
    %c0_95 = arith.constant 0 : index
    %176 = vector.load %arg5[%c0_94, %c0_95] : memref<24x216xf32, #tpu.memory_space<vmem>>, vector<24x216xf32>
    %c0_96 = arith.constant 0 : index
    %c0_97 = arith.constant 0 : index
    %177 = vector.load %arg18[%c0_96, %c0_97] : memref<216x256xf32, #tpu.memory_space<vmem>>, vector<216x256xf32>
    %cst_98 = arith.constant dense<0.000000e+00> : vector<24x256xf32>
    %178 = tpu.matmul %176, %177, %cst_98 {dimension_numbers = #tpu.dot_dimension_numbers<[1], [0], [0], [1], [0, 0, 1, 1], [], []>} : vector<24x216xf32>, vector<216x256xf32>, vector<24x256xf32> -> vector<24x256xf32>
    %c0_99 = arith.constant 0 : index
    %c0_100 = arith.constant 0 : index
    %179 = vector.load %arg6[%c0_99, %c0_100] : memref<24x1xf32, #tpu.memory_space<vmem>>, vector<24x1xf32>
    %180 = vector.broadcast %179 : vector<24x1xf32> to vector<24x256xf32>
    %181 = arith.addf %178, %180 : vector<24x256xf32>
    %cst_101 = arith.constant 0.000000e+00 : f32
    %182 = vector.broadcast %cst_101 : f32 to vector<24x256xf32>
    %183 = arith.maximumf %181, %182 : vector<24x256xf32>
    %c17_i32_102 = arith.constant 17 : i32
    %184 = tpu.dynamic_rotate %183 by %c17_i32_102 dim 1 : vector<24x256xf32>, i32 -> vector<24x256xf32>
    %cst_103 = arith.constant 0.000000e+00 : f32
    %185 = vector.shape_cast %13 : vector<1x256xi1> to vector<1x256xi1>
    %186 = vector.broadcast %185 : vector<1x256xi1> to vector<24x256xi1>
    %187 = vector.broadcast %cst_103 : f32 to vector<24x256xf32>
    %188 = arith.select %186, %184, %187 : vector<24x256xi1>, vector<24x256xf32>
    %c0_104 = arith.constant 0 : index
    %c0_105 = arith.constant 0 : index
    %189 = vector.load %arg18[%c0_104, %c0_105] : memref<216x256xf32, #tpu.memory_space<vmem>>, vector<24x256xf32>
    tpu.vector_store %arg18[%c0_104, %c0_105], %188 {strides = array<i32>} : memref<216x256xf32, #tpu.memory_space<vmem>>, vector<24x256xf32>,
    %c16_i32_106 = arith.constant 16 : i32
    %190 = tpu.dynamic_rotate %183 by %c16_i32_106 dim 1 : vector<24x256xf32>, i32 -> vector<24x256xf32>
    %cst_107 = arith.constant 0.000000e+00 : f32
    %191 = vector.shape_cast %15 : vector<1x256xi1> to vector<1x256xi1>
    %192 = vector.broadcast %191 : vector<1x256xi1> to vector<24x256xi1>
    %193 = vector.broadcast %cst_107 : f32 to vector<24x256xf32>
    %194 = arith.select %192, %190, %193 : vector<24x256xi1>, vector<24x256xf32>
    %c24_108 = arith.constant 24 : index
    %c0_109 = arith.constant 0 : index
    %195 = vector.load %arg18[%c24_108, %c0_109] : memref<216x256xf32, #tpu.memory_space<vmem>>, vector<24x256xf32>
    tpu.vector_store %arg18[%c24_108, %c0_109], %194 {strides = array<i32>} : memref<216x256xf32, #tpu.memory_space<vmem>>, vector<24x256xf32>,
    %c15_i32_110 = arith.constant 15 : i32
    %196 = tpu.dynamic_rotate %183 by %c15_i32_110 dim 1 : vector<24x256xf32>, i32 -> vector<24x256xf32>
    %cst_111 = arith.constant 0.000000e+00 : f32
    %197 = vector.shape_cast %20 : vector<1x256xi1> to vector<1x256xi1>
    %198 = vector.broadcast %197 : vector<1x256xi1> to vector<24x256xi1>
    %199 = vector.broadcast %cst_111 : f32 to vector<24x256xf32>
    %200 = arith.select %198, %196, %199 : vector<24x256xi1>, vector<24x256xf32>
    %c48_112 = arith.constant 48 : index
    %c0_113 = arith.constant 0 : index
    %201 = vector.load %arg18[%c48_112, %c0_113] : memref<216x256xf32, #tpu.memory_space<vmem>>, vector<24x256xf32>
    tpu.vector_store %arg18[%c48_112, %c0_113], %200 {strides = array<i32>} : memref<216x256xf32, #tpu.memory_space<vmem>>, vector<24x256xf32>,
    %c1_i32_114 = arith.constant 1 : i32
    %202 = tpu.dynamic_rotate %183 by %c1_i32_114 dim 1 : vector<24x256xf32>, i32 -> vector<24x256xf32>
    %cst_115 = arith.constant 0.000000e+00 : f32
    %203 = vector.shape_cast %22 : vector<1x256xi1> to vector<1x256xi1>
    %204 = vector.broadcast %203 : vector<1x256xi1> to vector<24x256xi1>
    %205 = vector.broadcast %cst_115 : f32 to vector<24x256xf32>
    %206 = arith.select %204, %202, %205 : vector<24x256xi1>, vector<24x256xf32>
    %c72_116 = arith.constant 72 : index
    %c0_117 = arith.constant 0 : index
    %207 = vector.load %arg18[%c72_116, %c0_117] : memref<216x256xf32, #tpu.memory_space<vmem>>, vector<24x256xf32>
    tpu.vector_store %arg18[%c72_116, %c0_117], %206 {strides = array<i32>} : memref<216x256xf32, #tpu.memory_space<vmem>>, vector<24x256xf32>,
    %c96_118 = arith.constant 96 : index
    %c0_119 = arith.constant 0 : index
    %208 = vector.load %arg18[%c96_118, %c0_119] : memref<216x256xf32, #tpu.memory_space<vmem>>, vector<24x256xf32>
    tpu.vector_store %arg18[%c96_118, %c0_119], %183 {strides = array<i32>} : memref<216x256xf32, #tpu.memory_space<vmem>>, vector<24x256xf32>,
    %c255_i32_120 = arith.constant 255 : i32
    %209 = tpu.dynamic_rotate %183 by %c255_i32_120 dim 1 : vector<24x256xf32>, i32 -> vector<24x256xf32>
    %cst_121 = arith.constant 0.000000e+00 : f32
    %210 = vector.shape_cast %24 : vector<1x256xi1> to vector<1x256xi1>
    %211 = vector.broadcast %210 : vector<1x256xi1> to vector<24x256xi1>
    %212 = vector.broadcast %cst_121 : f32 to vector<24x256xf32>
    %213 = arith.select %211, %209, %212 : vector<24x256xi1>, vector<24x256xf32>
    %c120_122 = arith.constant 120 : index
    %c0_123 = arith.constant 0 : index
    %214 = vector.load %arg18[%c120_122, %c0_123] : memref<216x256xf32, #tpu.memory_space<vmem>>, vector<24x256xf32>
    tpu.vector_store %arg18[%c120_122, %c0_123], %213 {strides = array<i32>} : memref<216x256xf32, #tpu.memory_space<vmem>>, vector<24x256xf32>,
    %c241_i32_124 = arith.constant 241 : i32
    %215 = tpu.dynamic_rotate %183 by %c241_i32_124 dim 1 : vector<24x256xf32>, i32 -> vector<24x256xf32>
    %cst_125 = arith.constant 0.000000e+00 : f32
    %216 = vector.shape_cast %29 : vector<1x256xi1> to vector<1x256xi1>
    %217 = vector.broadcast %216 : vector<1x256xi1> to vector<24x256xi1>
    %218 = vector.broadcast %cst_125 : f32 to vector<24x256xf32>
    %219 = arith.select %217, %215, %218 : vector<24x256xi1>, vector<24x256xf32>
    %c144_126 = arith.constant 144 : index
    %c0_127 = arith.constant 0 : index
    %220 = vector.load %arg18[%c144_126, %c0_127] : memref<216x256xf32, #tpu.memory_space<vmem>>, vector<24x256xf32>
    tpu.vector_store %arg18[%c144_126, %c0_127], %219 {strides = array<i32>} : memref<216x256xf32, #tpu.memory_space<vmem>>, vector<24x256xf32>,
    %c240_i32_128 = arith.constant 240 : i32
    %221 = tpu.dynamic_rotate %183 by %c240_i32_128 dim 1 : vector<24x256xf32>, i32 -> vector<24x256xf32>
    %cst_129 = arith.constant 0.000000e+00 : f32
    %222 = vector.shape_cast %31 : vector<1x256xi1> to vector<1x256xi1>
    %223 = vector.broadcast %222 : vector<1x256xi1> to vector<24x256xi1>
    %224 = vector.broadcast %cst_129 : f32 to vector<24x256xf32>
    %225 = arith.select %223, %221, %224 : vector<24x256xi1>, vector<24x256xf32>
    %c168_130 = arith.constant 168 : index
    %c0_131 = arith.constant 0 : index
    %226 = vector.load %arg18[%c168_130, %c0_131] : memref<216x256xf32, #tpu.memory_space<vmem>>, vector<24x256xf32>
    tpu.vector_store %arg18[%c168_130, %c0_131], %225 {strides = array<i32>} : memref<216x256xf32, #tpu.memory_space<vmem>>, vector<24x256xf32>,
    %c239_i32_132 = arith.constant 239 : i32
    %227 = tpu.dynamic_rotate %183 by %c239_i32_132 dim 1 : vector<24x256xf32>, i32 -> vector<24x256xf32>
    %cst_133 = arith.constant 0.000000e+00 : f32
    %228 = vector.shape_cast %36 : vector<1x256xi1> to vector<1x256xi1>
    %229 = vector.broadcast %228 : vector<1x256xi1> to vector<24x256xi1>
    %230 = vector.broadcast %cst_133 : f32 to vector<24x256xf32>
    %231 = arith.select %229, %227, %230 : vector<24x256xi1>, vector<24x256xf32>
    %c192_134 = arith.constant 192 : index
    %c0_135 = arith.constant 0 : index
    %232 = vector.load %arg18[%c192_134, %c0_135] : memref<216x256xf32, #tpu.memory_space<vmem>>, vector<24x256xf32>
    tpu.vector_store %arg18[%c192_134, %c0_135], %231 {strides = array<i32>} : memref<216x256xf32, #tpu.memory_space<vmem>>, vector<24x256xf32>,
    %c0_136 = arith.constant 0 : index
    %c0_137 = arith.constant 0 : index
    %233 = vector.load %arg7[%c0_136, %c0_137] : memref<3x216xf32, #tpu.memory_space<vmem>>, vector<3x216xf32>
    %c0_138 = arith.constant 0 : index
    %c0_139 = arith.constant 0 : index
    %234 = vector.load %arg18[%c0_138, %c0_139] : memref<216x256xf32, #tpu.memory_space<vmem>>, vector<216x256xf32>
    %cst_140 = arith.constant dense<0.000000e+00> : vector<3x256xf32>
    %235 = tpu.matmul %233, %234, %cst_140 {dimension_numbers = #tpu.dot_dimension_numbers<[1], [0], [0], [1], [0, 0, 1, 1], [], []>} : vector<3x216xf32>, vector<216x256xf32>, vector<3x256xf32> -> vector<3x256xf32>
    %c0_141 = arith.constant 0 : index
    %c0_142 = arith.constant 0 : index
    %236 = vector.load %arg8[%c0_141, %c0_142] : memref<3x1xf32, #tpu.memory_space<vmem>>, vector<3x1xf32>
    %237 = vector.broadcast %236 : vector<3x1xf32> to vector<3x256xf32>
    %238 = arith.addf %235, %237 : vector<3x256xf32>
    %cst_143 = arith.constant 1.000000e+00 : f32
    %239 = vector.broadcast %cst_143 : f32 to vector<3x256xf32>
    %240 = arith.addf %239, %238 : vector<3x256xf32>
    %241 = arith.mulf %240, %1 : vector<3x256xf32>
    %242 = vector.shape_cast %238 : vector<3x256xf32> to vector<1x3x256xf32>
    %c0_144 = arith.constant 0 : index
    %c0_145 = arith.constant 0 : index
    %c0_146 = arith.constant 0 : index
    %c0_147 = arith.constant 0 : index
    %243 = vector.load %arg15[%c0_144, %c0_145, %c0_146, %c0_147] : memref<5x1x3x256xf32, #tpu.memory_space<vmem>>, vector<1x1x3x256xf32>
    %244 = vector.shape_cast %243 : vector<1x1x3x256xf32> to vector<1x3x256xf32>
    %245 = vector.shape_cast %242 : vector<1x3x256xf32> to vector<1x1x3x256xf32>
    tpu.vector_store %arg15[%c0_144, %c0_145, %c0_146, %c0_147], %245 {strides = array<i32>} : memref<5x1x3x256xf32, #tpu.memory_space<vmem>>, vector<1x1x3x256xf32>,
    %246 = vector.shape_cast %241 : vector<3x256xf32> to vector<1x3x256xf32>
    %c0_148 = arith.constant 0 : index
    %c0_149 = arith.constant 0 : index
    %c0_150 = arith.constant 0 : index
    %c0_151 = arith.constant 0 : index
    %247 = vector.load %arg16[%c0_148, %c0_149, %c0_150, %c0_151] : memref<5x1x3x256xf32, #tpu.memory_space<vmem>>, vector<1x1x3x256xf32>
    %248 = vector.shape_cast %247 : vector<1x1x3x256xf32> to vector<1x3x256xf32>
    %249 = vector.shape_cast %246 : vector<1x3x256xf32> to vector<1x1x3x256xf32>
    tpu.vector_store %arg16[%c0_148, %c0_149, %c0_150, %c0_151], %249 {strides = array<i32>} : memref<5x1x3x256xf32, #tpu.memory_space<vmem>>, vector<1x1x3x256xf32>,
    %c1_i32_152 = arith.constant 1 : i32
    %c4_i32_153 = arith.constant 4 : i32
    %250 = arith.addi %c1_i32_152, %c4_i32_153 : i32
    %c1_i32_154 = arith.constant 1 : i32
    %251:2 = scf.for %arg19 = %c1_i32_152 to %250 step %c1_i32_154 iter_args(%arg20 = %238, %arg21 = %241) -> (vector<3x256xf32>, vector<3x256xf32>)  : i32 {
      %c17_i32_156 = arith.constant 17 : i32
      %252 = tpu.dynamic_rotate %arg21 by %c17_i32_156 dim 1 : vector<3x256xf32>, i32 -> vector<3x256xf32>
      %cst_157 = arith.constant 0.000000e+00 : f32
      %253 = vector.shape_cast %13 : vector<1x256xi1> to vector<1x256xi1>
      %254 = vector.broadcast %253 : vector<1x256xi1> to vector<3x256xi1>
      %255 = vector.broadcast %cst_157 : f32 to vector<3x256xf32>
      %256 = arith.select %254, %252, %255 : vector<3x256xi1>, vector<3x256xf32>
      %c36 = arith.constant 36 : index
      %c0_158 = arith.constant 0 : index
      %257 = vector.load %arg17[%c36, %c0_158] : memref<90x256xf32, #tpu.memory_space<vmem>>, vector<3x256xf32>
      tpu.vector_store %arg17[%c36, %c0_158], %256 {strides = array<i32>} : memref<90x256xf32, #tpu.memory_space<vmem>>, vector<3x256xf32>,
      %c16_i32_159 = arith.constant 16 : i32
      %258 = tpu.dynamic_rotate %arg21 by %c16_i32_159 dim 1 : vector<3x256xf32>, i32 -> vector<3x256xf32>
      %cst_160 = arith.constant 0.000000e+00 : f32
      %259 = vector.shape_cast %15 : vector<1x256xi1> to vector<1x256xi1>
      %260 = vector.broadcast %259 : vector<1x256xi1> to vector<3x256xi1>
      %261 = vector.broadcast %cst_160 : f32 to vector<3x256xf32>
      %262 = arith.select %260, %258, %261 : vector<3x256xi1>, vector<3x256xf32>
      %c39 = arith.constant 39 : index
      %c0_161 = arith.constant 0 : index
      %263 = vector.load %arg17[%c39, %c0_161] : memref<90x256xf32, #tpu.memory_space<vmem>>, vector<3x256xf32>
      tpu.vector_store %arg17[%c39, %c0_161], %262 {strides = array<i32>} : memref<90x256xf32, #tpu.memory_space<vmem>>, vector<3x256xf32>,
      %c15_i32_162 = arith.constant 15 : i32
      %264 = tpu.dynamic_rotate %arg21 by %c15_i32_162 dim 1 : vector<3x256xf32>, i32 -> vector<3x256xf32>
      %cst_163 = arith.constant 0.000000e+00 : f32
      %265 = vector.shape_cast %20 : vector<1x256xi1> to vector<1x256xi1>
      %266 = vector.broadcast %265 : vector<1x256xi1> to vector<3x256xi1>
      %267 = vector.broadcast %cst_163 : f32 to vector<3x256xf32>
      %268 = arith.select %266, %264, %267 : vector<3x256xi1>, vector<3x256xf32>
      %c42 = arith.constant 42 : index
      %c0_164 = arith.constant 0 : index
      %269 = vector.load %arg17[%c42, %c0_164] : memref<90x256xf32, #tpu.memory_space<vmem>>, vector<3x256xf32>
      tpu.vector_store %arg17[%c42, %c0_164], %268 {strides = array<i32>} : memref<90x256xf32, #tpu.memory_space<vmem>>, vector<3x256xf32>,
      %c1_i32_165 = arith.constant 1 : i32
      %270 = tpu.dynamic_rotate %arg21 by %c1_i32_165 dim 1 : vector<3x256xf32>, i32 -> vector<3x256xf32>
      %cst_166 = arith.constant 0.000000e+00 : f32
      %271 = vector.shape_cast %22 : vector<1x256xi1> to vector<1x256xi1>
      %272 = vector.broadcast %271 : vector<1x256xi1> to vector<3x256xi1>
      %273 = vector.broadcast %cst_166 : f32 to vector<3x256xf32>
      %274 = arith.select %272, %270, %273 : vector<3x256xi1>, vector<3x256xf32>
      %c45 = arith.constant 45 : index
      %c0_167 = arith.constant 0 : index
      %275 = vector.load %arg17[%c45, %c0_167] : memref<90x256xf32, #tpu.memory_space<vmem>>, vector<3x256xf32>
      tpu.vector_store %arg17[%c45, %c0_167], %274 {strides = array<i32>} : memref<90x256xf32, #tpu.memory_space<vmem>>, vector<3x256xf32>,
      %c48_168 = arith.constant 48 : index
      %c0_169 = arith.constant 0 : index
      %276 = vector.load %arg17[%c48_168, %c0_169] : memref<90x256xf32, #tpu.memory_space<vmem>>, vector<3x256xf32>
      tpu.vector_store %arg17[%c48_168, %c0_169], %arg21 {strides = array<i32>} : memref<90x256xf32, #tpu.memory_space<vmem>>, vector<3x256xf32>,
      %c255_i32_170 = arith.constant 255 : i32
      %277 = tpu.dynamic_rotate %arg21 by %c255_i32_170 dim 1 : vector<3x256xf32>, i32 -> vector<3x256xf32>
      %cst_171 = arith.constant 0.000000e+00 : f32
      %278 = vector.shape_cast %24 : vector<1x256xi1> to vector<1x256xi1>
      %279 = vector.broadcast %278 : vector<1x256xi1> to vector<3x256xi1>
      %280 = vector.broadcast %cst_171 : f32 to vector<3x256xf32>
      %281 = arith.select %279, %277, %280 : vector<3x256xi1>, vector<3x256xf32>
      %c51 = arith.constant 51 : index
      %c0_172 = arith.constant 0 : index
      %282 = vector.load %arg17[%c51, %c0_172] : memref<90x256xf32, #tpu.memory_space<vmem>>, vector<3x256xf32>
      tpu.vector_store %arg17[%c51, %c0_172], %281 {strides = array<i32>} : memref<90x256xf32, #tpu.memory_space<vmem>>, vector<3x256xf32>,
      %c241_i32_173 = arith.constant 241 : i32
      %283 = tpu.dynamic_rotate %arg21 by %c241_i32_173 dim 1 : vector<3x256xf32>, i32 -> vector<3x256xf32>
      %cst_174 = arith.constant 0.000000e+00 : f32
      %284 = vector.shape_cast %29 : vector<1x256xi1> to vector<1x256xi1>
      %285 = vector.broadcast %284 : vector<1x256xi1> to vector<3x256xi1>
      %286 = vector.broadcast %cst_174 : f32 to vector<3x256xf32>
      %287 = arith.select %285, %283, %286 : vector<3x256xi1>, vector<3x256xf32>
      %c54 = arith.constant 54 : index
      %c0_175 = arith.constant 0 : index
      %288 = vector.load %arg17[%c54, %c0_175] : memref<90x256xf32, #tpu.memory_space<vmem>>, vector<3x256xf32>
      tpu.vector_store %arg17[%c54, %c0_175], %287 {strides = array<i32>} : memref<90x256xf32, #tpu.memory_space<vmem>>, vector<3x256xf32>,
      %c240_i32_176 = arith.constant 240 : i32
      %289 = tpu.dynamic_rotate %arg21 by %c240_i32_176 dim 1 : vector<3x256xf32>, i32 -> vector<3x256xf32>
      %cst_177 = arith.constant 0.000000e+00 : f32
      %290 = vector.shape_cast %31 : vector<1x256xi1> to vector<1x256xi1>
      %291 = vector.broadcast %290 : vector<1x256xi1> to vector<3x256xi1>
      %292 = vector.broadcast %cst_177 : f32 to vector<3x256xf32>
      %293 = arith.select %291, %289, %292 : vector<3x256xi1>, vector<3x256xf32>
      %c57 = arith.constant 57 : index
      %c0_178 = arith.constant 0 : index
      %294 = vector.load %arg17[%c57, %c0_178] : memref<90x256xf32, #tpu.memory_space<vmem>>, vector<3x256xf32>
      tpu.vector_store %arg17[%c57, %c0_178], %293 {strides = array<i32>} : memref<90x256xf32, #tpu.memory_space<vmem>>, vector<3x256xf32>,
      %c239_i32_179 = arith.constant 239 : i32
      %295 = tpu.dynamic_rotate %arg21 by %c239_i32_179 dim 1 : vector<3x256xf32>, i32 -> vector<3x256xf32>
      %cst_180 = arith.constant 0.000000e+00 : f32
      %296 = vector.shape_cast %36 : vector<1x256xi1> to vector<1x256xi1>
      %297 = vector.broadcast %296 : vector<1x256xi1> to vector<3x256xi1>
      %298 = vector.broadcast %cst_180 : f32 to vector<3x256xf32>
      %299 = arith.select %297, %295, %298 : vector<3x256xi1>, vector<3x256xf32>
      %c60 = arith.constant 60 : index
      %c0_181 = arith.constant 0 : index
      %300 = vector.load %arg17[%c60, %c0_181] : memref<90x256xf32, #tpu.memory_space<vmem>>, vector<3x256xf32>
      tpu.vector_store %arg17[%c60, %c0_181], %299 {strides = array<i32>} : memref<90x256xf32, #tpu.memory_space<vmem>>, vector<3x256xf32>,
      %c17_i32_182 = arith.constant 17 : i32
      %301 = tpu.dynamic_rotate %arg20 by %c17_i32_182 dim 1 : vector<3x256xf32>, i32 -> vector<3x256xf32>
      %cst_183 = arith.constant 0.000000e+00 : f32
      %302 = vector.shape_cast %13 : vector<1x256xi1> to vector<1x256xi1>
      %303 = vector.broadcast %302 : vector<1x256xi1> to vector<3x256xi1>
      %304 = vector.broadcast %cst_183 : f32 to vector<3x256xf32>
      %305 = arith.select %303, %301, %304 : vector<3x256xi1>, vector<3x256xf32>
      %c63 = arith.constant 63 : index
      %c0_184 = arith.constant 0 : index
      %306 = vector.load %arg17[%c63, %c0_184] : memref<90x256xf32, #tpu.memory_space<vmem>>, vector<3x256xf32>
      tpu.vector_store %arg17[%c63, %c0_184], %305 {strides = array<i32>} : memref<90x256xf32, #tpu.memory_space<vmem>>, vector<3x256xf32>,
      %c16_i32_185 = arith.constant 16 : i32
      %307 = tpu.dynamic_rotate %arg20 by %c16_i32_185 dim 1 : vector<3x256xf32>, i32 -> vector<3x256xf32>
      %cst_186 = arith.constant 0.000000e+00 : f32
      %308 = vector.shape_cast %15 : vector<1x256xi1> to vector<1x256xi1>
      %309 = vector.broadcast %308 : vector<1x256xi1> to vector<3x256xi1>
      %310 = vector.broadcast %cst_186 : f32 to vector<3x256xf32>
      %311 = arith.select %309, %307, %310 : vector<3x256xi1>, vector<3x256xf32>
      %c66 = arith.constant 66 : index
      %c0_187 = arith.constant 0 : index
      %312 = vector.load %arg17[%c66, %c0_187] : memref<90x256xf32, #tpu.memory_space<vmem>>, vector<3x256xf32>
      tpu.vector_store %arg17[%c66, %c0_187], %311 {strides = array<i32>} : memref<90x256xf32, #tpu.memory_space<vmem>>, vector<3x256xf32>,
      %c15_i32_188 = arith.constant 15 : i32
      %313 = tpu.dynamic_rotate %arg20 by %c15_i32_188 dim 1 : vector<3x256xf32>, i32 -> vector<3x256xf32>
      %cst_189 = arith.constant 0.000000e+00 : f32
      %314 = vector.shape_cast %20 : vector<1x256xi1> to vector<1x256xi1>
      %315 = vector.broadcast %314 : vector<1x256xi1> to vector<3x256xi1>
      %316 = vector.broadcast %cst_189 : f32 to vector<3x256xf32>
      %317 = arith.select %315, %313, %316 : vector<3x256xi1>, vector<3x256xf32>
      %c69 = arith.constant 69 : index
      %c0_190 = arith.constant 0 : index
      %318 = vector.load %arg17[%c69, %c0_190] : memref<90x256xf32, #tpu.memory_space<vmem>>, vector<3x256xf32>
      tpu.vector_store %arg17[%c69, %c0_190], %317 {strides = array<i32>} : memref<90x256xf32, #tpu.memory_space<vmem>>, vector<3x256xf32>,
      %c1_i32_191 = arith.constant 1 : i32
      %319 = tpu.dynamic_rotate %arg20 by %c1_i32_191 dim 1 : vector<3x256xf32>, i32 -> vector<3x256xf32>
      %cst_192 = arith.constant 0.000000e+00 : f32
      %320 = vector.shape_cast %22 : vector<1x256xi1> to vector<1x256xi1>
      %321 = vector.broadcast %320 : vector<1x256xi1> to vector<3x256xi1>
      %322 = vector.broadcast %cst_192 : f32 to vector<3x256xf32>
      %323 = arith.select %321, %319, %322 : vector<3x256xi1>, vector<3x256xf32>
      %c72_193 = arith.constant 72 : index
      %c0_194 = arith.constant 0 : index
      %324 = vector.load %arg17[%c72_193, %c0_194] : memref<90x256xf32, #tpu.memory_space<vmem>>, vector<3x256xf32>
      tpu.vector_store %arg17[%c72_193, %c0_194], %323 {strides = array<i32>} : memref<90x256xf32, #tpu.memory_space<vmem>>, vector<3x256xf32>,
      %c75 = arith.constant 75 : index
      %c0_195 = arith.constant 0 : index
      %325 = vector.load %arg17[%c75, %c0_195] : memref<90x256xf32, #tpu.memory_space<vmem>>, vector<3x256xf32>
      tpu.vector_store %arg17[%c75, %c0_195], %arg20 {strides = array<i32>} : memref<90x256xf32, #tpu.memory_space<vmem>>, vector<3x256xf32>,
      %c255_i32_196 = arith.constant 255 : i32
      %326 = tpu.dynamic_rotate %arg20 by %c255_i32_196 dim 1 : vector<3x256xf32>, i32 -> vector<3x256xf32>
      %cst_197 = arith.constant 0.000000e+00 : f32
      %327 = vector.shape_cast %24 : vector<1x256xi1> to vector<1x256xi1>
      %328 = vector.broadcast %327 : vector<1x256xi1> to vector<3x256xi1>
      %329 = vector.broadcast %cst_197 : f32 to vector<3x256xf32>
      %330 = arith.select %328, %326, %329 : vector<3x256xi1>, vector<3x256xf32>
      %c78 = arith.constant 78 : index
      %c0_198 = arith.constant 0 : index
      %331 = vector.load %arg17[%c78, %c0_198] : memref<90x256xf32, #tpu.memory_space<vmem>>, vector<3x256xf32>
      tpu.vector_store %arg17[%c78, %c0_198], %330 {strides = array<i32>} : memref<90x256xf32, #tpu.memory_space<vmem>>, vector<3x256xf32>,
      %c241_i32_199 = arith.constant 241 : i32
      %332 = tpu.dynamic_rotate %arg20 by %c241_i32_199 dim 1 : vector<3x256xf32>, i32 -> vector<3x256xf32>
      %cst_200 = arith.constant 0.000000e+00 : f32
      %333 = vector.shape_cast %29 : vector<1x256xi1> to vector<1x256xi1>
      %334 = vector.broadcast %333 : vector<1x256xi1> to vector<3x256xi1>
      %335 = vector.broadcast %cst_200 : f32 to vector<3x256xf32>
      %336 = arith.select %334, %332, %335 : vector<3x256xi1>, vector<3x256xf32>
      %c81 = arith.constant 81 : index
      %c0_201 = arith.constant 0 : index
      %337 = vector.load %arg17[%c81, %c0_201] : memref<90x256xf32, #tpu.memory_space<vmem>>, vector<3x256xf32>
      tpu.vector_store %arg17[%c81, %c0_201], %336 {strides = array<i32>} : memref<90x256xf32, #tpu.memory_space<vmem>>, vector<3x256xf32>,
      %c240_i32_202 = arith.constant 240 : i32
      %338 = tpu.dynamic_rotate %arg20 by %c240_i32_202 dim 1 : vector<3x256xf32>, i32 -> vector<3x256xf32>
      %cst_203 = arith.constant 0.000000e+00 : f32
      %339 = vector.shape_cast %31 : vector<1x256xi1> to vector<1x256xi1>
      %340 = vector.broadcast %339 : vector<1x256xi1> to vector<3x256xi1>
      %341 = vector.broadcast %cst_203 : f32 to vector<3x256xf32>
      %342 = arith.select %340, %338, %341 : vector<3x256xi1>, vector<3x256xf32>
      %c84 = arith.constant 84 : index
      %c0_204 = arith.constant 0 : index
      %343 = vector.load %arg17[%c84, %c0_204] : memref<90x256xf32, #tpu.memory_space<vmem>>, vector<3x256xf32>
      tpu.vector_store %arg17[%c84, %c0_204], %342 {strides = array<i32>} : memref<90x256xf32, #tpu.memory_space<vmem>>, vector<3x256xf32>,
      %c239_i32_205 = arith.constant 239 : i32
      %344 = tpu.dynamic_rotate %arg20 by %c239_i32_205 dim 1 : vector<3x256xf32>, i32 -> vector<3x256xf32>
      %cst_206 = arith.constant 0.000000e+00 : f32
      %345 = vector.shape_cast %36 : vector<1x256xi1> to vector<1x256xi1>
      %346 = vector.broadcast %345 : vector<1x256xi1> to vector<3x256xi1>
      %347 = vector.broadcast %cst_206 : f32 to vector<3x256xf32>
      %348 = arith.select %346, %344, %347 : vector<3x256xi1>, vector<3x256xf32>
      %c87 = arith.constant 87 : index
      %c0_207 = arith.constant 0 : index
      %349 = vector.load %arg17[%c87, %c0_207] : memref<90x256xf32, #tpu.memory_space<vmem>>, vector<3x256xf32>
      tpu.vector_store %arg17[%c87, %c0_207], %348 {strides = array<i32>} : memref<90x256xf32, #tpu.memory_space<vmem>>, vector<3x256xf32>,
      %c0_208 = arith.constant 0 : index
      %c0_209 = arith.constant 0 : index
      %350 = vector.load %arg9[%c0_208, %c0_209] : memref<16x90xf32, #tpu.memory_space<vmem>>, vector<16x90xf32>
      %c0_210 = arith.constant 0 : index
      %c0_211 = arith.constant 0 : index
      %351 = vector.load %arg17[%c0_210, %c0_211] : memref<90x256xf32, #tpu.memory_space<vmem>>, vector<90x256xf32>
      %cst_212 = arith.constant dense<0.000000e+00> : vector<16x256xf32>
      %352 = tpu.matmul %350, %351, %cst_212 {dimension_numbers = #tpu.dot_dimension_numbers<[1], [0], [0], [1], [0, 0, 1, 1], [], []>} : vector<16x90xf32>, vector<90x256xf32>, vector<16x256xf32> -> vector<16x256xf32>
      %c0_213 = arith.constant 0 : index
      %c0_214 = arith.constant 0 : index
      %353 = vector.load %arg10[%c0_213, %c0_214] : memref<16x1xf32, #tpu.memory_space<vmem>>, vector<16x1xf32>
      %354 = vector.broadcast %353 : vector<16x1xf32> to vector<16x256xf32>
      %355 = arith.addf %352, %354 : vector<16x256xf32>
      %cst_215 = arith.constant 0.000000e+00 : f32
      %356 = vector.broadcast %cst_215 : f32 to vector<16x256xf32>
      %357 = arith.maximumf %355, %356 : vector<16x256xf32>
      %c17_i32_216 = arith.constant 17 : i32
      %358 = tpu.dynamic_rotate %357 by %c17_i32_216 dim 1 : vector<16x256xf32>, i32 -> vector<16x256xf32>
      %cst_217 = arith.constant 0.000000e+00 : f32
      %359 = vector.shape_cast %13 : vector<1x256xi1> to vector<1x256xi1>
      %360 = vector.broadcast %359 : vector<1x256xi1> to vector<16x256xi1>
      %361 = vector.broadcast %cst_217 : f32 to vector<16x256xf32>
      %362 = arith.select %360, %358, %361 : vector<16x256xi1>, vector<16x256xf32>
      %c0_218 = arith.constant 0 : index
      %c0_219 = arith.constant 0 : index
      %363 = vector.load %arg18[%c0_218, %c0_219] : memref<216x256xf32, #tpu.memory_space<vmem>>, vector<16x256xf32>
      tpu.vector_store %arg18[%c0_218, %c0_219], %362 {strides = array<i32>} : memref<216x256xf32, #tpu.memory_space<vmem>>, vector<16x256xf32>,
      %c16_i32_220 = arith.constant 16 : i32
      %364 = tpu.dynamic_rotate %357 by %c16_i32_220 dim 1 : vector<16x256xf32>, i32 -> vector<16x256xf32>
      %cst_221 = arith.constant 0.000000e+00 : f32
      %365 = vector.shape_cast %15 : vector<1x256xi1> to vector<1x256xi1>
      %366 = vector.broadcast %365 : vector<1x256xi1> to vector<16x256xi1>
      %367 = vector.broadcast %cst_221 : f32 to vector<16x256xf32>
      %368 = arith.select %366, %364, %367 : vector<16x256xi1>, vector<16x256xf32>
      %c16 = arith.constant 16 : index
      %c0_222 = arith.constant 0 : index
      %369 = vector.load %arg18[%c16, %c0_222] : memref<216x256xf32, #tpu.memory_space<vmem>>, vector<16x256xf32>
      tpu.vector_store %arg18[%c16, %c0_222], %368 {strides = array<i32>} : memref<216x256xf32, #tpu.memory_space<vmem>>, vector<16x256xf32>,
      %c15_i32_223 = arith.constant 15 : i32
      %370 = tpu.dynamic_rotate %357 by %c15_i32_223 dim 1 : vector<16x256xf32>, i32 -> vector<16x256xf32>
      %cst_224 = arith.constant 0.000000e+00 : f32
      %371 = vector.shape_cast %20 : vector<1x256xi1> to vector<1x256xi1>
      %372 = vector.broadcast %371 : vector<1x256xi1> to vector<16x256xi1>
      %373 = vector.broadcast %cst_224 : f32 to vector<16x256xf32>
      %374 = arith.select %372, %370, %373 : vector<16x256xi1>, vector<16x256xf32>
      %c32_225 = arith.constant 32 : index
      %c0_226 = arith.constant 0 : index
      %375 = vector.load %arg18[%c32_225, %c0_226] : memref<216x256xf32, #tpu.memory_space<vmem>>, vector<16x256xf32>
      tpu.vector_store %arg18[%c32_225, %c0_226], %374 {strides = array<i32>} : memref<216x256xf32, #tpu.memory_space<vmem>>, vector<16x256xf32>,
      %c1_i32_227 = arith.constant 1 : i32
      %376 = tpu.dynamic_rotate %357 by %c1_i32_227 dim 1 : vector<16x256xf32>, i32 -> vector<16x256xf32>
      %cst_228 = arith.constant 0.000000e+00 : f32
      %377 = vector.shape_cast %22 : vector<1x256xi1> to vector<1x256xi1>
      %378 = vector.broadcast %377 : vector<1x256xi1> to vector<16x256xi1>
      %379 = vector.broadcast %cst_228 : f32 to vector<16x256xf32>
      %380 = arith.select %378, %376, %379 : vector<16x256xi1>, vector<16x256xf32>
      %c48_229 = arith.constant 48 : index
      %c0_230 = arith.constant 0 : index
      %381 = vector.load %arg18[%c48_229, %c0_230] : memref<216x256xf32, #tpu.memory_space<vmem>>, vector<16x256xf32>
      tpu.vector_store %arg18[%c48_229, %c0_230], %380 {strides = array<i32>} : memref<216x256xf32, #tpu.memory_space<vmem>>, vector<16x256xf32>,
      %c64 = arith.constant 64 : index
      %c0_231 = arith.constant 0 : index
      %382 = vector.load %arg18[%c64, %c0_231] : memref<216x256xf32, #tpu.memory_space<vmem>>, vector<16x256xf32>
      tpu.vector_store %arg18[%c64, %c0_231], %357 {strides = array<i32>} : memref<216x256xf32, #tpu.memory_space<vmem>>, vector<16x256xf32>,
      %c255_i32_232 = arith.constant 255 : i32
      %383 = tpu.dynamic_rotate %357 by %c255_i32_232 dim 1 : vector<16x256xf32>, i32 -> vector<16x256xf32>
      %cst_233 = arith.constant 0.000000e+00 : f32
      %384 = vector.shape_cast %24 : vector<1x256xi1> to vector<1x256xi1>
      %385 = vector.broadcast %384 : vector<1x256xi1> to vector<16x256xi1>
      %386 = vector.broadcast %cst_233 : f32 to vector<16x256xf32>
      %387 = arith.select %385, %383, %386 : vector<16x256xi1>, vector<16x256xf32>
      %c80 = arith.constant 80 : index
      %c0_234 = arith.constant 0 : index
      %388 = vector.load %arg18[%c80, %c0_234] : memref<216x256xf32, #tpu.memory_space<vmem>>, vector<16x256xf32>
      tpu.vector_store %arg18[%c80, %c0_234], %387 {strides = array<i32>} : memref<216x256xf32, #tpu.memory_space<vmem>>, vector<16x256xf32>,
      %c241_i32_235 = arith.constant 241 : i32
      %389 = tpu.dynamic_rotate %357 by %c241_i32_235 dim 1 : vector<16x256xf32>, i32 -> vector<16x256xf32>
      %cst_236 = arith.constant 0.000000e+00 : f32
      %390 = vector.shape_cast %29 : vector<1x256xi1> to vector<1x256xi1>
      %391 = vector.broadcast %390 : vector<1x256xi1> to vector<16x256xi1>
      %392 = vector.broadcast %cst_236 : f32 to vector<16x256xf32>
      %393 = arith.select %391, %389, %392 : vector<16x256xi1>, vector<16x256xf32>
      %c96_237 = arith.constant 96 : index
      %c0_238 = arith.constant 0 : index
      %394 = vector.load %arg18[%c96_237, %c0_238] : memref<216x256xf32, #tpu.memory_space<vmem>>, vector<16x256xf32>
      tpu.vector_store %arg18[%c96_237, %c0_238], %393 {strides = array<i32>} : memref<216x256xf32, #tpu.memory_space<vmem>>, vector<16x256xf32>,
      %c240_i32_239 = arith.constant 240 : i32
      %395 = tpu.dynamic_rotate %357 by %c240_i32_239 dim 1 : vector<16x256xf32>, i32 -> vector<16x256xf32>
      %cst_240 = arith.constant 0.000000e+00 : f32
      %396 = vector.shape_cast %31 : vector<1x256xi1> to vector<1x256xi1>
      %397 = vector.broadcast %396 : vector<1x256xi1> to vector<16x256xi1>
      %398 = vector.broadcast %cst_240 : f32 to vector<16x256xf32>
      %399 = arith.select %397, %395, %398 : vector<16x256xi1>, vector<16x256xf32>
      %c112 = arith.constant 112 : index
      %c0_241 = arith.constant 0 : index
      %400 = vector.load %arg18[%c112, %c0_241] : memref<216x256xf32, #tpu.memory_space<vmem>>, vector<16x256xf32>
      tpu.vector_store %arg18[%c112, %c0_241], %399 {strides = array<i32>} : memref<216x256xf32, #tpu.memory_space<vmem>>, vector<16x256xf32>,
      %c239_i32_242 = arith.constant 239 : i32
      %401 = tpu.dynamic_rotate %357 by %c239_i32_242 dim 1 : vector<16x256xf32>, i32 -> vector<16x256xf32>
      %cst_243 = arith.constant 0.000000e+00 : f32
      %402 = vector.shape_cast %36 : vector<1x256xi1> to vector<1x256xi1>
      %403 = vector.broadcast %402 : vector<1x256xi1> to vector<16x256xi1>
      %404 = vector.broadcast %cst_243 : f32 to vector<16x256xf32>
      %405 = arith.select %403, %401, %404 : vector<16x256xi1>, vector<16x256xf32>
      %c128 = arith.constant 128 : index
      %c0_244 = arith.constant 0 : index
      %406 = vector.load %arg18[%c128, %c0_244] : memref<216x256xf32, #tpu.memory_space<vmem>>, vector<16x256xf32>
      tpu.vector_store %arg18[%c128, %c0_244], %405 {strides = array<i32>} : memref<216x256xf32, #tpu.memory_space<vmem>>, vector<16x256xf32>,
      %c0_245 = arith.constant 0 : index
      %c0_246 = arith.constant 0 : index
      %407 = vector.load %arg11[%c0_245, %c0_246] : memref<16x144xf32, #tpu.memory_space<vmem>>, vector<16x144xf32>
      %c0_247 = arith.constant 0 : index
      %c0_248 = arith.constant 0 : index
      %408 = vector.load %arg18[%c0_247, %c0_248] : memref<216x256xf32, #tpu.memory_space<vmem>>, vector<144x256xf32>
      %cst_249 = arith.constant dense<0.000000e+00> : vector<16x256xf32>
      %409 = tpu.matmul %407, %408, %cst_249 {dimension_numbers = #tpu.dot_dimension_numbers<[1], [0], [0], [1], [0, 0, 1, 1], [], []>} : vector<16x144xf32>, vector<144x256xf32>, vector<16x256xf32> -> vector<16x256xf32>
      %c0_250 = arith.constant 0 : index
      %c0_251 = arith.constant 0 : index
      %410 = vector.load %arg12[%c0_250, %c0_251] : memref<16x1xf32, #tpu.memory_space<vmem>>, vector<16x1xf32>
      %411 = vector.broadcast %410 : vector<16x1xf32> to vector<16x256xf32>
      %412 = arith.addf %409, %411 : vector<16x256xf32>
      %cst_252 = arith.constant 0.000000e+00 : f32
      %413 = vector.broadcast %cst_252 : f32 to vector<16x256xf32>
      %414 = arith.maximumf %412, %413 : vector<16x256xf32>
      %c17_i32_253 = arith.constant 17 : i32
      %415 = tpu.dynamic_rotate %414 by %c17_i32_253 dim 1 : vector<16x256xf32>, i32 -> vector<16x256xf32>
      %cst_254 = arith.constant 0.000000e+00 : f32
      %416 = vector.shape_cast %13 : vector<1x256xi1> to vector<1x256xi1>
      %417 = vector.broadcast %416 : vector<1x256xi1> to vector<16x256xi1>
      %418 = vector.broadcast %cst_254 : f32 to vector<16x256xf32>
      %419 = arith.select %417, %415, %418 : vector<16x256xi1>, vector<16x256xf32>
      %c0_255 = arith.constant 0 : index
      %c0_256 = arith.constant 0 : index
      %420 = vector.load %arg18[%c0_255, %c0_256] : memref<216x256xf32, #tpu.memory_space<vmem>>, vector<16x256xf32>
      tpu.vector_store %arg18[%c0_255, %c0_256], %419 {strides = array<i32>} : memref<216x256xf32, #tpu.memory_space<vmem>>, vector<16x256xf32>,
      %c16_i32_257 = arith.constant 16 : i32
      %421 = tpu.dynamic_rotate %414 by %c16_i32_257 dim 1 : vector<16x256xf32>, i32 -> vector<16x256xf32>
      %cst_258 = arith.constant 0.000000e+00 : f32
      %422 = vector.shape_cast %15 : vector<1x256xi1> to vector<1x256xi1>
      %423 = vector.broadcast %422 : vector<1x256xi1> to vector<16x256xi1>
      %424 = vector.broadcast %cst_258 : f32 to vector<16x256xf32>
      %425 = arith.select %423, %421, %424 : vector<16x256xi1>, vector<16x256xf32>
      %c16_259 = arith.constant 16 : index
      %c0_260 = arith.constant 0 : index
      %426 = vector.load %arg18[%c16_259, %c0_260] : memref<216x256xf32, #tpu.memory_space<vmem>>, vector<16x256xf32>
      tpu.vector_store %arg18[%c16_259, %c0_260], %425 {strides = array<i32>} : memref<216x256xf32, #tpu.memory_space<vmem>>, vector<16x256xf32>,
      %c15_i32_261 = arith.constant 15 : i32
      %427 = tpu.dynamic_rotate %414 by %c15_i32_261 dim 1 : vector<16x256xf32>, i32 -> vector<16x256xf32>
      %cst_262 = arith.constant 0.000000e+00 : f32
      %428 = vector.shape_cast %20 : vector<1x256xi1> to vector<1x256xi1>
      %429 = vector.broadcast %428 : vector<1x256xi1> to vector<16x256xi1>
      %430 = vector.broadcast %cst_262 : f32 to vector<16x256xf32>
      %431 = arith.select %429, %427, %430 : vector<16x256xi1>, vector<16x256xf32>
      %c32_263 = arith.constant 32 : index
      %c0_264 = arith.constant 0 : index
      %432 = vector.load %arg18[%c32_263, %c0_264] : memref<216x256xf32, #tpu.memory_space<vmem>>, vector<16x256xf32>
      tpu.vector_store %arg18[%c32_263, %c0_264], %431 {strides = array<i32>} : memref<216x256xf32, #tpu.memory_space<vmem>>, vector<16x256xf32>,
      %c1_i32_265 = arith.constant 1 : i32
      %433 = tpu.dynamic_rotate %414 by %c1_i32_265 dim 1 : vector<16x256xf32>, i32 -> vector<16x256xf32>
      %cst_266 = arith.constant 0.000000e+00 : f32
      %434 = vector.shape_cast %22 : vector<1x256xi1> to vector<1x256xi1>
      %435 = vector.broadcast %434 : vector<1x256xi1> to vector<16x256xi1>
      %436 = vector.broadcast %cst_266 : f32 to vector<16x256xf32>
      %437 = arith.select %435, %433, %436 : vector<16x256xi1>, vector<16x256xf32>
      %c48_267 = arith.constant 48 : index
      %c0_268 = arith.constant 0 : index
      %438 = vector.load %arg18[%c48_267, %c0_268] : memref<216x256xf32, #tpu.memory_space<vmem>>, vector<16x256xf32>
      tpu.vector_store %arg18[%c48_267, %c0_268], %437 {strides = array<i32>} : memref<216x256xf32, #tpu.memory_space<vmem>>, vector<16x256xf32>,
      %c64_269 = arith.constant 64 : index
      %c0_270 = arith.constant 0 : index
      %439 = vector.load %arg18[%c64_269, %c0_270] : memref<216x256xf32, #tpu.memory_space<vmem>>, vector<16x256xf32>
      tpu.vector_store %arg18[%c64_269, %c0_270], %414 {strides = array<i32>} : memref<216x256xf32, #tpu.memory_space<vmem>>, vector<16x256xf32>,
      %c255_i32_271 = arith.constant 255 : i32
      %440 = tpu.dynamic_rotate %414 by %c255_i32_271 dim 1 : vector<16x256xf32>, i32 -> vector<16x256xf32>
      %cst_272 = arith.constant 0.000000e+00 : f32
      %441 = vector.shape_cast %24 : vector<1x256xi1> to vector<1x256xi1>
      %442 = vector.broadcast %441 : vector<1x256xi1> to vector<16x256xi1>
      %443 = vector.broadcast %cst_272 : f32 to vector<16x256xf32>
      %444 = arith.select %442, %440, %443 : vector<16x256xi1>, vector<16x256xf32>
      %c80_273 = arith.constant 80 : index
      %c0_274 = arith.constant 0 : index
      %445 = vector.load %arg18[%c80_273, %c0_274] : memref<216x256xf32, #tpu.memory_space<vmem>>, vector<16x256xf32>
      tpu.vector_store %arg18[%c80_273, %c0_274], %444 {strides = array<i32>} : memref<216x256xf32, #tpu.memory_space<vmem>>, vector<16x256xf32>,
      %c241_i32_275 = arith.constant 241 : i32
      %446 = tpu.dynamic_rotate %414 by %c241_i32_275 dim 1 : vector<16x256xf32>, i32 -> vector<16x256xf32>
      %cst_276 = arith.constant 0.000000e+00 : f32
      %447 = vector.shape_cast %29 : vector<1x256xi1> to vector<1x256xi1>
      %448 = vector.broadcast %447 : vector<1x256xi1> to vector<16x256xi1>
      %449 = vector.broadcast %cst_276 : f32 to vector<16x256xf32>
      %450 = arith.select %448, %446, %449 : vector<16x256xi1>, vector<16x256xf32>
      %c96_277 = arith.constant 96 : index
      %c0_278 = arith.constant 0 : index
      %451 = vector.load %arg18[%c96_277, %c0_278] : memref<216x256xf32, #tpu.memory_space<vmem>>, vector<16x256xf32>
      tpu.vector_store %arg18[%c96_277, %c0_278], %450 {strides = array<i32>} : memref<216x256xf32, #tpu.memory_space<vmem>>, vector<16x256xf32>,
      %c240_i32_279 = arith.constant 240 : i32
      %452 = tpu.dynamic_rotate %414 by %c240_i32_279 dim 1 : vector<16x256xf32>, i32 -> vector<16x256xf32>
      %cst_280 = arith.constant 0.000000e+00 : f32
      %453 = vector.shape_cast %31 : vector<1x256xi1> to vector<1x256xi1>
      %454 = vector.broadcast %453 : vector<1x256xi1> to vector<16x256xi1>
      %455 = vector.broadcast %cst_280 : f32 to vector<16x256xf32>
      %456 = arith.select %454, %452, %455 : vector<16x256xi1>, vector<16x256xf32>
      %c112_281 = arith.constant 112 : index
      %c0_282 = arith.constant 0 : index
      %457 = vector.load %arg18[%c112_281, %c0_282] : memref<216x256xf32, #tpu.memory_space<vmem>>, vector<16x256xf32>
      tpu.vector_store %arg18[%c112_281, %c0_282], %456 {strides = array<i32>} : memref<216x256xf32, #tpu.memory_space<vmem>>, vector<16x256xf32>,
      %c239_i32_283 = arith.constant 239 : i32
      %458 = tpu.dynamic_rotate %414 by %c239_i32_283 dim 1 : vector<16x256xf32>, i32 -> vector<16x256xf32>
      %cst_284 = arith.constant 0.000000e+00 : f32
      %459 = vector.shape_cast %36 : vector<1x256xi1> to vector<1x256xi1>
      %460 = vector.broadcast %459 : vector<1x256xi1> to vector<16x256xi1>
      %461 = vector.broadcast %cst_284 : f32 to vector<16x256xf32>
      %462 = arith.select %460, %458, %461 : vector<16x256xi1>, vector<16x256xf32>
      %c128_285 = arith.constant 128 : index
      %c0_286 = arith.constant 0 : index
      %463 = vector.load %arg18[%c128_285, %c0_286] : memref<216x256xf32, #tpu.memory_space<vmem>>, vector<16x256xf32>
      tpu.vector_store %arg18[%c128_285, %c0_286], %462 {strides = array<i32>} : memref<216x256xf32, #tpu.memory_space<vmem>>, vector<16x256xf32>,
      %c0_287 = arith.constant 0 : index
      %c0_288 = arith.constant 0 : index
      %464 = vector.load %arg13[%c0_287, %c0_288] : memref<3x144xf32, #tpu.memory_space<vmem>>, vector<3x144xf32>
      %c0_289 = arith.constant 0 : index
      %c0_290 = arith.constant 0 : index
      %465 = vector.load %arg18[%c0_289, %c0_290] : memref<216x256xf32, #tpu.memory_space<vmem>>, vector<144x256xf32>
      %cst_291 = arith.constant dense<0.000000e+00> : vector<3x256xf32>
      %466 = tpu.matmul %464, %465, %cst_291 {dimension_numbers = #tpu.dot_dimension_numbers<[1], [0], [0], [1], [0, 0, 1, 1], [], []>} : vector<3x144xf32>, vector<144x256xf32>, vector<3x256xf32> -> vector<3x256xf32>
      %c0_292 = arith.constant 0 : index
      %c0_293 = arith.constant 0 : index
      %467 = vector.load %arg14[%c0_292, %c0_293] : memref<3x1xf32, #tpu.memory_space<vmem>>, vector<3x1xf32>
      %468 = vector.broadcast %467 : vector<3x1xf32> to vector<3x256xf32>
      %469 = arith.addf %466, %468 : vector<3x256xf32>
      %cst_294 = arith.constant 1.000000e+00 : f32
      %470 = vector.broadcast %cst_294 : f32 to vector<3x256xf32>
      %471 = arith.addf %470, %469 : vector<3x256xf32>
      %472 = arith.mulf %471, %1 : vector<3x256xf32>
      %473 = vector.shape_cast %469 : vector<3x256xf32> to vector<1x3x256xf32>
      %474 = arith.index_cast %arg19 : i32 to index
      %c0_295 = arith.constant 0 : index
      %c0_296 = arith.constant 0 : index
      %c0_297 = arith.constant 0 : index
      %475 = vector.load %arg15[%474, %c0_295, %c0_296, %c0_297] : memref<5x1x3x256xf32, #tpu.memory_space<vmem>>, vector<1x1x3x256xf32>
      %476 = vector.shape_cast %475 : vector<1x1x3x256xf32> to vector<1x3x256xf32>
      %477 = vector.shape_cast %473 : vector<1x3x256xf32> to vector<1x1x3x256xf32>
      tpu.vector_store %arg15[%474, %c0_295, %c0_296, %c0_297], %477 {strides = array<i32>} : memref<5x1x3x256xf32, #tpu.memory_space<vmem>>, vector<1x1x3x256xf32>,
      %478 = vector.shape_cast %472 : vector<3x256xf32> to vector<1x3x256xf32>
      %479 = arith.index_cast %arg19 : i32 to index
      %c0_298 = arith.constant 0 : index
      %c0_299 = arith.constant 0 : index
      %c0_300 = arith.constant 0 : index
      %480 = vector.load %arg16[%479, %c0_298, %c0_299, %c0_300] : memref<5x1x3x256xf32, #tpu.memory_space<vmem>>, vector<1x1x3x256xf32>
      %481 = vector.shape_cast %480 : vector<1x1x3x256xf32> to vector<1x3x256xf32>
      %482 = vector.shape_cast %478 : vector<1x3x256xf32> to vector<1x1x3x256xf32>
      tpu.vector_store %arg16[%479, %c0_298, %c0_299, %c0_300], %482 {strides = array<i32>} : memref<5x1x3x256xf32, #tpu.memory_space<vmem>>, vector<1x1x3x256xf32>,
      scf.yield %469, %472 : vector<3x256xf32>, vector<3x256xf32>
    }
    %c4_i32_155 = arith.constant 4 : i32
    return
  }
  func.func @transform_0(%arg0: i32) -> (i32, i32, i32) {
    %c0_i32 = arith.constant 0 : i32
    %c0_i32_0 = arith.constant 0 : i32
    %c0_i32_1 = arith.constant 0 : i32
    return %arg0, %c0_i32, %c0_i32_0 : i32, i32, i32
  }
  func.func @transform_1(%arg0: i32) -> (i32, i32, i32) {
    %c0_i32 = arith.constant 0 : i32
    %c0_i32_0 = arith.constant 0 : i32
    %c0_i32_1 = arith.constant 0 : i32
    return %arg0, %c0_i32, %c0_i32_0 : i32, i32, i32
  }
  func.func @transform_2(%arg0: i32) -> (i32, i32) {
    %c0_i32 = arith.constant 0 : i32
    %c0_i32_0 = arith.constant 0 : i32
    %c0_i32_1 = arith.constant 0 : i32
    return %c0_i32, %c0_i32_0 : i32, i32
  }
  func.func @transform_3(%arg0: i32) -> (i32, i32) {
    %c0_i32 = arith.constant 0 : i32
    %c0_i32_0 = arith.constant 0 : i32
    %c0_i32_1 = arith.constant 0 : i32
    return %c0_i32, %c0_i32_0 : i32, i32
  }
  func.func @transform_4(%arg0: i32) -> (i32, i32) {
    %c0_i32 = arith.constant 0 : i32
    %c0_i32_0 = arith.constant 0 : i32
    %c0_i32_1 = arith.constant 0 : i32
    return %c0_i32, %c0_i32_0 : i32, i32
  }
  func.func @transform_5(%arg0: i32) -> (i32, i32) {
    %c0_i32 = arith.constant 0 : i32
    %c0_i32_0 = arith.constant 0 : i32
    %c0_i32_1 = arith.constant 0 : i32
    return %c0_i32, %c0_i32_0 : i32, i32
  }
  func.func @transform_6(%arg0: i32) -> (i32, i32) {
    %c0_i32 = arith.constant 0 : i32
    %c0_i32_0 = arith.constant 0 : i32
    %c0_i32_1 = arith.constant 0 : i32
    return %c0_i32, %c0_i32_0 : i32, i32
  }
  func.func @transform_7(%arg0: i32) -> (i32, i32) {
    %c0_i32 = arith.constant 0 : i32
    %c0_i32_0 = arith.constant 0 : i32
    %c0_i32_1 = arith.constant 0 : i32
    return %c0_i32, %c0_i32_0 : i32, i32
  }
  func.func @transform_8(%arg0: i32) -> (i32, i32) {
    %c0_i32 = arith.constant 0 : i32
    %c0_i32_0 = arith.constant 0 : i32
    %c0_i32_1 = arith.constant 0 : i32
    return %c0_i32, %c0_i32_0 : i32, i32
  }
  func.func @transform_9(%arg0: i32) -> (i32, i32) {
    %c0_i32 = arith.constant 0 : i32
    %c0_i32_0 = arith.constant 0 : i32
    %c0_i32_1 = arith.constant 0 : i32
    return %c0_i32, %c0_i32_0 : i32, i32
  }
  func.func @transform_10(%arg0: i32) -> (i32, i32) {
    %c0_i32 = arith.constant 0 : i32
    %c0_i32_0 = arith.constant 0 : i32
    %c0_i32_1 = arith.constant 0 : i32
    return %c0_i32, %c0_i32_0 : i32, i32
  }
  func.func @transform_11(%arg0: i32) -> (i32, i32) {
    %c0_i32 = arith.constant 0 : i32
    %c0_i32_0 = arith.constant 0 : i32
    %c0_i32_1 = arith.constant 0 : i32
    return %c0_i32, %c0_i32_0 : i32, i32
  }
  func.func @transform_12(%arg0: i32) -> (i32, i32) {
    %c0_i32 = arith.constant 0 : i32
    %c0_i32_0 = arith.constant 0 : i32
    %c0_i32_1 = arith.constant 0 : i32
    return %c0_i32, %c0_i32_0 : i32, i32
  }
  func.func @transform_13(%arg0: i32) -> (i32, i32) {
    %c0_i32 = arith.constant 0 : i32
    %c0_i32_0 = arith.constant 0 : i32
    %c0_i32_1 = arith.constant 0 : i32
    return %c0_i32, %c0_i32_0 : i32, i32
  }
  func.func @transform_14(%arg0: i32) -> (i32, i32, i32, i32) {
    %c0_i32 = arith.constant 0 : i32
    %c0_i32_0 = arith.constant 0 : i32
    %c0_i32_1 = arith.constant 0 : i32
    %c0_i32_2 = arith.constant 0 : i32
    return %c0_i32, %arg0, %c0_i32_0, %c0_i32_1 : i32, i32, i32, i32
  }
  func.func @transform_15(%arg0: i32) -> (i32, i32, i32, i32) {
    %c0_i32 = arith.constant 0 : i32
    %c0_i32_0 = arith.constant 0 : i32
    %c0_i32_1 = arith.constant 0 : i32
    %c0_i32_2 = arith.constant 0 : i32
    return %c0_i32, %arg0, %c0_i32_0, %c0_i32_1 : i32, i32, i32, i32
  }
}

</mosaic_0001>

<bundles_post_ra>
// kernel: deshadow_net_s4.1
= control target key start
LH: loop header
LB: loop body
LE: loop exit
PB: predicated region body
PF: predicated region fallthrough
CT: control target
= control target key end

     0   :  { %s3564_s18 = smov 0   ;;  %s3566_s19 = smov 0   ;;  %s5378_s0 = inlined_call_operand.vmem [shape: f32[2,3,256], index: 0, kind: input, shape index: {}]   ;;  %s5379_s1 = inlined_call_operand.vmem [shape: f32[2,1,256], index: 1, kind: input, shape index: {}]   ;;  %s5380_s2 = inlined_call_operand.vmem [shape: f32[24,36], index: 2, kind: input, shape index: {}]   ;;  %s5381_s3 = inlined_call_operand.vmem [shape: f32[24,1], index: 3, kind: input, shape index: {}]   ;;  %s5382_s4 = inlined_call_operand.vmem [shape: f32[24,216], index: 4, kind: input, shape index: {}]   ;;  %s5383_s5 = inlined_call_operand.vmem [shape: f32[24,1], index: 5, kind: input, shape index: {}]   ;;  %s5384_s6 = inlined_call_operand.vmem [shape: f32[3,216], index: 6, kind: input, shape index: {}]   ;;  %s5385_s7 = inlined_call_operand.vmem [shape: f32[3,1], index: 7, kind: input, shape index: {}]   ;;  %s5386_s8 = inlined_call_operand.vmem [shape: f32[16,90], index: 8, kind: input, shape index: {}]   ;;  %s5387_s9 = inlined_call_operand.vmem [shape: f32[16,1], index: 9, kind: input, shape index: {}]   ;;  %s5388_s10 = inlined_call_operand.vmem [shape: f32[16,144], index: 10, kind: input, shape index: {}]   ;;  %s5389_s11 = inlined_call_operand.vmem [shape: f32[16,1], index: 11, kind: input, shape index: {}]   ;;  %s5390_s12 = inlined_call_operand.vmem [shape: f32[3,144], index: 12, kind: input, shape index: {}]   ;;  %s5391_s13 = inlined_call_operand.vmem [shape: f32[3,1], index: 13, kind: input, shape index: {}]   ;;  %s5392_s14 = inlined_call_operand.vmem [shape: f32[5,2,3,256], index: 14, kind: output, shape index: {0}]   ;;  %s5393_s15 = inlined_call_operand.vmem [shape: f32[5,2,3,256], index: 15, kind: output, shape index: {1}]  }
   0x1   :  { %s3568_s20 = smov 0  }
   0x2 LB: > { %5479 = sst [smem:[#allocation6_spill]] %s3440_s19  ;;  %s3577_s21 = sadd.s32 4294967295, %s3444_s20   ;;  %s3444_s20 = sphi %s3568_s20, %s5787_s20   ;;  %s3440_s19 = sphi %s3566_s19, %s5786_s19   ;;  %s3436_s18 = sphi %s3564_s18, %s5785_s18  }
   0x3   : > { %s3579_s22 = sadd.s32 1, %s3444_s20   ;;  %s337_s24 = sadd.s32 1, %s3440_s19 }
   0x4   : > { %s334_s23 = ssub.s32 %s3444_s20, %s3579_s22  ;;  %p347_p1 = scmp.ne.s32.totalorder %s3440_s19, %s3436_s18 }
   0x5   : > { %p335_p0 = scmp.eq.s32.totalorder %s334_s23, 0  ;;  %p348_p2 = scmp.eq.s32.totalorder %s3577_s21, 1 }
   0x6   : > { %p3107_p3 = scmp.ge.s32.totalorder %s3444_s20, 1  ;;  %p449_p5 = scmp.lt.s32.totalorder %s3444_s20, 3 }
   0x7   : > { %s3587_s25 = scalar_select %p335_p0, %s3440_s19, %s337_s24  }
   0x8   : > { %p3589_p4 = por %p348_p2, %p347_p1  ;;  %p450_p6 = pnand %p3107_p3, %p449_p5 }
   0x9   : > { %5480 = sst [smem:[#allocation7_spill]] %s3587_s25  ;;  %p504_p7 = scmp.lt.s32.totalorder (!%p450_p6), %s3577_s21, 1 }
   0xa   : > { %453 = sbr.rel (%p450_p6) target bundleno = 2141 (0x85d), region = 76  ;;  %s5420_s20 = smov (!%p450_p6), 113  }
   0xb   : > { %s5446_s19 = smov (!%p450_p6), 127   ;;  %s5442_s30 = smov (!%p450_p6), 15  }
   0xc   : > { %s5444_s16 = smov (!%p450_p6), 1   ;;  %s5540_s23 = smov (!%p450_p6), 113  }
   0xd   : > { %s495_s24 = sand.u32 (!%p450_p6), 1, %s3436_s18  }
   0xf   : > { %s505_s27 = scalar_select %p504_p7, %s3577_s21, 1  ;;  %v515_v18 = vlaneseq  ;;  %v5486_v30 = vmov 0  ;;  %vm5402_vm4 = vcmask 1040384   ;;  %v5488_v44 = vmov 0 }
  0x10   : > { %v5492_v46 = vmov 0  ;;  %v5494_v47 = vmov 0  ;;  %v5496_v49 = vmov 0 }
  0x11   : > { %s3110_s28 = sshll.u32 %s505_s27, 1  ;;  %s3148_s29 = sshll.u32 %s505_s27, 3  ;;  %vm3634_vm0 = vcmp.lt.s32.totalorder %v515_v18, 256  ;;  %v3650_v24 = vand.u32 127, %v515_v18 }
  0x12   : > { %s512_s17 = scalar_lea.vmem %s5379_s1, %s3110_s28  ;;  %s508_s25 = scalar_lea.vmem %s5378_s0, %s3148_s29 }
  0x13   : > { %v514_v0 = vld [vmem:[%s512_s17] sm:$0x3]  ;;  %s5430_s27 = smov 112   ;;  %s5428_s28 = smov 17   ;;  %v517_v25 = vadd.s32 128, %v3650_v24  ;;  %v518_v27 = vshra.s32 %v3650_v24, 4 }
  0x14   : > { %v3601_v1 = vld [vmem:[%s508_s25] sm:$0x77]  ;;  %v748_v2 = vperm.slane %v514_v0, 0  ;;  %v749_v3 = vperm.slane %v514_v0, 1  ;;  %s5448_s25 = smov 111   ;;  %s5432_s29 = smov 16  }
  0x15   : > { %539 = vst [vmem:[#allocation1] ss:$2 sm:$0xff] %v3601_v1  ;;  %v519_v28 = vshra.s32 %v517_v25, 4  ;;  %vm5395_vm1 = vcmp.lt.s32.totalorder %v3650_v24, 112  ;;  %vm3655_vm2 = vcmp.le.s32.totalorder %v518_v27, 14  ;;  %v521_v39 = vand.u32 15, %v517_v25 }
  0x16   : > { %840 = vrot.lane.b32.xlu1 %v748_v2, %s5420_s20  ;;  %824 = vrot.lane.b32.xlu0 %v748_v2, %s5446_s19  ;;  %822 = vst.msk [vmem:[#allocation2 + $0x37] ss:$8 sm:$0x3] %vm3634_vm0, %v514_v0  ;;  %v520_v43 = vand.u32 15, %v3650_v24  ;;  %vm5396_vm7 = vcmp.lt.s32.totalorder %v3650_v24, 113  ;;  %vm5398_vm8 = vcmp.lt.s32.totalorder %v3650_v24, 127 }
  0x17   : > { %856 = vrot.lane.b32.xlu2 %v748_v2, %s5430_s27  ;;  %vm3659_vm3 = vcmp.le.s32.totalorder %v519_v28, 14  ;;  %vm3675_vm5 = vcmp.ge.s32.totalorder %v521_v39, 1  ;;  %vm3693_vm10 = vcmp.le.s32.totalorder %v521_v39, 14  ;;  %vm5397_vm13 = vcmp.lt.s32.totalorder %v3650_v24, 111 }
  0x18   : > { %v5487_v30 = vsel %vm3659_vm3, 4294967295, %v5486_v30  ;;  %v5489_v44 = vsel %vm3675_vm5, 4294967295, %v5488_v44  ;;  %vm3679_vm6 = vcmp.ge.s32.totalorder %v520_v43, 1  ;;  %vm3689_vm9 = vmand %vm3659_vm3, %vm3675_vm5  ;;  %v5495_v47 = vsel %vm3693_vm10, 4294967295, %v5494_v47 }
  0x19   : > { %v5493_v46 = vsel %vm3689_vm9, 4294967295, %v5492_v46  ;;  %vm3697_vm11 = vcmp.le.s32.totalorder %v520_v43, 14  ;;  %vm3705_vm12 = vmand %vm3655_vm2, %vm3679_vm6 }
  0x1a   : > { %v5497_v49 = vsel %vm3697_vm11, 4294967295, %v5496_v49  ;;  %vm3738_vm14 = vmand %vm3659_vm3, %vm3693_vm10 }
  0x1b   : > { %vm3746_vm15 = vmand %vm3655_vm2, %vm3697_vm11 }
  0x1c   : > { %v540_v4 = vld.sshfl [vmem:[#allocation1] sm:$0xff pattern:$0x75316420]  ;;  %v541_v5 = vld.sshfl [vmem:[#allocation1 + $0x8] sm:$0xff pattern:$0x75316420] }
  0x1d   : > { %559 = vst [vmem:[#allocation1] ss:$2 sm:$0xff] %v3601_v1 }
  0x1e   : > { %842 = vrot.lane.b32.xlu1 %v749_v3, %s5420_s20  ;;  %826 = vrot.lane.b32.xlu0 %v749_v3, %s5446_s19 }
  0x1f   : > { %858 = vrot.lane.b32.xlu2 %v749_v3, %s5430_s27 }
  0x24   : > { %v560_v6 = vld.sshfl [vmem:[#allocation1] sm:$0xff pattern:$0x75316420]  ;;  %v561_v7 = vld.sshfl [vmem:[#allocation1 + $0x8] sm:$0xff pattern:$0x75316420] }
  0x25   : > { %585 = vst [vmem:[#allocation1] ss:$2 sm:$0xff] %v3601_v1 }
  0x26   : > { %874 = vrot.lane.b32.xlu1 %v749_v3, %s5448_s25  ;;  %872 = vrot.lane.b32.xlu0 %v748_v2, %s5448_s25 }
  0x27   : > { %752 = vrot.lane.b32.xlu2 %v748_v2, %s5428_s28 }
  0x2c   : > { %v587_v8 = vld.sshfl [vmem:[#allocation1 + $0x8] sm:$0xff pattern:$0x75316420]  ;;  %v586_v9 = vld.sshfl [vmem:[#allocation1] sm:$0xff pattern:$0x75316420] }
  0x2d   : > { %613 = vst [vmem:[#allocation1] ss:$2 sm:$0xff] %v3601_v1 }
  0x2e   : > { %773 = vrot.lane.b32.xlu1 %v748_v2, %s5432_s29  ;;  %754 = vrot.lane.b32.xlu0 %v749_v3, %s5428_s28 }
  0x2f   : > { %775 = vrot.lane.b32.xlu2 %v749_v3, %s5432_s29 }
  0x34   : > { %v614_v10 = vld.sshfl [vmem:[#allocation1] sm:$0xff pattern:$0x75316420]  ;;  %v615_v11 = vld.sshfl [vmem:[#allocation1 + $0x8] sm:$0xff pattern:$0x75316420] }
  0x35   : > { %640 = vst [vmem:[#allocation1 + $0x1] ss:$2 sm:$0xff] %v3601_v1 }
  0x36   : > { %791 = vrot.lane.b32.xlu1 %v749_v3, %s5442_s30  ;;  %789 = vrot.lane.b32.xlu0 %v748_v2, %s5442_s30 }
  0x37   : > { %805 = vrot.lane.b32.xlu2 %v748_v2, %s5444_s16  ;;  %v5500_v2 = vmov 0 }
  0x38   : > { %v5501_v2 = vsel %vm3738_vm14, 4294967295, %v5500_v2 }
  0x3c   : > { %v641_v12 = vld.sshfl [vmem:[#allocation1] sm:$0xff pattern:$0x75316420]  ;;  %v642_v13 = vld.sshfl [vmem:[#allocation1 + $0x8] sm:$0xff pattern:$0x75316420] }
  0x3d   : > { %645 = vst [vmem:[#allocation2 + $0x10] sm:$0x70] %v641_v12 }
  0x3e   : > { %646 = vst [vmem:[#allocation2 + $0x18] sm:$0x70] %v642_v13  ;;  %807 = vrot.lane.b32.xlu0 %v749_v3, %s5444_s16  ;;  %592 = vrot.lane.b32.xlu1 %v587_v8, %s5442_s30 }
  0x3f   : > { %647 = vst [vmem:[#allocation1] ss:$2 sm:$0xff] %v3601_v1  ;;  %618 = vrot.lane.b32.xlu2 %v614_v10, %s5444_s16 }
  0x46   : > { %v648_v14 = vld.sshfl [vmem:[#allocation1] sm:$0xff pattern:$0x75316420]  ;;  %v649_v15 = vld.sshfl [vmem:[#allocation1 + $0x8] sm:$0xff pattern:$0x75316420]  ;;  %590 = vrot.lane.b32.xlu0 %v586_v9, %s5442_s30 }
  0x47   : > { %652 = vrot.lane.b32.xlu1 %v648_v14, %s5446_s19  ;;  %675 = vst [vmem:[#allocation1] ss:$2 sm:$0xff] %v3601_v1  ;;  %654 = vrot.lane.b32.xlu2 %v649_v15, %s5446_s19  ;;  %v5506_v14 = vmov 0  ;;  %v5508_v15 = vmov 0 }
  0x4e   : > { %v677_v16 = vld.sshfl [vmem:[#allocation1 + $0x8] sm:$0xff pattern:$0x75316420]  ;;  %v676_v17 = vld.sshfl [vmem:[#allocation1] sm:$0xff pattern:$0x75316420] }
  0x4f   : > { %682 = vrot.lane.b32.xlu1 %v677_v16, %s5420_s20  ;;  %680 = vrot.lane.b32.xlu0 %v676_v17, %s5420_s20  ;;  %701 = vst [vmem:[#allocation1] ss:$2 sm:$0xff] %v3601_v1  ;;  %s3153_s20 = smul.u32 40, %s495_s24 }
  0x51   : > { %s4668_s18 = scalar_lea.vmem [#allocation5], %s3153_s20 }
  0x56   : > { %v703_v20 = vld.sshfl [vmem:[#allocation1 + $0x8] sm:$0xff pattern:$0x75316420]  ;;  %v702_v21 = vld.sshfl [vmem:[#allocation1] sm:$0xff pattern:$0x75316420] }
  0x57   : > { %564 = vrot.lane.b32.xlu1 %v560_v6, %s5432_s29  ;;  %708 = vrot.lane.b32.xlu0 %v703_v20, %s5430_s27  ;;  %727 = vst [vmem:[#allocation1] ss:$2 sm:$0xff] %v3601_v1 }
  0x58   : > { %706 = vrot.lane.b32.xlu2 %v702_v21, %s5430_s27  ;;  %v5510_v21 = vmov 0  ;;  %s5538_s27 = smov 112  }
  0x5e   : > { %v728_v22 = vld.sshfl [vmem:[#allocation1] sm:$0xff pattern:$0x75316420]  ;;  %v729_v23 = vld.sshfl [vmem:[#allocation1 + $0x8] sm:$0xff pattern:$0x75316420] }
  0x5f   : > { %620 = vrot.lane.b32.xlu0 %v615_v11, %s5444_s16  ;;  %732 = vrot.lane.b32.xlu1 %v728_v22, %s5448_s25  ;;  %v5504_v11 = vmov 0 }
  0x60   : > { %734 = vrot.lane.b32.xlu2 %v729_v23, %s5448_s25 }
  0x67   : > { %544 = vrot.lane.b32.xlu0 %v540_v4, %s5428_s28  ;;  %546 = vrot.lane.b32.xlu1 %v541_v5, %s5428_s28  ;;  %v5502_v5 = vmov 0  ;;  %s5539_s28 = smov 17  }
  0x68   : > { %566 = vrot.lane.b32.xlu2 %v561_v7, %s5432_s29  ;;  %v5503_v5 = vsel %vm3746_vm15, 4294967295, %v5502_v5 }
  0x71   : > { %v857_v26 = vpop.permute.xlu2 %856 }
  0x79   : > { %v859_v31 = vpop.permute.xlu2 %858 }
  0x7a   : > { %v860_v32 = vsel %vm5395_vm1, %v857_v26, %v859_v31  ;;  %v861_v33 = vsel %vm5395_vm1, %v859_v31, %v857_v26  ;;  %vm3758_vm1 = vcmp.ge.s32.totalorder %v519_v28, 1 }
  0x7b   : > { %v862_v34 = vsel %vm3655_vm2, %v860_v32, 0.0  ;;  %v863_v35 = vsel %vm3659_vm3, %v861_v33, 0.0  ;;  %v5505_v11 = vsel %vm3758_vm1, 4294967295, %v5504_v11 }
  0x7c   : > { %v866_v36 = vrot.slane %v863_v35, 7 }
  0x7e   : > { %v867_v37 = vsel %vm5402_vm4, %v862_v34, %v866_v36 }
  0x7f   : > { %870 = vst.msk [vmem:[#allocation2 + $0x42] ss:$8 sm:$0x3] %vm3634_vm0, %v867_v37 }
  0x81   : > { %v753_v38 = vpop.permute.xlu2 %752 }
  0x88   : > { %v841_v40 = vpop.permute.xlu1 %840  ;;  %v825_v41 = vpop.permute.xlu0 %824 }
  0x89   : > { %v776_v42 = vpop.permute.xlu2 %775 }
  0x90   : > { %v843_v48 = vpop.permute.xlu1 %842  ;;  %v827_v50 = vpop.permute.xlu0 %826 }
  0x91   : > { %v844_v52 = vsel %vm5396_vm7, %v841_v40, %v843_v48  ;;  %v845_v53 = vsel %vm5396_vm7, %v843_v48, %v841_v40  ;;  %v828_v54 = vsel %vm5398_vm8, %v825_v41, %v827_v50  ;;  %v829_v55 = vsel %vm5398_vm8, %v827_v50, %v825_v41  ;;  %v3721_v60 = vpop.permute.xlu2 %805 }
  0x92   : > { %v847_v56 = vsel %vm3689_vm9, %v845_v53, 0.0  ;;  %v831_v57 = vsel %vm3693_vm10, %v829_v55, 0.0  ;;  %v846_v61 = vsel %vm3705_vm12, %v844_v52, 0.0  ;;  %v830_v62 = vsel %vm3697_vm11, %v828_v54, 0.0 }
  0x93   : > { %v850_v58 = vrot.slane %v847_v56, 7  ;;  %v834_v59 = vrot.slane %v831_v57, 7  ;;  %vm3767_vm7 = vcmp.ge.s32.totalorder %v518_v27, 1  ;;  %vm5410_vm8 = vcmp.lt.s32.totalorder %v3650_v24, 17 }
  0x94   : > { %v5507_v14 = vsel %vm3767_vm7, 4294967295, %v5506_v14 }
  0x95   : > { %v851_v63 = vsel %vm5402_vm4, %v846_v61, %v850_v58  ;;  %v835_v0 = vsel %vm5402_vm4, %v830_v62, %v834_v59 }
  0x96   : > { %854 = vst.msk [vmem:[#allocation2 + $0x41] ss:$8 sm:$0x3] %vm3634_vm0, %v851_v63 }
  0x97   : > { %838 = vst.msk [vmem:[#allocation2 + $0x40] ss:$8 sm:$0x3] %vm3634_vm0, %v835_v0 }
  0x98   : > { %v875_v3 = vpop.permute.xlu1 %874  ;;  %v873_v4 = vpop.permute.xlu0 %872 }
  0x99   : > { %v876_v6 = vsel %vm5397_vm13, %v873_v4, %v875_v3  ;;  %v877_v7 = vsel %vm5397_vm13, %v875_v3, %v873_v4  ;;  %v3763_v13 = vpop.permute.xlu2 %618  ;;  %vm5403_vm13 = vcmp.lt.s32.totalorder %v3650_v24, 16 }
  0x9a   : > { %v879_v8 = vsel %vm3738_vm14, %v877_v7, 0.0  ;;  %v878_v10 = vsel %vm3746_vm15, %v876_v6, 0.0  ;;  %vm3777_vm14 = vmand %vm3758_vm1, %vm3675_vm5  ;;  %vm5512_vm15 = vcmask 1040384  }
  0x9b   : > { %v882_v9 = vrot.slane %v879_v8, 7  ;;  %v5509_v15 = vsel %vm3777_vm14, 4294967295, %v5508_v15  ;;  %vm5513_vm3 = vmmov %vm5512_vm15 }
  0x9d   : > { %v883_v12 = vsel %vm5402_vm4, %v878_v10, %v882_v9  ;;  %vm3789_vm4 = vmand %vm3767_vm7, %vm3679_vm6 }
  0x9e   : > { %886 = vst.msk [vmem:[#allocation2 + $0x43] ss:$8 sm:$0x3] %vm3634_vm0, %v883_v12  ;;  %v5511_v21 = vsel %vm3789_vm4, 4294967295, %v5510_v21 }
  0xa0   : > { %v774_v16 = vpop.permute.xlu1 %773  ;;  %v755_v17 = vpop.permute.xlu0 %754 }
  0xa1   : > { %v777_v18 = vsel %vm5403_vm13, %v774_v16, %v776_v42  ;;  %v778_v20 = vsel %vm5403_vm13, %v776_v42, %v774_v16  ;;  %v756_v22 = vsel %vm5410_vm8, %v753_v38, %v755_v17  ;;  %v757_v23 = vsel %vm5410_vm8, %v755_v17, %v753_v38  ;;  %v655_v38 = vpop.permute.xlu2 %654 }
  0xa2   : > { %v780_v25 = vsel %vm3758_vm1, %v777_v18, 0.0  ;;  %v759_v26 = vsel %vm3777_vm14, %v756_v22, 0.0  ;;  %vm5411_vm13 = vcmask 1043456   ;;  %v779_v31 = vsel %vm3767_vm7, %v778_v20, 0.0 }
  0xa3   : > { %v783_v27 = vrot.slane %v780_v25, 7  ;;  %v762_v28 = vrot.slane %v759_v26, 7  ;;  %v758_v32 = vsel %vm3789_vm4, %v757_v23, 0.0  ;;  %vm5419_vm8 = vcmp.lt.s32.totalorder %v3650_v24, 15 }
  0xa4   : > { %vm5415_vm14 = vcmp.lt.s32.totalorder %v3650_v24, 1 }
  0xa5   : > { %v784_v33 = vsel %vm5512_vm15, %v779_v31, %v783_v27  ;;  %v764_v34 = vsel %vm5513_vm3, %v758_v32, %v762_v28  ;;  %v899_v35 = vld [vmem:[#allocation2 + $0x40] sm:$0xf]  ;;  %v900_v36 = vld [vmem:[#allocation2 + $0x48] sm:$0xf]  ;;  %vm3818_vm15 = vmand %vm3758_vm1, %vm3693_vm10 }
  0xa6   : > { %787 = vst.msk [vmem:[#allocation2 + $0x34] ss:$8 sm:$0x3] %vm3634_vm0, %v784_v33  ;;  %3111 = vmatpush.msk.msra.mxu0 %vm5411_vm13, %v899_v35  ;;  %3115 = vmatpush.msk.msra.mxu1 %vm5411_vm13, %v900_v36  ;;  %vm3826_vm3 = vmand %vm3767_vm7, %vm3697_vm11  ;;  %vm5518_vm13 = vcmask 1040384  }
  0xa7   : > { %771 = vst.msk [vmem:[#allocation2 + $0x33] ss:$8 sm:$0x3] %vm3634_vm0, %v764_v34 }
  0xa8   : > { %v792_v39 = vpop.permute.xlu1 %791  ;;  %v790_v40 = vpop.permute.xlu0 %789 }
  0xa9   : > { %v793_v42 = vsel %vm5419_vm8, %v790_v40, %v792_v39  ;;  %v794_v43 = vsel %vm5419_vm8, %v792_v39, %v790_v40 }
  0xaa   : > { %v796_v48 = vsel %vm3818_vm15, %v793_v42, 0.0  ;;  %v795_v52 = vsel %vm3826_vm3, %v794_v43, 0.0 }
  0xab   : > { %v799_v50 = vrot.slane %v796_v48, 7 }
  0xad   : > { %v800_v53 = vsel %vm5518_vm13, %v795_v52, %v799_v50 }
  0xae   : > { %803 = vst.msk [vmem:[#allocation2 + $0x35] ss:$8 sm:$0x3] %vm3634_vm0, %v800_v53 }
  0xb0   : > { %v808_v54 = vpop.permute.xlu0 %807  ;;  %v593_v55 = vpop.permute.xlu1 %592 }
  0xb1   : > { %v809_v56 = vsel %vm5415_vm14, %v3721_v60, %v808_v54  ;;  %v810_v57 = vsel %vm5415_vm14, %v808_v54, %v3721_v60  ;;  %vm5519_vm14 = vcmp.lt.s32.totalorder %v3650_v24, 127 }
  0xb2   : > { %v812_v58 = vsel %vm3675_vm5, %v809_v56, 0.0  ;;  %v707_v59 = vpop.permute.xlu2 %706  ;;  %v811_v62 = vsel %vm3679_vm6, %v810_v57, 0.0  ;;  %vm5520_vm4 = vmmov %vm5519_vm14  ;;  %v901_v56 = vld [vmem:[%s5381_s3] sm:$0xff]  ;;  %v902_v57 = vld [vmem:[%s5381_s3 + $0x8] sm:$0xff] }
  0xb3   : > { %v815_v61 = vrot.slane %v812_v58, 7  ;;  %v3474_v58 = vmov 0  }
  0xb4   : > { %3236 = vset.pattern.permute.xlu2 %v3474_v58  ;;  %3238 = vset.pattern.permute.xlu1 %v3474_v58 }
  0xb5   : > { %v816_v63 = vsel %vm5518_vm13, %v811_v62, %v815_v61  ;;  %906 = vperm.xlu2 %3236, %v901_v56   ;;  %911 = vperm.xlu1 %3238, %v902_v57  }
  0xb6   : > { %819 = vst.msk [vmem:[#allocation2 + $0x36] ss:$8 sm:$0x3] %vm3634_vm0, %v816_v63  ;;  %vm5521_vm0 = vcmp.lt.s32.totalorder %v3650_v24, 113  ;;  %3237 = vset.pattern.permute.xlu0 %v3474_v58 }
  0xb8   : > { %v591_v0 = vpop.permute.xlu0 %590 }
  0xb9   : > { %v653_v3 = vpop.permute.xlu1 %652  ;;  %v595_v4 = vsel %vm5419_vm8, %v591_v0, %v593_v55  ;;  %v596_v60 = vsel %vm5419_vm8, %v593_v55, %v591_v0  ;;  %vm5527_vm8 = vnez %v5487_v30 }
  0xba   : > { %v657_v6 = vsel %vm5519_vm14, %v653_v3, %v655_v38  ;;  %v658_v7 = vsel %vm5520_vm4, %v655_v38, %v653_v3  ;;  %v601_v8 = vsel %vm3826_vm3, %v596_v60, 0.0  ;;  %v602_v19 = vsel %vm3818_vm15, %v595_v4, 0.0  ;;  %v735_v17 = vpop.permute.xlu2 %734  ;;  %vm5522_vm4 = vmmov %vm5521_vm0 }
  0xbb   : > { %v663_v9 = vsel %vm3697_vm11, %v657_v6, 0.0  ;;  %v605_v10 = vrot.slane %v601_v8, 2  ;;  %v606_v12 = vrot.slane %v602_v19, 2  ;;  %v664_v16 = vsel %vm3693_vm10, %v658_v7, 0.0  ;;  %v903_v19 = vld [vmem:[%s5381_s3 + $0x10] sm:$0xff] }
  0xbc   : > { %v667_v18 = vrot.slane %v663_v9, 1  ;;  %v668_v20 = vrot.slane %v664_v16, 1  ;;  %vm5523_vm14 = vcmp.lt.s32.totalorder %v3650_v24, 112  ;;  %916 = vperm.xlu0 %3237, %v903_v19  }
  0xbd   : > { %609 = vst [vmem:[#allocation2] sm:$0xc0] %v605_v10  ;;  %vm5524_vm13 = vmmov %vm5523_vm14 }
  0xbe   : > { %610 = vst [vmem:[#allocation2 + $0x8] sm:$0xc0] %v606_v12 }
  0xbf   : > { %611 = vst [vmem:[#allocation2 + $0x10] sm:$0x1] %v605_v10 }
  0xc0   : > { %612 = vst [vmem:[#allocation2 + $0x18] sm:$0x1] %v606_v12 }
  0xc1   : > { %v683_v22 = vpop.permute.xlu1 %682  ;;  %v681_v23 = vpop.permute.xlu0 %680  ;;  %671 = vst [vmem:[#allocation2 + $0x10] sm:$0x80] %v667_v18 }
  0xc2   : > { %v685_v25 = vsel %vm5521_vm0, %v681_v23, %v683_v22  ;;  %v686_v26 = vsel %vm5522_vm4, %v683_v22, %v681_v23  ;;  %672 = vst [vmem:[#allocation2 + $0x18] sm:$0x80] %v668_v20  ;;  %v567_v33 = vpop.permute.xlu2 %566  ;;  %vm5525_vm0 = vcmp.lt.s32.totalorder %v3650_v24, 16 }
  0xc3   : > { %v691_v27 = vsel %vm3705_vm12, %v685_v25, 0.0  ;;  %v692_v28 = vsel %vm3689_vm9, %v686_v26, 0.0  ;;  %673 = vst [vmem:[#allocation2 + $0x20] sm:$0x3] %v667_v18  ;;  %vm5526_vm4 = vmmov %vm5525_vm0 }
  0xc4   : > { %v695_v31 = vrot.slane %v691_v27, 6  ;;  %v696_v32 = vrot.slane %v692_v28, 6  ;;  %674 = vst [vmem:[#allocation2 + $0x28] sm:$0x3] %v668_v20  ;;  %v888_v28 = vld [vmem:[%s5380_s2] sm:$0xff] }
  0xc6   : > { %699 = vst [vmem:[#allocation2 + $0x20] sm:$0x1c] %v695_v31 }
  0xc7   : > { %700 = vst [vmem:[#allocation2 + $0x28] sm:$0x1c] %v696_v32 }
  0xc9   : > { %v565_v34 = vpop.permute.xlu1 %564  ;;  %v709_v35 = vpop.permute.xlu0 %708 }
  0xca   : > { %v711_v36 = vsel %vm5523_vm14, %v707_v59, %v709_v35  ;;  %v712_v38 = vsel %vm5524_vm13, %v709_v35, %v707_v59  ;;  %v569_v39 = vsel %vm5525_vm0, %v565_v34, %v567_v33  ;;  %v570_v40 = vsel %vm5526_vm4, %v567_v33, %v565_v34  ;;  %v889_v33 = vld [vmem:[%s5380_s2 + $0x8] sm:$0xff]  ;;  %v890_v34 = vld [vmem:[%s5380_s2 + $0x10] sm:$0xff] }
  0xcb   : > { %v717_v42 = vsel %vm3655_vm2, %v711_v36, 0.0  ;;  %v718_v43 = vsel %vm5527_vm8, %v712_v38, 0.0  ;;  %v575_v48 = vsel %vm3767_vm7, %v570_v40, 0.0  ;;  %v576_v50 = vsel %vm3758_vm1, %v569_v39, 0.0 }
  0xcc   : > { %v721_v52 = vrot.slane %v717_v42, 3  ;;  %v722_v53 = vrot.slane %v718_v43, 3  ;;  %v579_v54 = vrot.slane %v575_v48, 5  ;;  %v580_v55 = vrot.slane %v576_v50, 5 }
  0xcd   : > { %vm5528_vm14 = vcmp.lt.s32.totalorder %v3650_v24, 1  ;;  %vm5530_vm0 = vcmp.lt.s32.totalorder %v3650_v24, 111  ;;  %vm5532_vm1 = vnez %v5503_v5  ;;  %vm5537_vm7 = vnez %v5509_v15 }
  0xce   : > { %725 = vst [vmem:[#allocation2 + $0x20] sm:$0xe0] %v721_v52  ;;  %vm5529_vm13 = vmmov %vm5528_vm14 }
  0xcf   : > { %726 = vst [vmem:[#allocation2 + $0x28] sm:$0xe0] %v722_v53  ;;  %vm5531_vm4 = vmmov %vm5530_vm0 }
  0xd0   : > { %583 = vst [vmem:[#allocation2] sm:$0x38] %v579_v54 }
  0xd1   : > { %584 = vst [vmem:[#allocation2 + $0x8] sm:$0x38] %v580_v55  ;;  %v621_v59 = vpop.permute.xlu0 %620  ;;  %v733_v61 = vpop.permute.xlu1 %732 }
  0xd2   : > { %v623_v62 = vsel %vm5528_vm14, %v3763_v13, %v621_v59  ;;  %v624_v63 = vsel %vm5529_vm13, %v621_v59, %v3763_v13  ;;  %v737_v0 = vsel %vm5530_vm0, %v733_v61, %v735_v17  ;;  %v738_v3 = vsel %vm5531_vm4, %v735_v17, %v733_v61 }
  0xd3   : > { %v629_v4 = vsel %vm3679_vm6, %v624_v63, 0.0  ;;  %v630_v60 = vsel %vm3675_vm5, %v623_v62, 0.0  ;;  %v743_v6 = vsel %vm5532_vm1, %v737_v0, 0.0  ;;  %vm5533_vm14 = vnez %v5501_v2 }
  0xd4   : > { %v744_v7 = vsel %vm5533_vm14, %v738_v3, 0.0  ;;  %v633_v8 = vrot.slane %v629_v4, 7  ;;  %v634_v13 = vrot.slane %v630_v60, 7  ;;  %745 = vst [vmem:[#allocation2 + $0x30] sm:$0x7] %v743_v6  ;;  %vm5534_vm13 = vcmp.lt.s32.totalorder %v3650_v24, 17 }
  0xd5   : > { %746 = vst [vmem:[#allocation2 + $0x38] sm:$0x7] %v744_v7  ;;  %vm5535_vm0 = vmmov %vm5534_vm13  ;;  %vm5536_vm4 = vnez %v5511_v21  ;;  %v895_v23 = vld [vmem:[#allocation2 + $0x20] sm:$0xff] }
  0xd6   : > { %637 = vst [vmem:[#allocation2 + $0x10] sm:$0xe] %v633_v8  ;;  %v896_v25 = vld [vmem:[#allocation2 + $0x28] sm:$0xff] }
  0xd7   : > { %638 = vst [vmem:[#allocation2 + $0x18] sm:$0xe] %v634_v13 }
  0xd9   : > { %v545_v9 = vpop.permute.xlu0 %544  ;;  %v547_v10 = vpop.permute.xlu1 %546 }
  0xda   : > { %v549_v12 = vsel %vm5534_vm13, %v545_v9, %v547_v10  ;;  %v550_v16 = vsel %vm5535_vm0, %v547_v10, %v545_v9  ;;  %vm919_vm13 = vcmask 293888   ;;  %vm5541_vm0 = vcmp.lt.s32.totalorder %v3650_v24, 127  ;;  %v1300_v9 = vld [vmem:[%s5383_s5] sm:$0xff] }
  0xdb   : > { %v555_v17 = vsel %vm5536_vm4, %v550_v16, 0.0  ;;  %v556_v18 = vsel %vm5537_vm7, %v549_v12, 0.0  ;;  %v897_v20 = vld [vmem:[#allocation2 + $0x30] sm:$0xff]  ;;  %vm5547_vm7 = vcmp.lt.s32.totalorder %v3650_v24, 15 }
  0xdc   : > { %557 = vst [vmem:[#allocation2] sm:$0x7] %v555_v17  ;;  %948 = vmatpush.msra.mxu0 %v897_v20  ;;  %v898_v22 = vld [vmem:[#allocation2 + $0x38] sm:$0xff]  ;;  %v1302_v20 = vld [vmem:[%s5383_s5 + $0x10] sm:$0xff]  ;;  %vm5548_vm4 = vmmov %vm5547_vm7 }
  0xdd   : > { %558 = vst [vmem:[#allocation2 + $0x8] sm:$0x7] %v556_v18  ;;  %974 = vmatpush.msra.mxu1 %v898_v22  ;;  %v893_v26 = vld [vmem:[#allocation2 + $0x10] sm:$0xff] }
  0xde   : > { %949 = vmatpush.msra.mxu0 %v895_v23  ;;  %v894_v27 = vld [vmem:[#allocation2 + $0x18] sm:$0xff] }
  0xdf   : > { %975 = vmatpush.msra.mxu1 %v896_v25 }
  0xe0   : > { %950 = vmatpush.msra.mxu0 %v893_v26 }
  0xe1   : > { %976 = vmatpush.msra.mxu1 %v894_v27 }
  0xe3   : > { %v891_v31 = vld [vmem:[#allocation2] sm:$0xff] }
  0xe4   : > { %951 = vmatpush.msra.mxu0 %v891_v31  ;;  %v892_v32 = vld [vmem:[#allocation2 + $0x8] sm:$0xff] }
  0xe5   : > { %977 = vmatpush.msra.mxu1 %v892_v32  ;;  %3112 = vmatmul.msk.f32.vlgmr.msra.gmra.mxu0 %vm919_vm13, %v888_v28 }
  0xe6   : > { %3116 = vmatmul.msk.f32.vlgmr.msra.gmra.mxu1 %vm919_vm13, %v888_v28  ;;  %v1301_v28 = vld [vmem:[%s5383_s5 + $0x8] sm:$0xff] }
  0xed   : > { %3113 = vmatmul.msk.f32.gmra.mxu0 %vm919_vm13, %v889_v33 }
  0xee   : > { %3117 = vmatmul.msk.f32.gmra.mxu1 %vm919_vm13, %v889_v33 }
  0xf5   : > { %3114 = vmatmul.msk.f32.gmra.mxu0 %vm919_vm13, %v890_v34 }
  0xf6   : > { %3118 = vmatmul.msk.f32.gmra.mxu1 %vm919_vm13, %v890_v34  ;;  %vm5542_vm13 = vmmov %vm5541_vm0 }
 0x10f   : > { %v907_v35 = vpop.permute.xlu2 %906 }
 0x127   : > { %v912_v48 = vpop.permute.xlu1 %911 }
 0x12e   : > { %v917_v57 = vpop.permute.xlu0 %916 }
 0x162   : > { %v953_v36 = vpop.f32.mrf.mxu0 }
 0x163   : > { %v954_v38 = vadd.f32 %v953_v36, %v907_v35  ;;  %v979_v39 = vpop.f32.mrf.mxu1 }
 0x164   : > { %v980_v40 = vadd.f32 %v979_v39, %v907_v35 }
 0x165   : > { %v3939_v42 = vmax.f32 %v954_v38, 0.0 }
 0x166   : > { %v3941_v43 = vmax.f32 %v980_v40, 0.0 }
 0x167   : > { %1084 = vrot.lane.b32.xlu0 %v3939_v42, %s5444_s16  ;;  %1120 = vrot.lane.b32.xlu2 %v3939_v42, %s5446_s19 }
 0x168   : > { %1126 = vrot.lane.b32.xlu1 %v3941_v43, %s5446_s19 }
 0x16a   : > { %v956_v52 = vpop.f32.mrf.mxu0 }
 0x16b   : > { %v982_v50 = vpop.f32.mrf.mxu1  ;;  %v957_v54 = vadd.f32 %v956_v52, %v912_v48 }
 0x16c   : > { %v983_v53 = vadd.f32 %v982_v50, %v912_v48 }
 0x16d   : > { %v990_v56 = vmax.f32 %v957_v54, 0.0 }
 0x16e   : > { %v3967_v55 = vmax.f32 %v983_v53, 0.0 }
 0x16f   : > { %1054 = vrot.lane.b32.xlu0 %v3939_v42, %s5442_s30  ;;  %1216 = vrot.lane.b32.xlu2 %v3941_v43, %s5448_s25 }
 0x170   : > { %1090 = vrot.lane.b32.xlu1 %v3941_v43, %s5444_s16 }
 0x172   : > { %v959_v58 = vpop.f32.mrf.mxu0 }
 0x173   : > { %v960_v59 = vadd.f32 %v959_v58, %v917_v57  ;;  %v985_v62 = vpop.f32.mrf.mxu1 }
 0x174   : > { %v986_v63 = vadd.f32 %v985_v62, %v917_v57 }
 0x175   : > { %v992_v61 = vmax.f32 %v960_v59, 0.0 }
 0x176   : > { %v993_v0 = vmax.f32 %v986_v63, 0.0 }
 0x177   : > { %1024 = vrot.lane.b32.xlu0 %v3939_v42, %s5432_s29  ;;  %1186 = vrot.lane.b32.xlu2 %v3941_v43, %s5538_s27 }
 0x178   : > { %1210 = vrot.lane.b32.xlu1 %v3939_v42, %s5448_s25 }
 0x17f   : > { %994 = vrot.lane.b32.xlu0 %v3939_v42, %s5539_s28  ;;  %1156 = vrot.lane.b32.xlu2 %v3941_v43, %s5540_s23 }
 0x180   : > { %1060 = vrot.lane.b32.xlu1 %v3941_v43, %s5442_s30 }
 0x187   : > { %1212 = vrot.lane.b32.xlu0 %v990_v56, %s5448_s25  ;;  %1092 = vrot.lane.b32.xlu2 %v3967_v55, %s5444_s16 }
 0x188   : > { %1180 = vrot.lane.b32.xlu1 %v3939_v42, %s5538_s27 }
 0x18f   : > { %1062 = vrot.lane.b32.xlu0 %v3967_v55, %s5442_s30  ;;  %1056 = vrot.lane.b32.xlu2 %v990_v56, %s5442_s30 }
 0x190   : > { %1030 = vrot.lane.b32.xlu1 %v3941_v43, %s5432_s29 }
 0x197   : > { %1182 = vrot.lane.b32.xlu0 %v990_v56, %s5538_s27  ;;  %1026 = vrot.lane.b32.xlu2 %v990_v56, %s5432_s29 }
 0x198   : > { %1150 = vrot.lane.b32.xlu1 %v3939_v42, %s5540_s23 }
 0x19f   : > { %1032 = vrot.lane.b32.xlu0 %v3967_v55, %s5432_s29  ;;  %996 = vrot.lane.b32.xlu2 %v990_v56, %s5539_s28 }
 0x1a0   : > { %1000 = vrot.lane.b32.xlu1 %v3941_v43, %s5539_s28 }
 0x1a7   : > { %1152 = vrot.lane.b32.xlu0 %v990_v56, %s5540_s23  ;;  %1088 = vrot.lane.b32.xlu2 %v992_v61, %s5444_s16 }
 0x1a8   : > { %1086 = vrot.lane.b32.xlu1 %v990_v56, %s5444_s16 }
 0x1af   : > { %1002 = vrot.lane.b32.xlu0 %v3967_v55, %s5539_s28  ;;  %1214 = vrot.lane.b32.xlu2 %v992_v61, %s5448_s25 }
 0x1b0   : > { %1218 = vrot.lane.b32.xlu1 %v3967_v55, %s5448_s25 }
 0x1b7   : > { %1094 = vrot.lane.b32.xlu0 %v993_v0, %s5444_s16  ;;  %1064 = vrot.lane.b32.xlu2 %v993_v0, %s5442_s30  ;;  %s5591_s16 = smov 127  }
 0x1b8   : > { %1188 = vrot.lane.b32.xlu1 %v3967_v55, %s5538_s27 }
 0x1bf   : > { %1220 = vrot.lane.b32.xlu0 %v993_v0, %s5448_s25  ;;  %1184 = vrot.lane.b32.xlu2 %v992_v61, %s5538_s27  ;;  %s5593_s25 = smov 15  }
 0x1c0   : > { %1158 = vrot.lane.b32.xlu1 %v3967_v55, %s5540_s23 }
 0x1c1   : > { %v1121_v3 = vpop.permute.xlu2 %1120 }
 0x1c7   : > { %1190 = vrot.lane.b32.xlu0 %v993_v0, %s5538_s27  ;;  %1034 = vrot.lane.b32.xlu2 %v993_v0, %s5432_s29 }
 0x1c8   : > { %1058 = vrot.lane.b32.xlu1 %v992_v61, %s5442_s30  ;;  %s5590_s30 = smov 111  }
 0x1c9   : > { %v1217_v4 = vpop.permute.xlu2 %1216 }
 0x1cf   : > { %1160 = vrot.lane.b32.xlu0 %v993_v0, %s5540_s23  ;;  %1154 = vrot.lane.b32.xlu2 %v992_v61, %s5540_s23 }
 0x1d0   : > { %1028 = vrot.lane.b32.xlu1 %v992_v61, %s5432_s29  ;;  %s5594_s29 = smov 16  }
 0x1d1   : > { %v1187_v60 = vpop.permute.xlu2 %1186 }
 0x1d7   : > { %1130 = vrot.lane.b32.xlu0 %v993_v0, %s5446_s19  ;;  %1004 = vrot.lane.b32.xlu2 %v993_v0, %s5539_s28 }
 0x1d8   : > { %998 = vrot.lane.b32.xlu1 %v992_v61, %s5539_s28 }
 0x1d9   : > { %v1085_v6 = vpop.permute.xlu0 %1084  ;;  %v4013_v7 = vpop.permute.xlu2 %1156 }
 0x1da   : > { %v1127_v8 = vpop.permute.xlu1 %1126 }
 0x1db   : > { %v1132_v13 = vsel %vm5541_vm0, %v1121_v3, %v1127_v8  ;;  %v1135_v19 = vsel %vm5542_vm13, %v1127_v8, %v1121_v3  ;;  %vm5543_vm0 = vcmp.lt.s32.totalorder %v3650_v24, 1 }
 0x1dc   : > { %3242 = vmatpush.msk.msra.mxu2 %vm3697_vm11, %v1132_v13  ;;  %3243 = vmatpush.msk.msrb.mxu0 %vm3693_vm10, %v1135_v19  ;;  %vm5544_vm13 = vmmov %vm5543_vm0 }
 0x1de   : > { %1329 = vmatpush.msra.mxu2 %v992_v61  ;;  %1381 = vmatpush.msrb.mxu0 %v993_v0 }
 0x1df   : > { %1305 = vperm.xlu0 %3237, %v1300_v9   ;;  %1124 = vrot.lane.b32.xlu2 %v992_v61, %s5446_s19 }
 0x1e0   : > { %1122 = vrot.lane.b32.xlu1 %v990_v56, %s5446_s19  ;;  %1330 = vmatpush.msra.mxu2 %v990_v56 }
 0x1e1   : > { %v1055_v10 = vpop.permute.xlu0 %1054  ;;  %v1093_v12 = vpop.permute.xlu2 %1092  ;;  %1382 = vmatpush.msrb.mxu0 %v3967_v55 }
 0x1e2   : > { %v1091_v16 = vpop.permute.xlu1 %1090  ;;  %1331 = vmatpush.msra.mxu2 %v3939_v42 }
 0x1e3   : > { %v1096_v17 = vsel %vm5543_vm0, %v1085_v6, %v1091_v16  ;;  %v1099_v18 = vsel %vm5544_vm13, %v1091_v16, %v1085_v6  ;;  %1383 = vmatpush.msrb.mxu0 %v3941_v43  ;;  %vm5545_vm0 = vcmp.lt.s32.totalorder %v3650_v24, 111 }
 0x1e4   : > { %vm5546_vm13 = vmmov %vm5545_vm0 }
 0x1e7   : > { %1128 = vrot.lane.b32.xlu2 %v3967_v55, %s5446_s19  ;;  %s5592_s19 = smov 1  }
 0x1e8   : > { %1315 = vperm.xlu1 %3238, %v1302_v20  }
 0x1e9   : > { %v1025_v22 = vpop.permute.xlu0 %1024  ;;  %v1057_v23 = vpop.permute.xlu2 %1056 }
 0x1ea   : > { %v1211_v25 = vpop.permute.xlu1 %1210 }
 0x1eb   : > { %v1222_v26 = vsel %vm5545_vm0, %v1211_v25, %v1217_v4  ;;  %v1225_v27 = vsel %vm5546_vm13, %v1217_v4, %v1211_v25  ;;  %vm5549_vm0 = vcmp.lt.s32.totalorder %v3650_v24, 112 }
 0x1ec   : > { %vm5550_vm13 = vmmov %vm5549_vm0 }
 0x1ef   : > { %1310 = vperm.xlu2 %3236, %v1301_v28  }
 0x1f1   : > { %v4047_v31 = vpop.permute.xlu0 %994  ;;  %v4049_v32 = vpop.permute.xlu2 %1026 }
 0x1f2   : > { %v1061_v33 = vpop.permute.xlu1 %1060 }
 0x1f3   : > { %v4053_v34 = vsel %vm5547_vm7, %v1055_v10, %v1061_v33  ;;  %v4057_v35 = vsel %vm5548_vm4, %v1061_v33, %v1055_v10  ;;  %vm5551_vm7 = vcmp.lt.s32.totalorder %v3650_v24, 16 }
 0x1f4   : > { %vm5552_vm4 = vmmov %vm5551_vm7 }
 0x1f9   : > { %v1213_v36 = vpop.permute.xlu0 %1212  ;;  %v4059_v38 = vpop.permute.xlu2 %996 }
 0x1fa   : > { %v1181_v39 = vpop.permute.xlu1 %1180 }
 0x1fb   : > { %v4063_v40 = vsel %vm5549_vm0, %v1181_v39, %v1187_v60  ;;  %v4067_v42 = vsel %vm5550_vm13, %v1187_v60, %v1181_v39  ;;  %vm5553_vm0 = vcmp.lt.s32.totalorder %v3650_v24, 1 }
 0x1fc   : > { %vm5554_vm13 = vmmov %vm5553_vm0 }
 0x201   : > { %v1063_v43 = vpop.permute.xlu0 %1062  ;;  %v1089_v50 = vpop.permute.xlu2 %1088 }
 0x202   : > { %v1031_v48 = vpop.permute.xlu1 %1030 }
 0x203   : > { %v4071_v52 = vsel %vm5551_vm7, %v1025_v22, %v1031_v48  ;;  %v4075_v53 = vsel %vm5552_vm4, %v1031_v48, %v1025_v22  ;;  %vm5555_vm7 = vmmov %vm5553_vm0 }
 0x204   : > { %vm5556_vm4 = vmmov %vm5553_vm0 }
 0x209   : > { %v1183_v54 = vpop.permute.xlu0 %1182  ;;  %v1215_v56 = vpop.permute.xlu2 %1214 }
 0x20a   : > { %v4077_v55 = vpop.permute.xlu1 %1150 }
 0x211   : > { %v1033_v57 = vpop.permute.xlu0 %1032  ;;  %v1065_v59 = vpop.permute.xlu2 %1064 }
 0x212   : > { %v4079_v58 = vpop.permute.xlu1 %1000 }
 0x219   : > { %v1153_v61 = vpop.permute.xlu0 %1152  ;;  %v1185_v63 = vpop.permute.xlu2 %1184 }
 0x21a   : > { %v1087_v62 = vpop.permute.xlu1 %1086 }
 0x21b   : > { %v1097_v60 = vsel %vm5553_vm0, %v1087_v62, %v1093_v12  ;;  %v1100_v6 = vsel %vm5554_vm13, %v1093_v12, %v1087_v62  ;;  %vm5557_vm0 = vcmp.lt.s32.totalorder %v3650_v24, 111 }
 0x21c   : > { %vm5558_vm13 = vmmov %vm5557_vm0 }
 0x221   : > { %v4081_v0 = vpop.permute.xlu0 %1002  ;;  %v1035_v8 = vpop.permute.xlu2 %1034 }
 0x222   : > { %v1219_v3 = vpop.permute.xlu1 %1218 }
 0x223   : > { %v1223_v12 = vsel %vm5557_vm0, %v1213_v36, %v1219_v3  ;;  %v1226_v16 = vsel %vm5558_vm13, %v1219_v3, %v1213_v36 }
 0x229   : > { %v1095_v4 = vpop.permute.xlu0 %1094  ;;  %v1155_v28 = vpop.permute.xlu2 %1154 }
 0x22a   : > { %v1189_v13 = vpop.permute.xlu1 %1188  ;;  %v1098_v19 = vsel %vm5555_vm7, %v1089_v50, %v1095_v4  ;;  %v1101_v9 = vsel %vm5556_vm4, %v1095_v4, %v1089_v50  ;;  %vm5559_vm7 = vmmov %vm5557_vm0 }
 0x22b   : > { %3244 = vmatpush.msk.msra.mxu2 %vm3679_vm6, %v1101_v9  ;;  %3245 = vmatpush.msk.msrb.mxu0 %vm3675_vm5, %v1098_v19  ;;  %vm5560_vm4 = vmmov %vm5557_vm0  ;;  %vm5561_vm0 = vcmp.lt.s32.totalorder %v3650_v24, 15 }
 0x22c   : > { %vm5562_vm13 = vmmov %vm5561_vm0 }
 0x22d   : > { %3246 = vmatpush.msk.msra.mxu2 %vm3679_vm6, %v1100_v6  ;;  %3247 = vmatpush.msk.msrb.mxu0 %vm3675_vm5, %v1097_v60 }
 0x22f   : > { %3248 = vmatpush.msk.msra.mxu2 %vm3679_vm6, %v1099_v18  ;;  %3249 = vmatpush.msk.msrb.mxu0 %vm3675_vm5, %v1096_v17  ;;  %v1067_v17 = vsel %vm5561_vm0, %v1057_v23, %v1063_v43  ;;  %v1070_v18 = vsel %vm5562_vm13, %v1063_v43, %v1057_v23 }
 0x231   : > { %v1221_v10 = vpop.permute.xlu0 %1220  ;;  %v1005_v43 = vpop.permute.xlu2 %1004 }
 0x232   : > { %v1159_v20 = vpop.permute.xlu1 %1158  ;;  %v1224_v22 = vsel %vm5559_vm7, %v1215_v56, %v1221_v10  ;;  %v1227_v25 = vsel %vm5560_vm4, %v1221_v10, %v1215_v56  ;;  %vm5563_vm7 = vcmp.lt.s32.totalorder %v3650_v24, 112  ;;  %v1241_v10 = vld [vmem:[%s5382_s4 + $0x8] sm:$0xff] }
 0x233   : > { %3250 = vmatpush.msk.msra.mxu3 %vm5532_vm1, %v1224_v22  ;;  %3251 = vmatpush.msk.msrb.mxu1 %vm5533_vm14, %v1227_v25  ;;  %v1193_v36 = vsel %vm5563_vm7, %v1183_v54, %v1189_v13  ;;  %vm5564_vm4 = vmmov %vm5563_vm7  ;;  %v1245_v22 = vld [vmem:[%s5382_s4 + $0x28] sm:$0xff] }
 0x234   : > { %v1196_v39 = vsel %vm5564_vm4, %v1189_v13, %v1183_v54  ;;  %vm5565_vm5 = vmmov %vm5564_vm4  ;;  %v1240_v13 = vld [vmem:[%s5382_s4] sm:$0xff] }
 0x235   : > { %3252 = vmatpush.msk.msra.mxu3 %vm5532_vm1, %v1223_v12  ;;  %3253 = vmatpush.msk.msrb.mxu1 %vm5533_vm14, %v1226_v16  ;;  %v1242_v12 = vld [vmem:[%s5382_s4 + $0x10] sm:$0xff]  ;;  %v1243_v16 = vld [vmem:[%s5382_s4 + $0x18] sm:$0xff] }
 0x237   : > { %3254 = vmatpush.msk.msra.mxu3 %vm5532_vm1, %v1222_v26  ;;  %3255 = vmatpush.msk.msrb.mxu1 %vm5533_vm14, %v1225_v27  ;;  %vm5566_vm1 = vmmov %vm5564_vm4 }
 0x238   : > { %vm5567_vm14 = vmmov %vm5561_vm0 }
 0x239   : > { %v1191_v33 = vpop.permute.xlu0 %1190 }
 0x23a   : > { %v1059_v48 = vpop.permute.xlu1 %1058  ;;  %v1194_v26 = vsel %vm5565_vm5, %v1185_v63, %v1191_v33  ;;  %v1197_v27 = vsel %vm5566_vm1, %v1191_v33, %v1185_v63  ;;  %vm5568_vm1 = vcmp.lt.s32.totalorder %v3650_v24, 16 }
 0x23b   : > { %v1068_v50 = vsel %vm5567_vm14, %v1059_v48, %v1065_v59  ;;  %v1071_v23 = vsel %vm5561_vm0, %v1065_v59, %v1059_v48  ;;  %3256 = vmatpush.msk.msra.mxu3 %vm3655_vm2, %v1194_v26  ;;  %3257 = vmatpush.msk.msrb.mxu1 %vm5527_vm8, %v1197_v27  ;;  %v1037_v54 = vsel %vm5568_vm1, %v4049_v32, %v1033_v57  ;;  %vm5569_vm5 = vmmov %vm5568_vm1  ;;  %vm5570_vm14 = vcmp.lt.s32.totalorder %v3650_v24, 113 }
 0x23c   : > { %3258 = vmatpush.msk.msra.mxu2 %vm3826_vm3, %v1071_v23  ;;  %3259 = vmatpush.msk.msrb.mxu0 %vm3818_vm15, %v1068_v50  ;;  %v1040_v56 = vsel %vm5569_vm5, %v1033_v57, %v4049_v32  ;;  %vm5571_vm13 = vmmov %vm5570_vm14 }
 0x23d   : > { %3260 = vmatpush.msk.msra.mxu3 %vm3655_vm2, %v1193_v36  ;;  %3261 = vmatpush.msk.msrb.mxu1 %vm5527_vm8, %v1196_v39  ;;  %vm5572_vm7 = vmmov %vm5571_vm13 }
 0x23e   : > { %3262 = vmatpush.msk.msra.mxu2 %vm3826_vm3, %v1070_v18  ;;  %3263 = vmatpush.msk.msrb.mxu0 %vm3818_vm15, %v1067_v17  ;;  %vm5573_vm4 = vmmov %vm5572_vm7 }
 0x23f   : > { %3264 = vmatpush.msk.msra.mxu3 %vm3655_vm2, %v4063_v40  ;;  %3265 = vmatpush.msk.msrb.mxu1 %vm5527_vm8, %v4067_v42  ;;  %v1163_v40 = vsel %vm5570_vm14, %v1153_v61, %v1159_v20  ;;  %v1166_v42 = vsel %vm5571_vm13, %v1159_v20, %v1153_v61  ;;  %vm5574_vm0 = vmmov %vm5568_vm1  ;;  %vm5578_vm13 = vnez %v5507_v14  ;;  %v1244_v20 = vld [vmem:[%s5382_s4 + $0x20] sm:$0xff] }
 0x240   : > { %3266 = vmatpush.msk.msra.mxu2 %vm3826_vm3, %v4057_v35  ;;  %3267 = vmatpush.msk.msrb.mxu0 %vm3818_vm15, %v4053_v34  ;;  %vm5575_vm1 = vmmov %vm5574_vm0 }
 0x241   : > { %v1161_v59 = vpop.permute.xlu0 %1160  ;;  %vm5576_vm5 = vmmov %vm5573_vm4 }
 0x242   : > { %v1029_v62 = vpop.permute.xlu1 %1028  ;;  %v1164_v63 = vsel %vm5572_vm7, %v1155_v28, %v1161_v59  ;;  %v1167_v32 = vsel %vm5573_vm4, %v1161_v59, %v1155_v28  ;;  %v1162_v34 = vsel %vm5576_vm5, %v4077_v55, %v4013_v7  ;;  %vm5577_vm14 = vmmov %vm5573_vm4  ;;  %vm5579_vm7 = vnez %v5505_v11 }
 0x243   : > { %v1038_v35 = vsel %vm5574_vm0, %v1029_v62, %v1035_v8  ;;  %v1041_v57 = vsel %vm5575_vm1, %v1035_v8, %v1029_v62  ;;  %v1165_v61 = vsel %vm5577_vm14, %v4013_v7, %v4077_v55  ;;  %3268 = vmatpush.msk.msra.mxu3 %vm3705_vm12, %v1164_v63  ;;  %3269 = vmatpush.msk.msrb.mxu1 %vm3689_vm9, %v1167_v32  ;;  %v1125_v7 = vpop.permute.xlu2 %1124  ;;  %vm5580_vm4 = vcmp.lt.s32.totalorder %v3650_v24, 17 }
 0x244   : > { %3270 = vmatpush.msk.msra.mxu2 %vm5578_vm13, %v1041_v57  ;;  %3271 = vmatpush.msk.msrb.mxu0 %vm5579_vm7, %v1038_v35  ;;  %v1007_v3 = vsel %vm5580_vm4, %v4059_v38, %v4081_v0  ;;  %vm5581_vm0 = vmmov %vm5580_vm4  ;;  %vm5582_vm1 = vcmp.lt.s32.totalorder %v3650_v24, 127 }
 0x245   : > { %3272 = vmatpush.msk.msra.mxu3 %vm3705_vm12, %v1163_v40  ;;  %3273 = vmatpush.msk.msrb.mxu1 %vm3689_vm9, %v1166_v42  ;;  %v1010_v4 = vsel %vm5581_vm0, %v4081_v0, %v4059_v38  ;;  %vm5583_vm5 = vmmov %vm5582_vm1  ;;  %v1009_v0 = vsel %vm5581_vm0, %v4079_v58, %v4047_v31 }
 0x246   : > { %3274 = vmatpush.msk.msra.mxu2 %vm5578_vm13, %v1040_v56  ;;  %3275 = vmatpush.msk.msrb.mxu0 %vm5579_vm7, %v1037_v54  ;;  %vm5584_vm14 = vmmov %vm5581_vm0 }
 0x247   : > { %3276 = vmatpush.msk.msra.mxu3 %vm3705_vm12, %v1162_v34  ;;  %3277 = vmatpush.msk.msrb.mxu1 %vm3689_vm9, %v1165_v61  ;;  %vm5585_vm9 = vmmov %vm5581_vm0 }
 0x248   : > { %3278 = vmatpush.msk.msra.mxu2 %vm5578_vm13, %v4075_v53  ;;  %3279 = vmatpush.msk.msrb.mxu0 %vm5579_vm7, %v4071_v52  ;;  %vm5586_vm4 = vmmov %vm5581_vm0 }
 0x249   : > { %v1131_v55 = vpop.permute.xlu0 %1130  ;;  %v1006_v38 = vsel %vm5586_vm4, %v4047_v31, %v4079_v58  ;;  %vm5450_vm4 = vcmask 719872   ;;  %vm5595_vm0 = vmmov %vm5583_vm5 }
 0x24a   : > { %v999_v60 = vpop.permute.xlu1 %998  ;;  %v1134_v6 = vsel %vm5582_vm1, %v1125_v7, %v1131_v55  ;;  %v1137_v53 = vsel %vm5583_vm5, %v1131_v55, %v1125_v7  ;;  %vm5587_vm1 = vnez %v5511_v21 }
 0x24b   : > { %v1008_v52 = vsel %vm5584_vm14, %v999_v60, %v1005_v43  ;;  %v1011_v8 = vsel %vm5585_vm9, %v1005_v43, %v999_v60  ;;  %3280 = vmatpush.msk.msra.mxu3 %vm3697_vm11, %v1134_v6  ;;  %3281 = vmatpush.msk.msrb.mxu1 %vm3693_vm10, %v1137_v53  ;;  %vm5588_vm9 = vnez %v5509_v15  ;;  %v1129_v31 = vpop.permute.xlu2 %1128  ;;  %vm5589_vm14 = vmmov %vm5583_vm5 }
 0x24c   : > { %3282 = vmatpush.msk.msra.mxu2 %vm5587_vm1, %v1011_v8  ;;  %3283 = vmatpush.msk.msrb.mxu0 %vm5588_vm9, %v1008_v52 }
 0x24e   : > { %3284 = vmatpush.msk.msra.mxu2 %vm5587_vm1, %v1010_v4  ;;  %3285 = vmatpush.msk.msrb.mxu0 %vm5588_vm9, %v1007_v3 }
 0x250   : > { %3286 = vmatpush.msk.msra.mxu2 %vm5587_vm1, %v1009_v0  ;;  %3287 = vmatpush.msk.msrb.mxu0 %vm5588_vm9, %v1006_v38 }
 0x251   : > { %1344 = vmatmul.f32.vlgmr.msra.gmra.mxu2 %v1240_v13  ;;  %1396 = vmatmul.f32.vlgmr.msrb.gmra.mxu0 %v1240_v13  ;;  %v1306_v28 = vpop.permute.xlu0 %1305 }
 0x252   : > { %v1123_v58 = vpop.permute.xlu1 %1122 }
 0x253   : > { %v1133_v19 = vsel %vm5583_vm5, %v1123_v58, %v1129_v31  ;;  %v1136_v9 = vsel %vm5589_vm14, %v1129_v31, %v1123_v58  ;;  %v1311_v27 = vpop.permute.xlu2 %1310  ;;  %vm5596_vm5 = vmmov %vm5595_vm0  ;;  %vm5597_vm14 = vcmp.lt.s32.totalorder %v3650_v24, 1 }
 0x254   : > { %3288 = vmatpush.msk.msra.mxu3 %vm3697_vm11, %v1133_v19  ;;  %3289 = vmatpush.msk.msrb.mxu1 %vm3693_vm10, %v1136_v9 }
 0x255   : > { %3119 = vmatmul.msk.f32.vlgmr.msra.gmra.mxu3 %vm5450_vm4, %v1241_v10  ;;  %3122 = vmatmul.msk.f32.vlgmr.msrb.gmra.mxu1 %vm5450_vm4, %v1241_v10 }
 0x259   : > { %1347 = vmatmul.f32.gmra.mxu2 %v1242_v12  ;;  %1399 = vmatmul.f32.gmra.mxu0 %v1242_v12 }
 0x25a   : > { %v1316_v32 = vpop.permute.xlu1 %1315 }
 0x25d   : > { %3120 = vmatmul.msk.f32.gmra.mxu3 %vm5450_vm4, %v1243_v16  ;;  %3123 = vmatmul.msk.f32.gmra.mxu1 %vm5450_vm4, %v1243_v16 }
 0x261   : > { %1350 = vmatmul.f32.gmra.mxu2 %v1244_v20  ;;  %1402 = vmatmul.f32.gmra.mxu0 %v1244_v20 }
 0x265   : > { %3121 = vmatmul.msk.f32.gmra.mxu3 %vm5450_vm4, %v1245_v22  ;;  %3124 = vmatmul.msk.f32.gmra.mxu1 %vm5450_vm4, %v1245_v22 }
 0x2ce   : > { %v1397_v25 = vpop.f32.mrf.mxu0 }
 0x2cf   : > { %v1398_v17 = vadd.f32 %v1397_v25, %v1306_v28 }
 0x2d2   : > { %v1423_v18 = vpop.f32.mrf.mxu1 }
 0x2d3   : > { %v1424_v33 = vadd.f32 %v1423_v18, %v1398_v17 }
 0x2d4   : > { %v1345_v36 = vpop.f32.mrf.mxu2 }
 0x2d5   : > { %v4291_v39 = vmax.f32 %v1424_v33, 0.0  ;;  %v1346_v26 = vadd.f32 %v1345_v36, %v1306_v28  ;;  %v1739_v28 = vld [vmem:[%s5385_s7] sm:$0x7] }
 0x2d6   : > { %v1400_v48 = vpop.f32.mrf.mxu0 }
 0x2d7   : > { %1660 = vrot.lane.b32.xlu2 %v4291_v39, %s5590_s30  ;;  %1570 = vrot.lane.b32.xlu1 %v4291_v39, %s5591_s16  ;;  %v1401_v23 = vadd.f32 %v1400_v48, %v1311_v27 }
 0x2d8   : > { %v1371_v50 = vpop.f32.mrf.mxu3 }
 0x2d9   : > { %v1372_v43 = vadd.f32 %v1371_v50, %v1346_v26 }
 0x2da   : > { %v1426_v54 = vpop.f32.mrf.mxu1 }
 0x2db   : > { %v4297_v56 = vmax.f32 %v1372_v43, 0.0  ;;  %v1427_v59 = vadd.f32 %v1426_v54, %v1401_v23 }
 0x2dc   : > { %v1348_v40 = vpop.f32.mrf.mxu2 }
 0x2dd   : > { %v4299_v42 = vmax.f32 %v1427_v59, 0.0  ;;  %1564 = vrot.lane.b32.xlu0 %v4297_v56, %s5591_s16  ;;  %v1349_v63 = vadd.f32 %v1348_v40, %v1311_v27 }
 0x2de   : > { %v1403_v62 = vpop.f32.mrf.mxu0 }
 0x2df   : > { %1630 = vrot.lane.b32.xlu2 %v4291_v39, %s5538_s27  ;;  %1534 = vrot.lane.b32.xlu1 %v4291_v39, %s5592_s19  ;;  %v1404_v57 = vadd.f32 %v1403_v62, %v1316_v32 }
 0x2e0   : > { %v1374_v35 = vpop.f32.mrf.mxu3 }
 0x2e1   : > { %v1375_v34 = vadd.f32 %v1374_v35, %v1349_v63 }
 0x2e2   : > { %v1429_v61 = vpop.f32.mrf.mxu1 }
 0x2e3   : > { %v4307_v7 = vmax.f32 %v1375_v34, 0.0  ;;  %v1430_v55 = vadd.f32 %v1429_v61, %v1404_v57 }
 0x2e4   : > { %v1351_v3 = vpop.f32.mrf.mxu2 }
 0x2e5   : > { %v1437_v4 = vmax.f32 %v1430_v55, 0.0  ;;  %1528 = vrot.lane.b32.xlu0 %v4297_v56, %s5592_s19  ;;  %v1352_v60 = vadd.f32 %v1351_v3, %v1316_v32 }
 0x2e7   : > { %1600 = vrot.lane.b32.xlu2 %v4291_v39, %s5540_s23  ;;  %1504 = vrot.lane.b32.xlu1 %v4291_v39, %s5593_s25 }
 0x2e8   : > { %v1377_v6 = vpop.f32.mrf.mxu3 }
 0x2e9   : > { %v1378_v53 = vadd.f32 %v1377_v6, %v1352_v60 }
 0x2eb   : > { %v1436_v52 = vmax.f32 %v1378_v53, 0.0 }
 0x2ed   : > { %1498 = vrot.lane.b32.xlu0 %v4297_v56, %s5593_s25 }
 0x2ef   : > { %1474 = vrot.lane.b32.xlu1 %v4291_v39, %s5594_s29  ;;  %1536 = vrot.lane.b32.xlu2 %v4299_v42, %s5592_s19 }
 0x2f5   : > { %1468 = vrot.lane.b32.xlu0 %v4297_v56, %s5594_s29 }
 0x2f7   : > { %1444 = vrot.lane.b32.xlu1 %v4291_v39, %s5539_s28  ;;  %1500 = vrot.lane.b32.xlu2 %v4307_v7, %s5593_s25 }
 0x2fd   : > { %1438 = vrot.lane.b32.xlu0 %v4297_v56, %s5539_s28 }
 0x2ff   : > { %1470 = vrot.lane.b32.xlu2 %v4307_v7, %s5594_s29  ;;  %1654 = vrot.lane.b32.xlu1 %v4297_v56, %s5590_s30 }
 0x305   : > { %1506 = vrot.lane.b32.xlu0 %v4299_v42, %s5593_s25 }
 0x307   : > { %1440 = vrot.lane.b32.xlu2 %v4307_v7, %s5539_s28  ;;  %1624 = vrot.lane.b32.xlu1 %v4297_v56, %s5538_s27 }
 0x30d   : > { %1476 = vrot.lane.b32.xlu0 %v4299_v42, %s5594_s29 }
 0x30f   : > { %1508 = vrot.lane.b32.xlu2 %v1437_v4, %s5593_s25  ;;  %1594 = vrot.lane.b32.xlu1 %v4297_v56, %s5540_s23 }
 0x315   : > { %1446 = vrot.lane.b32.xlu0 %v4299_v42, %s5539_s28 }
 0x317   : > { %1478 = vrot.lane.b32.xlu2 %v1437_v4, %s5594_s29  ;;  %1662 = vrot.lane.b32.xlu1 %v4299_v42, %s5590_s30 }
 0x31d   : > { %1656 = vrot.lane.b32.xlu0 %v4307_v7, %s5590_s30 }
 0x31f   : > { %1448 = vrot.lane.b32.xlu2 %v1437_v4, %s5539_s28  ;;  %1632 = vrot.lane.b32.xlu1 %v4299_v42, %s5538_s27 }
 0x325   : > { %1626 = vrot.lane.b32.xlu0 %v4307_v7, %s5538_s27 }
 0x327   : > { %1532 = vrot.lane.b32.xlu2 %v1436_v52, %s5592_s19  ;;  %1602 = vrot.lane.b32.xlu1 %v4299_v42, %s5540_s23 }
 0x32d   : > { %1596 = vrot.lane.b32.xlu0 %v4307_v7, %s5540_s23 }
 0x32f   : > { %1658 = vrot.lane.b32.xlu2 %v1436_v52, %s5590_s30  ;;  %1530 = vrot.lane.b32.xlu1 %v4307_v7, %s5592_s19 }
 0x331   : > { %v1661_v8 = vpop.permute.xlu2 %1660 }
 0x335   : > { %1538 = vrot.lane.b32.xlu0 %v1437_v4, %s5592_s19 }
 0x337   : > { %1628 = vrot.lane.b32.xlu2 %v1436_v52, %s5538_s27  ;;  %1502 = vrot.lane.b32.xlu1 %v1436_v52, %s5593_s25 }
 0x339   : > { %v1631_v38 = vpop.permute.xlu2 %1630 }
 0x33d   : > { %1664 = vrot.lane.b32.xlu0 %v1437_v4, %s5590_s30  ;;  %s4664_s30 = scalar_lea.vmem [#allocation4], %s3153_s20 }
 0x33f   : > { %1598 = vrot.lane.b32.xlu2 %v1436_v52, %s5540_s23  ;;  %1472 = vrot.lane.b32.xlu1 %v1436_v52, %s5594_s29 }
 0x341   : > { %v1601_v0 = vpop.permute.xlu2 %1600 }
 0x345   : > { %1634 = vrot.lane.b32.xlu0 %v1437_v4, %s5538_s27 }
 0x347   : > { %1568 = vrot.lane.b32.xlu2 %v1436_v52, %s5591_s16  ;;  %1442 = vrot.lane.b32.xlu1 %v1436_v52, %s5539_s28 }
 0x349   : > { %v1571_v13 = vpop.permute.xlu1 %1570  ;;  %v4373_v31 = vpop.permute.xlu2 %1536 }
 0x34d   : > { %1604 = vrot.lane.b32.xlu0 %v1437_v4, %s5540_s23 }
 0x34f   : > { %1572 = vrot.lane.b32.xlu2 %v4299_v42, %s5591_s16  ;;  %1566 = vrot.lane.b32.xlu1 %v4307_v7, %s5591_s16  ;;  %v1565_v58 = vpop.permute.xlu0 %1564 }
 0x350   : > { %v1576_v19 = vsel %vm5595_vm0, %v1565_v58, %v1571_v13  ;;  %v1579_v9 = vsel %vm5596_vm5, %v1571_v13, %v1565_v58  ;;  %vm5598_vm0 = vmmov %vm5597_vm14  ;;  %vm5599_vm5 = vcmp.lt.s32.totalorder %v3650_v24, 15 }
 0x351   : > { %v1535_v10 = vpop.permute.xlu1 %1534  ;;  %3290 = vmatpush.msk.msrb.mxu3 %vm3697_vm11, %v1576_v19  ;;  %3291 = vmatpush.msk.msra.mxu1 %vm3693_vm10, %v1579_v9  ;;  %v1501_v12 = vpop.permute.xlu2 %1500  ;;  %vm5605_vm10 = vcmp.lt.s32.totalorder %v3650_v24, 111 }
 0x353   : > { %1753 = vmatpush.msrb.mxu3 %v1436_v52  ;;  %1793 = vmatpush.msra.mxu1 %v1437_v4 }
 0x355   : > { %1574 = vrot.lane.b32.xlu0 %v1437_v4, %s5591_s16  ;;  %1754 = vmatpush.msrb.mxu3 %v4307_v7  ;;  %s4679_s16 = smov 1  }
 0x356   : > { %1794 = vmatpush.msra.mxu1 %v4299_v42 }
 0x357   : > { %v1529_v16 = vpop.permute.xlu0 %1528  ;;  %1755 = vmatpush.msrb.mxu3 %v4297_v56 }
 0x358   : > { %v4393_v20 = vsel %vm5597_vm14, %v1529_v16, %v1535_v10  ;;  %v4397_v22 = vsel %vm5598_vm0, %v1535_v10, %v1529_v16  ;;  %1795 = vmatpush.msra.mxu1 %v4291_v39  ;;  %vm5600_vm14 = vmmov %vm5599_vm5  ;;  %vm5601_vm0 = vcmp.lt.s32.totalorder %v3650_v24, 16 }
 0x359   : > { %v1505_v25 = vpop.permute.xlu1 %1504  ;;  %v1471_v17 = vpop.permute.xlu2 %1470  ;;  %vm5602_vm4 = vmmov %vm5601_vm0 }
 0x35d   : > { %1742 = vperm.xlu0 %3237, %v1739_v28  }
 0x35f   : > { %v1499_v18 = vpop.permute.xlu0 %1498 }
 0x360   : > { %v4406_v33 = vsel %vm5599_vm5, %v1499_v18, %v1505_v25  ;;  %v4410_v36 = vsel %vm5600_vm14, %v1505_v25, %v1499_v18  ;;  %vm5603_vm5 = vcmp.lt.s32.totalorder %v3650_v24, 17 }
 0x361   : > { %v1475_v48 = vpop.permute.xlu1 %1474  ;;  %v1441_v26 = vpop.permute.xlu2 %1440  ;;  %vm5604_vm14 = vmmov %vm5603_vm5 }
 0x367   : > { %v1469_v27 = vpop.permute.xlu0 %1468 }
 0x368   : > { %v4414_v39 = vsel %vm5601_vm0, %v1469_v27, %v1475_v48  ;;  %v4418_v50 = vsel %vm5602_vm4, %v1475_v48, %v1469_v27  ;;  %vm5606_vm0 = vmmov %vm5605_vm10  ;;  %vm5607_vm4 = vcmp.lt.s32.totalorder %v3650_v24, 15  ;;  %v1684_v48 = vld [vmem:[%s5384_s6] sm:$0x77] }
 0x369   : > { %v1445_v23 = vpop.permute.xlu1 %1444  ;;  %v1509_v59 = vpop.permute.xlu2 %1508  ;;  %1746 = vst [vmem:[#allocation1] ss:$2 sm:$0xff] %v1684_v48 }
 0x36f   : > { %v1439_v43 = vpop.permute.xlu0 %1438 }
 0x370   : > { %v4422_v54 = vsel %vm5603_vm5, %v1439_v43, %v1445_v23  ;;  %v4426_v56 = vsel %vm5604_vm14, %v1445_v23, %v1439_v43  ;;  %vm5608_vm5 = vmmov %vm5607_vm4  ;;  %vm5609_vm14 = vcmp.lt.s32.totalorder %v3650_v24, 112 }
 0x371   : > { %v1655_v40 = vpop.permute.xlu1 %1654  ;;  %vm5610_vm11 = vmmov %vm5609_vm14  ;;  %v1479_v7 = vpop.permute.xlu2 %1478 }
 0x372   : > { %v4430_v42 = vsel %vm5605_vm10, %v1655_v40, %v1661_v8  ;;  %v4434_v62 = vsel %vm5606_vm0, %v1661_v8, %v1655_v40  ;;  %vm5611_vm10 = vcmp.lt.s32.totalorder %v3650_v24, 16 }
 0x373   : > { %vm5612_vm0 = vmmov %vm5611_vm10 }
 0x377   : > { %v1507_v63 = vpop.permute.xlu0 %1506 }
 0x378   : > { %v1511_v32 = vsel %vm5607_vm4, %v1501_v12, %v1507_v63  ;;  %v1514_v35 = vsel %vm5608_vm5, %v1507_v63, %v1501_v12  ;;  %vm5613_vm4 = vcmp.lt.s32.totalorder %v3650_v24, 113 }
 0x379   : > { %v1625_v57 = vpop.permute.xlu1 %1624  ;;  %vm5614_vm5 = vmmov %vm5613_vm4  ;;  %v4464_v52 = vpop.permute.xlu2 %1448 }
 0x37a   : > { %v4442_v34 = vsel %vm5609_vm14, %v1625_v57, %v1631_v38  ;;  %v4446_v61 = vsel %vm5610_vm11, %v1631_v38, %v1625_v57  ;;  %vm5615_vm11 = vcmp.lt.s32.totalorder %v3650_v24, 17 }
 0x37b   : > { %vm5616_vm14 = vmmov %vm5615_vm11 }
 0x37f   : > { %v1477_v55 = vpop.permute.xlu0 %1476 }
 0x380   : > { %v4450_v3 = vsel %vm5611_vm10, %v1471_v17, %v1477_v55  ;;  %v4454_v4 = vsel %vm5612_vm0, %v1477_v55, %v1471_v17  ;;  %vm5617_vm10 = vcmp.lt.s32.totalorder %v3650_v24, 111 }
 0x381   : > { %v1595_v60 = vpop.permute.xlu1 %1594  ;;  %v1533_v19 = vpop.permute.xlu2 %1532  ;;  %vm5618_vm0 = vmmov %vm5617_vm10 }
 0x382   : > { %v4458_v6 = vsel %vm5613_vm4, %v1595_v60, %v1601_v0  ;;  %v4462_v53 = vsel %vm5614_vm5, %v1601_v0, %v1595_v60  ;;  %vm5619_vm4 = vcmp.lt.s32.totalorder %v3650_v24, 112 }
 0x383   : > { %vm5620_vm5 = vmmov %vm5619_vm4 }
 0x387   : > { %v1447_v8 = vpop.permute.xlu0 %1446 }
 0x388   : > { %v4468_v38 = vsel %vm5615_vm11, %v1441_v26, %v1447_v8  ;;  %v4472_v13 = vsel %vm5616_vm14, %v1447_v8, %v1441_v26  ;;  %vm5621_vm11 = vcmp.lt.s32.totalorder %v3650_v24, 113 }
 0x389   : > { %v1663_v58 = vpop.permute.xlu1 %1662  ;;  %v1659_v17 = vpop.permute.xlu2 %1658  ;;  %vm5622_vm14 = vmmov %vm5621_vm11 }
 0x38f   : > { %v1657_v9 = vpop.permute.xlu0 %1656 }
 0x390   : > { %v1667_v10 = vsel %vm5617_vm10, %v1657_v9, %v1663_v58  ;;  %v1670_v0 = vsel %vm5618_vm0, %v1663_v58, %v1657_v9  ;;  %vm5623_vm10 = vcmp.lt.s32.totalorder %v3650_v24, 1 }
 0x391   : > { %v1633_v12 = vpop.permute.xlu1 %1632  ;;  %vm5624_vm0 = vmmov %vm5623_vm10  ;;  %v1629_v57 = vpop.permute.xlu2 %1628 }
 0x397   : > { %v1627_v16 = vpop.permute.xlu0 %1626 }
 0x398   : > { %v4480_v25 = vsel %vm5619_vm4, %v1627_v16, %v1633_v12  ;;  %v4484_v28 = vsel %vm5620_vm5, %v1633_v12, %v1627_v16  ;;  %vm5625_vm4 = vmmov %vm5624_vm0  ;;  %v4525_v16 = vld.sshfl [vmem:[#allocation1 + $0x8] sm:$0xff pattern:$0x75316420] }
 0x399   : > { %v1603_v18 = vpop.permute.xlu1 %1602  ;;  %vm5626_vm5 = vmmov %vm5624_vm0 }
 0x39f   : > { %v1597_v26 = vpop.permute.xlu0 %1596 }
 0x3a0   : > { %v4491_v27 = vsel %vm5621_vm11, %v1597_v26, %v1603_v18  ;;  %v4495_v23 = vsel %vm5622_vm14, %v1603_v18, %v1597_v26  ;;  %vm5627_vm11 = vcmp.lt.s32.totalorder %v3650_v24, 15 }
 0x3a1   : > { %v1531_v43 = vpop.permute.xlu1 %1530  ;;  %vm5628_vm14 = vmmov %vm5627_vm11 }
 0x3a2   : > { %v1541_v40 = vsel %vm5623_vm10, %v1531_v43, %v4373_v31  ;;  %v1544_v63 = vsel %vm5624_vm0, %v4373_v31, %v1531_v43  ;;  %vm5629_vm10 = vnez %v5489_v44  ;;  %v1599_v31 = vpop.permute.xlu2 %1598  ;;  %vm5630_vm0 = vcmp.lt.s32.totalorder %v3650_v24, 111 }
 0x3a7   : > { %v1539_v55 = vpop.permute.xlu0 %1538 }
 0x3a8   : > { %v1542_v60 = vsel %vm5625_vm4, %v1533_v19, %v1539_v55  ;;  %v1545_v8 = vsel %vm5626_vm5, %v1539_v55, %v1533_v19  ;;  %v1747_v19 = vld.sshfl [vmem:[#allocation1] sm:$0xff pattern:$0x75316420]  ;;  %vm5631_vm4 = vmmov %vm5630_vm0  ;;  %vm5632_vm5 = vcmp.lt.s32.totalorder %v3650_v24, 16 }
 0x3a9   : > { %v1503_v58 = vpop.permute.xlu1 %1502  ;;  %3292 = vmatpush.msk.msrb.mxu3 %vm3679_vm6, %v1545_v8  ;;  %3293 = vmatpush.msk.msra.mxu1 %vm5629_vm10, %v1542_v60  ;;  %1834 = vst [vmem:[#allocation1] ss:$2 sm:$0xff] %v3601_v1 }
 0x3aa   : > { %v1512_v9 = vsel %vm5627_vm11, %v1503_v58, %v1509_v59  ;;  %v1515_v12 = vsel %vm5628_vm14, %v1509_v59, %v1503_v58  ;;  %vm5633_vm11 = vmmov %vm5632_vm5  ;;  %vm5634_vm14 = vnez %v5503_v5 }
 0x3ab   : > { %3294 = vmatpush.msk.msrb.mxu3 %vm3679_vm6, %v1544_v63  ;;  %3295 = vmatpush.msk.msra.mxu1 %vm5629_vm10, %v1541_v40 }
 0x3ad   : > { %3296 = vmatpush.msk.msrb.mxu3 %vm3679_vm6, %v4397_v22  ;;  %3297 = vmatpush.msk.msra.mxu1 %vm5629_vm10, %v4393_v20  ;;  %vm5635_vm10 = vnez %v5501_v2 }
 0x3af   : > { %v1665_v59 = vpop.permute.xlu0 %1664  ;;  %3298 = vmatpush.msk.msrb.mxu3 %vm3826_vm3, %v1515_v12  ;;  %3299 = vmatpush.msk.msra.mxu1 %vm3818_vm15, %v1512_v9 }
 0x3b0   : > { %v1668_v18 = vsel %vm5630_vm0, %v1659_v17, %v1665_v59  ;;  %v1671_v48 = vsel %vm5631_vm4, %v1665_v59, %v1659_v17  ;;  %vm5636_vm0 = vcmp.lt.s32.totalorder %v3650_v24, 112  ;;  %v1836_v17 = vld.sshfl [vmem:[#allocation1 + $0x8] sm:$0xff pattern:$0x75316420] }
 0x3b1   : > { %v1473_v22 = vpop.permute.xlu1 %1472  ;;  %3300 = vmatpush.msk.msrb.mxu3 %vm3826_vm3, %v1514_v35  ;;  %3301 = vmatpush.msk.msrb.mxu2 %vm5634_vm14, %v1668_v18  ;;  %vm5637_vm4 = vmmov %vm5636_vm0 }
 0x3b2   : > { %v1482_v20 = vsel %vm5632_vm5, %v1473_v22, %v1479_v7  ;;  %v1485_v26 = vsel %vm5633_vm11, %v1479_v7, %v1473_v22  ;;  %3302 = vmatpush.msk.msra.mxu1 %vm3818_vm15, %v1511_v32  ;;  %3303 = vmatpush.msk.msra.mxu0 %vm5635_vm10, %v1671_v48  ;;  %v1569_v32 = vpop.permute.xlu2 %1568  ;;  %vm5638_vm5 = vcmp.lt.s32.totalorder %v3650_v24, 17 }
 0x3b3   : > { %3304 = vmatpush.msk.msrb.mxu3 %vm3826_vm3, %v4410_v36  ;;  %3305 = vmatpush.msk.msrb.mxu2 %vm5634_vm14, %v1667_v10  ;;  %vm5639_vm11 = vmmov %vm5638_vm5 }
 0x3b4   : > { %3306 = vmatpush.msk.msra.mxu1 %vm3818_vm15, %v4406_v33  ;;  %3307 = vmatpush.msk.msra.mxu0 %vm5635_vm10, %v1670_v0 }
 0x3b5   : > { %3308 = vmatpush.msk.msrb.mxu3 %vm5578_vm13, %v1485_v26  ;;  %3309 = vmatpush.msk.msrb.mxu2 %vm5634_vm14, %v4430_v42  ;;  %vm5642_vm14 = vcmp.lt.s32.totalorder %v3650_v24, 127 }
 0x3b6   : > { %3310 = vmatpush.msk.msra.mxu1 %vm5579_vm7, %v1482_v20  ;;  %3311 = vmatpush.msk.msra.mxu0 %vm5635_vm10, %v4434_v62  ;;  %vm5644_vm10 = vnez %v5493_v46 }
 0x3b7   : > { %v1635_v35 = vpop.permute.xlu0 %1634  ;;  %3312 = vmatpush.msk.msrb.mxu3 %vm5578_vm13, %v4454_v4 }
 0x3b8   : > { %v1638_v33 = vsel %vm5636_vm0, %v1629_v57, %v1635_v35  ;;  %v1641_v36 = vsel %vm5637_vm4, %v1635_v35, %v1629_v57  ;;  %3313 = vmatpush.msk.msra.mxu1 %vm5579_vm7, %v4450_v3  ;;  %vm5647_vm0 = vnez %v5497_v49  ;;  %vm5648_vm4 = vnez %v5495_v47  ;;  %v1835_v57 = vld.sshfl [vmem:[#allocation1] sm:$0xff pattern:$0x75316420] }
 0x3b9   : > { %v1443_v42 = vpop.permute.xlu1 %1442  ;;  %3314 = vmatpush.msk.msrb.mxu3 %vm5578_vm13, %v4418_v50  ;;  %3315 = vmatpush.msk.msrb.mxu2 %vm3655_vm2, %v1638_v33  ;;  %vm5640_vm13 = vcmp.lt.s32.totalorder %v3650_v24, 113 }
 0x3ba   : > { %v1452_v7 = vsel %vm5638_vm5, %v1443_v42, %v4464_v52  ;;  %v1455_v62 = vsel %vm5639_vm11, %v4464_v52, %v1443_v42  ;;  %3316 = vmatpush.msk.msra.mxu1 %vm5579_vm7, %v4414_v39  ;;  %3317 = vmatpush.msk.msra.mxu0 %vm5527_vm8, %v1641_v36  ;;  %vm5641_vm7 = vmmov %vm5640_vm13  ;;  %vm5649_vm5 = vcmask 719872  }
 0x3bb   : > { %3318 = vmatpush.msk.msrb.mxu3 %vm5587_vm1, %v1455_v62  ;;  %3319 = vmatpush.msk.msrb.mxu2 %vm3655_vm2, %v4480_v25  ;;  %vm5650_vm11 = vmmov %vm5649_vm5 }
 0x3bc   : > { %3320 = vmatpush.msk.msra.mxu1 %vm5588_vm9, %v1452_v7  ;;  %3321 = vmatpush.msk.msra.mxu0 %vm5527_vm8, %v4484_v28 }
 0x3bd   : > { %3322 = vmatpush.msk.msrb.mxu3 %vm5587_vm1, %v4472_v13  ;;  %3323 = vmatpush.msk.msrb.mxu2 %vm3655_vm2, %v4442_v34  ;;  %v1573_v34 = vpop.permute.xlu2 %1572 }
 0x3be   : > { %3324 = vmatpush.msk.msra.mxu1 %vm5588_vm9, %v4468_v38  ;;  %3325 = vmatpush.msk.msra.mxu0 %vm5527_vm8, %v4446_v61  ;;  %vm5643_vm8 = vmmov %vm5642_vm14 }
 0x3bf   : > { %v1605_v39 = vpop.permute.xlu0 %1604  ;;  %3326 = vmatpush.msk.msrb.mxu3 %vm5587_vm1, %v4426_v56  ;;  %vm5645_vm1 = vmmov %vm5643_vm8 }
 0x3c0   : > { %v1608_v50 = vsel %vm5640_vm13, %v1599_v31, %v1605_v39  ;;  %v1611_v3 = vsel %vm5641_vm7, %v1605_v39, %v1599_v31  ;;  %3327 = vmatpush.msk.msra.mxu1 %vm5588_vm9, %v4422_v54  ;;  %1768 = vmatmul.f32.vlgmr.msrb.gmra.mxu3 %v1747_v19  ;;  %vm5646_vm9 = vmmov %vm5645_vm1  ;;  %vm5651_vm13 = vcmask 1043456  }
 0x3c1   : > { %v1567_v4 = vpop.permute.xlu1 %1566  ;;  %1808 = vmatmul.f32.vlgmr.msra.gmra.mxu1 %v1747_v19  ;;  %3328 = vmatpush.msk.msrb.mxu2 %vm3705_vm12, %v1608_v50  ;;  %vm5652_vm7 = vmmov %vm5651_vm13 }
 0x3c2   : > { %v1577_v61 = vsel %vm5642_vm14, %v1567_v4, %v1573_v34  ;;  %v1580_v52 = vsel %vm5643_vm8, %v1573_v34, %v1567_v4  ;;  %3329 = vmatpush.msk.msra.mxu0 %vm5644_vm10, %v1611_v3 }
 0x3c3   : > { %3330 = vmatpush.msk.msrb.mxu2 %vm3705_vm12, %v4491_v27 }
 0x3c4   : > { %3331 = vmatpush.msk.msra.mxu0 %vm5644_vm10, %v4495_v23 }
 0x3c5   : > { %3332 = vmatpush.msk.msrb.mxu2 %vm3705_vm12, %v4458_v6 }
 0x3c6   : > { %3333 = vmatpush.msk.msra.mxu0 %vm5644_vm10, %v4462_v53 }
 0x3c7   : > { %v1575_v54 = vpop.permute.xlu0 %1574 }
 0x3c8   : > { %v1578_v56 = vsel %vm5645_vm1, %v1569_v32, %v1575_v54  ;;  %v1581_v38 = vsel %vm5646_vm9, %v1575_v54, %v1569_v32 }
 0x3c9   : > { %3334 = vmatpush.msk.msrb.mxu2 %vm5647_vm0, %v1578_v56  ;;  %3335 = vmatpush.msk.msra.mxu0 %vm5648_vm4, %v1581_v38 }
 0x3cb   : > { %3336 = vmatpush.msk.msrb.mxu2 %vm5647_vm0, %v1577_v61  ;;  %3337 = vmatpush.msk.msra.mxu0 %vm5648_vm4, %v1580_v52 }
 0x3cc   : > { %3125 = vmatmul.msk.f32.vlgmr.msrb.gmra.mxu2 %vm5649_vm5, %v4525_v16  ;;  %3126 = vmatmul.msk.f32.vlgmr.msra.gmra.mxu0 %vm5650_vm11, %v4525_v16 }
 0x3cf   : > { %v1743_v53 = vpop.permute.xlu0 %1742 }
 0x43e   : > { %v1809_v6 = vpop.f32.mrf.mxu1 }
 0x43f   : > { %v1810_v13 = vadd.f32 %v1809_v6, %v1743_v53 }
 0x443   : > { %v1769_v25 = vpop.f32.mrf.mxu3 }
 0x444   : > { %v1770_v27 = vadd.f32 %v1769_v25, %v1743_v53 }
 0x449   : > { %v1829_v10 = vpop.f32.mrf.mxu0 }
 0x44a   : > { %v1830_v0 = vadd.f32 %v1829_v10, %v1810_v13  }
 0x44c   : > { %v1833_v28 = vadd.f32 1.0, %v1830_v0  ;;  %v1843_v40 = vrot.slane %v1830_v0, 4 }
 0x44e   : > { %v1840_v43 = vmul.f32 %v1836_v17, %v1833_v28  }
 0x44f   : > { %v1789_v23 = vpop.f32.mrf.mxu2 }
 0x450   : > { %v1790_v63 = vadd.f32 %v1789_v23, %v1770_v27   ;;  %v1849_v8 = vrot.slane %v1840_v43, 4 }
 0x452   : > { %v1832_v55 = vadd.f32 1.0, %v1790_v63  ;;  %v1844_v60 = vsel %vm5651_vm13, %v1790_v63, %v1843_v40 }
 0x453   : > { %1846 = vst [vmem:[%s4664_s30] sm:$0x77] %v1844_v60 }
 0x454   : > { %v1839_v58 = vmul.f32 %v1835_v57, %v1832_v55  }
 0x456   : > { %v1850_v9 = vsel %vm5652_vm7, %v1839_v58, %v1849_v8 }
 0x457   : > { %1852 = vst [vmem:[%s4668_s18] sm:$0x77] %v1850_v9 }
 0x458 LB: >> { %s3475_s19 = smov 127   ;;  %s5458_s25 = smov 111   ;;  %1929 = vst [vmem:[#allocation2 + $0x60] sm:$0x7] %v3452_v58  ;;  %vm5653_vm14 = vcmp.lt.s32.totalorder %v3650_v24, 113  ;;  %vm5655_vm10 = vnez %v5493_v46  ;;  %vm5656_vm1 = vcmp.lt.s32.totalorder %v3650_v24, 127  ;;  %vm5660_vm5 = vnez %v5497_v49  ;;  %s3464_s16 = sphi %s4679_s16, %s1858_s16   ;;  %v3460_v63 = vphi %v1790_v63, %v2806_v63   ;;  %v3456_v0 = vphi %v1830_v0, %v2846_v0   ;;  %v3452_v58 = vphi %v1839_v58, %v2855_v58   ;;  %v3448_v43 = vphi %v1840_v43, %v2856_v43  }
 0x459   : >> { %2065 = vrot.lane.b32.xlu1 %v3460_v63, %s3475_s19  ;;  %2115 = vrot.lane.b32.xlu0 %v3460_v63, %s5458_s25  ;;  %s3477_s29 = smov 113   ;;  %s5474_s27 = smov 112   ;;  %1930 = vst [vmem:[#allocation2 + $0x68] sm:$0x7] %v3448_v43  ;;  %vm5654_vm8 = vmmov %vm5653_vm14  ;;  %vm5658_vm0 = vcmp.lt.s32.totalorder %v3650_v24, 111  ;;  %vm5661_vm11 = vnez %v5495_v47  ;;  %vm5662_vm13 = vnez %v5503_v5  ;;  %vm5663_vm7 = vnez %v5501_v2 }
 0x45a   : >> { %2083 = vrot.lane.b32.xlu2 %v3460_v63, %s3477_s29  ;;  %s5461_s28 = smov 17   ;;  %s5463_s23 = smov 16   ;;  %vm5657_vm9 = vmmov %vm5656_vm1  ;;  %v2059_v23 = vrot.slane %v3460_v63, 5 }
 0x45b   : >> { %s5472_s17 = smov 15   ;;  %s5465_s24 = smov 1   ;;  %vm5659_vm4 = vmmov %vm5658_vm0 }
 0x45c   : >> { %2063 = vst [vmem:[#allocation2 + $0x90] sm:$0x38] %v2059_v23 }
 0x461   : >> { %2067 = vrot.lane.b32.xlu1 %v3456_v0, %s3475_s19  ;;  %2117 = vrot.lane.b32.xlu0 %v3456_v0, %s5458_s25 }
 0x462   : >> { %2085 = vrot.lane.b32.xlu2 %v3456_v0, %s3477_s29 }
 0x469   : >> { %2101 = vrot.lane.b32.xlu1 %v3456_v0, %s5474_s27  ;;  %2099 = vrot.lane.b32.xlu0 %v3460_v63, %s5474_s27 }
 0x46a   : >> { %1997 = vrot.lane.b32.xlu2 %v3460_v63, %s5461_s28 }
 0x471   : >> { %2015 = vrot.lane.b32.xlu1 %v3460_v63, %s5463_s23  ;;  %1999 = vrot.lane.b32.xlu0 %v3456_v0, %s5461_s28 }
 0x472   : >> { %2017 = vrot.lane.b32.xlu2 %v3456_v0, %s5463_s23 }
 0x479   : >> { %2033 = vrot.lane.b32.xlu1 %v3456_v0, %s5472_s17  ;;  %2031 = vrot.lane.b32.xlu0 %v3460_v63, %s5472_s17 }
 0x47a   : >> { %2047 = vrot.lane.b32.xlu2 %v3460_v63, %s5465_s24 }
 0x481   : >> { %2049 = vrot.lane.b32.xlu0 %v3456_v0, %s5465_s24  ;;  %1947 = vrot.lane.b32.xlu1 %v3452_v58, %s3477_s29 }
 0x482   : >> { %1949 = vrot.lane.b32.xlu2 %v3448_v43, %s3477_s29 }
 0x489   : >> { %1965 = vrot.lane.b32.xlu0 %v3452_v58, %s5474_s27  ;;  %1967 = vrot.lane.b32.xlu1 %v3448_v43, %s5474_s27 }
 0x48a   : >> { %1981 = vrot.lane.b32.xlu2 %v3452_v58, %s5458_s25 }
 0x491   : >> { %1983 = vrot.lane.b32.xlu0 %v3448_v43, %s5458_s25  ;;  %1931 = vrot.lane.b32.xlu1 %v3452_v58, %s3475_s19  ;;  %s5704_s25 = smov 111  }
 0x492   : >> { %1933 = vrot.lane.b32.xlu2 %v3448_v43, %s3475_s19 }
 0x499   : >> { %1879 = vrot.lane.b32.xlu0 %v3452_v58, %s5463_s23  ;;  %1881 = vrot.lane.b32.xlu1 %v3448_v43, %s5463_s23  ;;  %s5703_s23 = smov 17  }
 0x49a   : >> { %1897 = vrot.lane.b32.xlu2 %v3452_v58, %s5472_s17 }
 0x4a1   : >> { %1899 = vrot.lane.b32.xlu0 %v3448_v43, %s5472_s17  ;;  %1913 = vrot.lane.b32.xlu1 %v3452_v58, %s5465_s24 }
 0x4a2   : >> { %1915 = vrot.lane.b32.xlu2 %v3448_v43, %s5465_s24 }
 0x4a9   : >> { %1863 = vrot.lane.b32.xlu0 %v3452_v58, %s5461_s28  ;;  %1865 = vrot.lane.b32.xlu1 %v3448_v43, %s5461_s28  ;;  %v2060_v43 = vrot.slane %v3456_v0, 5  ;;  %s5702_s28 = smov 16  }
 0x4ab   : >> { %2064 = vst [vmem:[#allocation2 + $0x98] sm:$0x38] %v2060_v43 }
 0x4b4   : >> { %v2084_v12 = vpop.permute.xlu2 %2083 }
 0x4bc   : >> { %v2086_v31 = vpop.permute.xlu2 %2085 }
 0x4bd   : >> { %v2087_v59 = vsel %vm5653_vm14, %v2084_v12, %v2086_v31  ;;  %v2088_v19 = vsel %vm5654_vm8, %v2086_v31, %v2084_v12  ;;  %vm5664_vm14 = vcmp.lt.s32.totalorder %v3650_v24, 112 }
 0x4be   : >> { %v2089_v16 = vsel %vm3705_vm12, %v2087_v59, 0.0  ;;  %v2090_v18 = vsel %vm5655_vm10, %v2088_v19, 0.0  ;;  %vm5665_vm8 = vmmov %vm5664_vm14 }
 0x4bf   : >> { %v2093_v48 = vrot.slane %v2089_v16, 7  ;;  %v2094_v22 = vrot.slane %v2090_v18, 7 }
 0x4c1   : >> { %2097 = vst [vmem:[#allocation2 + $0xa0] sm:$0xe] %v2093_v48 }
 0x4c2   : >> { %2098 = vst [vmem:[#allocation2 + $0xa8] sm:$0xe] %v2094_v22 }
 0x4c4   : >> { %v1998_v20 = vpop.permute.xlu2 %1997 }
 0x4cb   : >> { %v2066_v26 = vpop.permute.xlu1 %2065  ;;  %v2116_v32 = vpop.permute.xlu0 %2115 }
 0x4cc   : >> { %v2018_v39 = vpop.permute.xlu2 %2017 }
 0x4d3   : >> { %v2068_v35 = vpop.permute.xlu1 %2067  ;;  %v2118_v33 = vpop.permute.xlu0 %2117 }
 0x4d4   : >> { %v2069_v36 = vsel %vm5656_vm1, %v2066_v26, %v2068_v35  ;;  %v2070_v42 = vsel %vm5657_vm9, %v2068_v35, %v2066_v26  ;;  %v2119_v7 = vsel %vm5658_vm0, %v2116_v32, %v2118_v33  ;;  %v2120_v62 = vsel %vm5659_vm4, %v2118_v33, %v2116_v32  ;;  %v2048_v27 = vpop.permute.xlu2 %2047 }
 0x4d5   : >> { %v2071_v50 = vsel %vm5660_vm5, %v2069_v36, 0.0  ;;  %v2072_v3 = vsel %vm5661_vm11, %v2070_v42, 0.0  ;;  %v2121_v34 = vsel %vm5662_vm13, %v2119_v7, 0.0  ;;  %v2122_v52 = vsel %vm5663_vm7, %v2120_v62, 0.0 }
 0x4d6   : >> { %v2075_v4 = vrot.slane %v2071_v50, 2  ;;  %v2076_v61 = vrot.slane %v2072_v3, 2  ;;  %v2125_v54 = vrot.slane %v2121_v34, 1  ;;  %v2126_v56 = vrot.slane %v2122_v52, 1 }
 0x4d7   : >> { %vm5666_vm1 = vnez %v5487_v30  ;;  %vm5667_vm0 = vcmp.lt.s32.totalorder %v3650_v24, 16  ;;  %vm5671_vm11 = vnez %v5507_v14  ;;  %vm5672_vm9 = vnez %v5505_v11 }
 0x4d8   : >> { %2079 = vst [vmem:[#allocation2 + $0x90] sm:$0xc0] %v2075_v4  ;;  %vm5668_vm4 = vmmov %vm5667_vm0  ;;  %vm5673_vm5 = vnez %v5511_v21 }
 0x4d9   : >> { %2080 = vst [vmem:[#allocation2 + $0x98] sm:$0xc0] %v2076_v61 }
 0x4da   : >> { %2081 = vst [vmem:[#allocation2 + $0xa0] sm:$0x1] %v2075_v4 }
 0x4db   : >> { %2082 = vst [vmem:[#allocation2 + $0xa8] sm:$0x1] %v2076_v61  ;;  %v2102_v38 = vpop.permute.xlu1 %2101  ;;  %v2100_v6 = vpop.permute.xlu0 %2099 }
 0x4dc   : >> { %2129 = vst [vmem:[#allocation2 + $0xa0] sm:$0x80] %v2125_v54  ;;  %v2103_v53 = vsel %vm5664_vm14, %v2100_v6, %v2102_v38  ;;  %v2104_v13 = vsel %vm5665_vm8, %v2102_v38, %v2100_v6  ;;  %vm5669_vm14 = vcmp.lt.s32.totalorder %v3650_v24, 17  ;;  %v1950_v26 = vpop.permute.xlu2 %1949 }
 0x4dd   : >> { %2130 = vst [vmem:[#allocation2 + $0xa8] sm:$0x80] %v2126_v56  ;;  %v2105_v10 = vsel %vm3655_vm2, %v2103_v53, 0.0  ;;  %v2106_v25 = vsel %vm5666_vm1, %v2104_v13, 0.0  ;;  %vm5670_vm8 = vmmov %vm5669_vm14 }
 0x4de   : >> { %2131 = vst [vmem:[#allocation2 + $0xb0] sm:$0x3] %v2125_v54  ;;  %v2109_v28 = vrot.slane %v2105_v10, 4  ;;  %v2110_v17 = vrot.slane %v2106_v25, 4 }
 0x4df   : >> { %2132 = vst [vmem:[#allocation2 + $0xb8] sm:$0x3] %v2126_v56 }
 0x4e0   : >> { %2113 = vst [vmem:[#allocation2 + $0xa0] sm:$0x70] %v2109_v28 }
 0x4e1   : >> { %2114 = vst [vmem:[#allocation2 + $0xa8] sm:$0x70] %v2110_v17 }
 0x4e3   : >> { %v2016_v40 = vpop.permute.xlu1 %2015  ;;  %v2000_v57 = vpop.permute.xlu0 %1999 }
 0x4e4   : >> { %v2019_v55 = vsel %vm5667_vm0, %v2016_v40, %v2018_v39  ;;  %v2020_v60 = vsel %vm5668_vm4, %v2018_v39, %v2016_v40  ;;  %v2001_v8 = vsel %vm5669_vm14, %v1998_v20, %v2000_v57  ;;  %v2002_v63 = vsel %vm5670_vm8, %v2000_v57, %v1998_v20  ;;  %v1982_v50 = vpop.permute.xlu2 %1981 }
 0x4e5   : >> { %v2157_v0 = vld [vmem:[#allocation2 + $0xb0] sm:$0x3]  ;;  %v2021_v58 = vsel %vm5671_vm11, %v2020_v60, 0.0  ;;  %v2022_v9 = vsel %vm5672_vm9, %v2019_v55, 0.0  ;;  %v2003_v12 = vsel %vm5673_vm5, %v2002_v63, 0.0  ;;  %vm5674_vm0 = vnez %v5509_v15 }
 0x4e6   : >> { %v2004_v31 = vsel %vm5674_vm0, %v2001_v8, 0.0  ;;  %vm5675_vm4 = vcmask 1041408   ;;  %v2158_v59 = vld [vmem:[#allocation2 + $0xb8] sm:$0x3]  ;;  %v2025_v19 = vrot.slane %v2021_v58, 6  ;;  %v2026_v16 = vrot.slane %v2022_v9, 6 }
 0x4e7   : >> { %3127 = vmatpush.msk.msra.mxu0 %vm5675_vm4, %v2157_v0  ;;  %v2007_v18 = vrot.slane %v2003_v12, 1  ;;  %vm5676_vm14 = vmmov %vm5675_vm4  ;;  %v2008_v48 = vrot.slane %v2004_v31, 1  ;;  %v2155_v22 = vld [vmem:[#allocation2 + $0xa0] sm:$0xff]  ;;  %vm5677_vm8 = vcmp.lt.s32.totalorder %v3650_v24, 15  ;;  %vm5683_vm5 = vnez %v5489_v44 }
 0x4e8   : >> { %3130 = vmatpush.msk.msra.mxu1 %vm5676_vm14, %v2158_v59  ;;  %2029 = vst [vmem:[#allocation2 + $0x80] sm:$0x1c] %v2025_v19  ;;  %v2156_v20 = vld [vmem:[#allocation2 + $0xa8] sm:$0xff]  ;;  %vm5678_vm4 = vmmov %vm5677_vm8  ;;  %vm5679_vm14 = vcmp.lt.s32.totalorder %v3650_v24, 1 }
 0x4e9   : >> { %2190 = vmatpush.msra.mxu0 %v2155_v22  ;;  %2030 = vst [vmem:[#allocation2 + $0x88] sm:$0x1c] %v2026_v16 }
 0x4ea   : >> { %2213 = vmatpush.msra.mxu1 %v2156_v20  ;;  %2011 = vst [vmem:[#allocation2 + $0x70] sm:$0x80] %v2007_v18 }
 0x4eb   : >> { %2012 = vst [vmem:[#allocation2 + $0x78] sm:$0x80] %v2008_v48  ;;  %v2034_v32 = vpop.permute.xlu1 %2033  ;;  %v2032_v35 = vpop.permute.xlu0 %2031 }
 0x4ec   : >> { %2013 = vst [vmem:[#allocation2 + $0x80] sm:$0x3] %v2007_v18  ;;  %v2035_v33 = vsel %vm5677_vm8, %v2032_v35, %v2034_v32  ;;  %v2036_v36 = vsel %vm5678_vm4, %v2034_v32, %v2032_v35  ;;  %vm5680_vm8 = vmmov %vm5679_vm14  ;;  %vm5681_vm4 = vcmp.lt.s32.totalorder %v3650_v24, 113  ;;  %v1934_v57 = vpop.permute.xlu2 %1933 }
 0x4ed   : >> { %2014 = vst [vmem:[#allocation2 + $0x88] sm:$0x3] %v2008_v48  ;;  %v2037_v42 = vsel %vm3826_vm3, %v2036_v36, 0.0  ;;  %v2038_v7 = vsel %vm3818_vm15, %v2035_v33, 0.0  ;;  %vm5682_vm0 = vmmov %vm5681_vm4 }
 0x4ee   : >> { %v2041_v62 = vrot.slane %v2037_v42, 3  ;;  %v2042_v39 = vrot.slane %v2038_v7, 3 }
 0x4f0   : >> { %2045 = vst [vmem:[#allocation2 + $0x80] sm:$0xe0] %v2041_v62 }
 0x4f1   : >> { %2046 = vst [vmem:[#allocation2 + $0x88] sm:$0xe0] %v2042_v39 }
 0x4f3   : >> { %v2050_v3 = vpop.permute.xlu0 %2049  ;;  %v1948_v34 = vpop.permute.xlu1 %1947 }
 0x4f4   : >> { %v2051_v4 = vsel %vm5679_vm14, %v2048_v27, %v2050_v3  ;;  %v2052_v61 = vsel %vm5680_vm8, %v2050_v3, %v2048_v27  ;;  %v1951_v52 = vsel %vm5681_vm4, %v1948_v34, %v1950_v26  ;;  %v1952_v54 = vsel %vm5682_vm0, %v1950_v26, %v1948_v34  ;;  %v1898_v33 = vpop.permute.xlu2 %1897 }
 0x4f5   : >> { %v2053_v56 = vsel %vm3679_vm6, %v2052_v61, 0.0  ;;  %v2054_v38 = vsel %vm5683_vm5, %v2051_v4, 0.0  ;;  %v1953_v6 = vsel %vm3705_vm12, %v1951_v52, 0.0  ;;  %v1954_v53 = vsel %vm5655_vm10, %v1952_v54, 0.0 }
 0x4f6   : >> { %2055 = vst [vmem:[#allocation2 + $0x90] sm:$0x7] %v2053_v56  ;;  %v1957_v13 = vrot.slane %v1953_v6, 2  ;;  %v1958_v10 = vrot.slane %v1954_v53, 2  ;;  %vm5684_vm0 = vcmp.lt.s32.totalorder %v3650_v24, 112  ;;  %vm5686_vm8 = vcmp.lt.s32.totalorder %v3650_v24, 111 }
 0x4f7   : >> { %2056 = vst [vmem:[#allocation2 + $0x98] sm:$0x7] %v2054_v38  ;;  %vm5685_vm14 = vmmov %vm5684_vm0  ;;  %v2151_v63 = vld [vmem:[#allocation2 + $0x80] sm:$0xff]  ;;  %vm5690_vm10 = vnez %v5497_v49  ;;  %v2159_v38 = vld [vmem:[%s5387_s9] sm:$0xff] }
 0x4f8   : >> { %1961 = vst [vmem:[#allocation2 + $0x60] sm:$0xc0] %v1957_v13  ;;  %v2152_v0 = vld [vmem:[#allocation2 + $0x88] sm:$0xff]  ;;  %vm5687_vm4 = vmmov %vm5686_vm8 }
 0x4f9   : >> { %1962 = vst [vmem:[#allocation2 + $0x68] sm:$0xc0] %v1958_v10 }
 0x4fa   : >> { %1963 = vst [vmem:[#allocation2 + $0x70] sm:$0x1] %v1957_v13  ;;  %v3483_v13 = vmov 0  }
 0x4fb   : >> { %1964 = vst [vmem:[#allocation2 + $0x78] sm:$0x1] %v1958_v10  ;;  %v1966_v25 = vpop.permute.xlu0 %1965  ;;  %v1968_v28 = vpop.permute.xlu1 %1967  ;;  %3240 = vset.pattern.permute.xlu0 %v3483_v13  ;;  %3239 = vset.pattern.permute.xlu2 %v3483_v13 }
 0x4fc   : >> { %v1969_v17 = vsel %vm5684_vm0, %v1966_v25, %v1968_v28  ;;  %v1970_v27 = vsel %vm5685_vm14, %v1968_v28, %v1966_v25  ;;  %vm5688_vm0 = vcmp.lt.s32.totalorder %v3650_v24, 127  ;;  %v1916_v54 = vpop.permute.xlu2 %1915  ;;  %2163 = vperm.xlu0 %3240, %v2159_v38   ;;  %3241 = vset.pattern.permute.xlu1 %v3483_v13 }
 0x4fd   : >> { %v1971_v23 = vsel %vm3655_vm2, %v1969_v17, 0.0  ;;  %v1972_v43 = vsel %vm5666_vm1, %v1970_v27, 0.0  ;;  %v2153_v40 = vld [vmem:[#allocation2 + $0x90] sm:$0xff]  ;;  %vm5689_vm14 = vmmov %vm5688_vm0 }
 0x4fe   : >> { %v1975_v55 = vrot.slane %v1971_v23, 7  ;;  %v1976_v60 = vrot.slane %v1972_v43, 7  ;;  %2191 = vmatpush.msra.mxu0 %v2153_v40  ;;  %v2154_v8 = vld [vmem:[#allocation2 + $0x98] sm:$0xff] }
 0x4ff   : >> { %2214 = vmatpush.msra.mxu1 %v2154_v8 }
 0x500   : >> { %1979 = vst [vmem:[#allocation2 + $0x70] sm:$0xe] %v1975_v55  ;;  %2192 = vmatpush.msra.mxu0 %v2151_v63  ;;  %v2160_v63 = vld [vmem:[%s5387_s9 + $0x8] sm:$0xff] }
 0x501   : >> { %1980 = vst [vmem:[#allocation2 + $0x78] sm:$0xe] %v1976_v60  ;;  %2215 = vmatpush.msra.mxu1 %v2152_v0  ;;  %2168 = vperm.xlu2 %3239, %v2160_v63  }
 0x503   : >> { %v1984_v58 = vpop.permute.xlu0 %1983  ;;  %v1932_v9 = vpop.permute.xlu1 %1931 }
 0x504   : >> { %v1985_v12 = vsel %vm5686_vm8, %v1982_v50, %v1984_v58  ;;  %v1986_v31 = vsel %vm5687_vm4, %v1984_v58, %v1982_v50  ;;  %v1935_v59 = vsel %vm5688_vm0, %v1932_v9, %v1934_v57  ;;  %v1936_v19 = vsel %vm5689_vm14, %v1934_v57, %v1932_v9 }
 0x505   : >> { %v1987_v16 = vsel %vm5662_vm13, %v1985_v12, 0.0  ;;  %v1988_v18 = vsel %vm5663_vm7, %v1986_v31, 0.0  ;;  %v1937_v48 = vsel %vm5690_vm10, %v1935_v59, 0.0  ;;  %vm5691_vm8 = vnez %v5495_v47 }
 0x506   : >> { %v1938_v22 = vsel %vm5691_vm8, %v1936_v19, 0.0  ;;  %v1991_v20 = vrot.slane %v1987_v16, 4  ;;  %v1992_v26 = vrot.slane %v1988_v18, 4  ;;  %v1941_v32 = vrot.slane %v1937_v48, 5 }
 0x507   : >> { %v1942_v35 = vrot.slane %v1938_v22, 5  ;;  %vm5692_vm4 = vcmp.lt.s32.totalorder %v3650_v24, 16  ;;  %vm5694_vm14 = vcmp.lt.s32.totalorder %v3650_v24, 15 }
 0x508   : >> { %1995 = vst [vmem:[#allocation2 + $0x70] sm:$0x70] %v1991_v20  ;;  %vm5693_vm0 = vmmov %vm5692_vm4  ;;  %v2141_v20 = vld [vmem:[#allocation2 + $0x30] sm:$0xff] }
 0x509   : >> { %1996 = vst [vmem:[#allocation2 + $0x78] sm:$0x70] %v1992_v26 }
 0x50a   : >> { %1945 = vst [vmem:[#allocation2 + $0x60] sm:$0x38] %v1941_v32  ;;  %v2142_v32 = vld [vmem:[#allocation2 + $0x38] sm:$0xff] }
 0x50b   : >> { %1946 = vst [vmem:[#allocation2 + $0x68] sm:$0x38] %v1942_v35  ;;  %v1880_v36 = vpop.permute.xlu0 %1879  ;;  %v1882_v42 = vpop.permute.xlu1 %1881  ;;  %v2139_v35 = vld [vmem:[#allocation2 + $0x20] sm:$0xff] }
 0x50c   : >> { %v1883_v7 = vsel %vm5692_vm4, %v1880_v36, %v1882_v42  ;;  %v1884_v62 = vsel %vm5693_vm0, %v1882_v42, %v1880_v36  ;;  %vm5695_vm4 = vmmov %vm5694_vm14  ;;  %vm5696_vm0 = vcmp.lt.s32.totalorder %v3650_v24, 1  ;;  %v2137_v36 = vld [vmem:[#allocation2 + $0x10] sm:$0xff]  ;;  %v2138_v42 = vld [vmem:[#allocation2 + $0x18] sm:$0xff] }
 0x50d   : >> { %v1885_v39 = vsel %vm5671_vm11, %v1884_v62, 0.0  ;;  %v1886_v50 = vsel %vm5672_vm9, %v1883_v7, 0.0  ;;  %vm5697_vm7 = vmmov %vm5696_vm0  ;;  %v2135_v7 = vld [vmem:[#allocation2] sm:$0xff]  ;;  %v2136_v62 = vld [vmem:[#allocation2 + $0x8] sm:$0xff] }
 0x50e   : >> { %v1889_v3 = vrot.slane %v1885_v39, 1  ;;  %v1890_v34 = vrot.slane %v1886_v50, 1  ;;  %v2133_v39 = vld [vmem:[%s5386_s8] sm:$0xff]  ;;  %v2134_v50 = vld [vmem:[%s5386_s8 + $0x8] sm:$0xff] }
 0x50f   : >> { %v2149_v4 = vld [vmem:[#allocation2 + $0x70] sm:$0xff] }
 0x510   : >> { %1893 = vst [vmem:[#allocation2 + $0x40] sm:$0x80] %v1889_v3  ;;  %2193 = vmatpush.msra.mxu0 %v2149_v4  ;;  %v2150_v61 = vld [vmem:[#allocation2 + $0x78] sm:$0xff] }
 0x511   : >> { %1894 = vst [vmem:[#allocation2 + $0x48] sm:$0x80] %v1890_v34  ;;  %2216 = vmatpush.msra.mxu1 %v2150_v61  ;;  %v2147_v52 = vld [vmem:[#allocation2 + $0x60] sm:$0xff] }
 0x512   : >> { %1895 = vst [vmem:[#allocation2 + $0x50] sm:$0x3] %v1889_v3  ;;  %2194 = vmatpush.msra.mxu0 %v2147_v52  ;;  %v2148_v56 = vld [vmem:[#allocation2 + $0x68] sm:$0xff] }
 0x513   : >> { %1896 = vst [vmem:[#allocation2 + $0x58] sm:$0x3] %v1890_v34  ;;  %2217 = vmatpush.msra.mxu1 %v2148_v56  ;;  %v1900_v6 = vpop.permute.xlu0 %1899  ;;  %v1914_v53 = vpop.permute.xlu1 %1913 }
 0x514   : >> { %v1901_v10 = vsel %vm5694_vm14, %v1898_v33, %v1900_v6  ;;  %v1902_v25 = vsel %vm5695_vm4, %v1900_v6, %v1898_v33  ;;  %v1917_v28 = vsel %vm5696_vm0, %v1914_v53, %v1916_v54  ;;  %v1918_v17 = vsel %vm5697_vm7, %v1916_v54, %v1914_v53  ;;  %v2140_v33 = vld [vmem:[#allocation2 + $0x28] sm:$0xff] }
 0x515   : >> { %v1903_v27 = vsel %vm3826_vm3, %v1902_v25, 0.0  ;;  %v1904_v23 = vsel %vm3818_vm15, %v1901_v10, 0.0  ;;  %v1919_v43 = vsel %vm3679_vm6, %v1918_v17, 0.0  ;;  %v1920_v40 = vsel %vm5683_vm5, %v1917_v28, 0.0  ;;  %v2439_v17 = vld [vmem:[%s5389_s11] sm:$0xff] }
 0x516   : >> { %v1907_v57 = vrot.slane %v1903_v27, 6  ;;  %v1908_v55 = vrot.slane %v1904_v23, 6  ;;  %v1923_v60 = vrot.slane %v1919_v43, 3  ;;  %v1924_v8 = vrot.slane %v1920_v40, 3 }
 0x517   : >> { %vm5698_vm7 = vcmp.lt.s32.totalorder %v3650_v24, 17  ;;  %vm5700_vm4 = vnez %v5511_v21  ;;  %vm5701_vm0 = vnez %v5509_v15 }
 0x518   : >> { %1911 = vst [vmem:[#allocation2 + $0x50] sm:$0x1c] %v1907_v57  ;;  %vm5699_vm14 = vmmov %vm5698_vm7 }
 0x519   : >> { %1912 = vst [vmem:[#allocation2 + $0x58] sm:$0x1c] %v1908_v55 }
 0x51a   : >> { %1927 = vst [vmem:[#allocation2 + $0x50] sm:$0xe0] %v1923_v60 }
 0x51b   : >> { %1928 = vst [vmem:[#allocation2 + $0x58] sm:$0xe0] %v1924_v8  ;;  %v1864_v0 = vpop.permute.xlu0 %1863  ;;  %v1866_v58 = vpop.permute.xlu1 %1865 }
 0x51c   : >> { %v1867_v9 = vsel %vm5698_vm7, %v1864_v0, %v1866_v58  ;;  %v1868_v12 = vsel %vm5699_vm14, %v1866_v58, %v1864_v0  ;;  %vm2171_vm7 = vcmask 736256   ;;  %vm5705_vm14 = vcmp.lt.s32.totalorder %v3650_v24, 112 }
 0x51d   : >> { %v1869_v31 = vsel %vm5700_vm4, %v1868_v12, 0.0  ;;  %v1870_v59 = vsel %vm5701_vm0, %v1867_v9, 0.0 }
 0x51e   : >> { %v1873_v19 = vrot.slane %v1869_v31, 4  ;;  %v1874_v16 = vrot.slane %v1870_v59, 4 }
 0x520   : >> { %1877 = vst [vmem:[#allocation2 + $0x40] sm:$0x70] %v1873_v19 }
 0x521   : >> { %1878 = vst [vmem:[#allocation2 + $0x48] sm:$0x70] %v1874_v16  ;;  %v2145_v18 = vld [vmem:[#allocation2 + $0x50] sm:$0xff] }
 0x522   : >> { %2195 = vmatpush.msra.mxu0 %v2145_v18  ;;  %v2146_v48 = vld [vmem:[#allocation2 + $0x58] sm:$0xff] }
 0x523   : >> { %2218 = vmatpush.msra.mxu1 %v2146_v48 }
 0x527   : >> { %v2143_v22 = vld [vmem:[#allocation2 + $0x40] sm:$0xff] }
 0x528   : >> { %2196 = vmatpush.msra.mxu0 %v2143_v22  ;;  %v2144_v26 = vld [vmem:[#allocation2 + $0x48] sm:$0xff] }
 0x529   : >> { %2219 = vmatpush.msra.mxu1 %v2144_v26 }
 0x52a   : >> { %2197 = vmatpush.msra.mxu0 %v2141_v20 }
 0x52b   : >> { %2220 = vmatpush.msra.mxu1 %v2142_v32 }
 0x52c   : >> { %2198 = vmatpush.msra.mxu0 %v2139_v35 }
 0x52d   : >> { %2221 = vmatpush.msra.mxu1 %v2140_v33 }
 0x52e   : >> { %2199 = vmatpush.msra.mxu0 %v2137_v36 }
 0x52f   : >> { %2222 = vmatpush.msra.mxu1 %v2138_v42 }
 0x530   : >> { %2200 = vmatpush.msra.mxu0 %v2135_v7 }
 0x531   : >> { %2223 = vmatpush.msra.mxu1 %v2136_v62  ;;  %3128 = vmatmul.msk.f32.vlgmr.msra.gmra.mxu0 %vm2171_vm7, %v2133_v39 }
 0x532   : >> { %3131 = vmatmul.msk.f32.vlgmr.msra.gmra.mxu1 %vm2171_vm7, %v2133_v39 }
 0x539   : >> { %3129 = vmatmul.msk.f32.gmra.mxu0 %vm2171_vm7, %v2134_v50 }
 0x53a   : >> { %3132 = vmatmul.msk.f32.gmra.mxu1 %vm2171_vm7, %v2134_v50  ;;  %vm5706_vm7 = vmmov %vm5705_vm14 }
 0x53b   : >> { %vm5707_vm13 = vmmov %vm5706_vm7 }
 0x53c   : >> { %vm5708_vm0 = vmmov %vm5706_vm7 }
 0x55b   : >> { %v2169_v6 = vpop.permute.xlu2 %2168 }
 0x56e   : >> { %v2164_v3 = vpop.permute.xlu0 %2163 }
 0x5ae   : >> { %v2202_v34 = vpop.f32.mrf.mxu0 }
 0x5af   : >> { %v2203_v4 = vadd.f32 %v2202_v34, %v2164_v3  ;;  %v2225_v61 = vpop.f32.mrf.mxu1 }
 0x5b0   : >> { %v2226_v52 = vadd.f32 %v2225_v61, %v2164_v3 }
 0x5b1   : >> { %v4884_v54 = vmax.f32 %v2203_v4, 0.0 }
 0x5b2   : >> { %v4886_v56 = vmax.f32 %v2226_v52, 0.0 }
 0x5b3   : >> { %2359 = vrot.lane.b32.xlu1 %v4884_v54, %s5474_s27 }
 0x5b4   : >> { %2343 = vrot.lane.b32.xlu0 %v4886_v56, %s3477_s29  ;;  %2363 = vrot.lane.b32.xlu2 %v4886_v56, %s5474_s27 }
 0x5b6   : >> { %v2205_v38 = vpop.f32.mrf.mxu0 }
 0x5b7   : >> { %v2228_v53 = vpop.f32.mrf.mxu1  ;;  %v2206_v13 = vadd.f32 %v2205_v38, %v2169_v6 }
 0x5b8   : >> { %v2229_v10 = vadd.f32 %v2228_v53, %v2169_v6 }
 0x5b9   : >> { %v4912_v25 = vmax.f32 %v2206_v13, 0.0 }
 0x5ba   : >> { %v4914_v28 = vmax.f32 %v2229_v10, 0.0 }
 0x5bb   : >> { %2323 = vrot.lane.b32.xlu1 %v4886_v56, %s3475_s19 }
 0x5bc   : >> { %2319 = vrot.lane.b32.xlu0 %v4884_v54, %s3475_s19  ;;  %2339 = vrot.lane.b32.xlu2 %v4884_v54, %s3477_s29 }
 0x5c3   : >> { %2295 = vrot.lane.b32.xlu1 %v4884_v54, %s5465_s24 }
 0x5c4   : >> { %2279 = vrot.lane.b32.xlu0 %v4886_v56, %s5472_s17  ;;  %2299 = vrot.lane.b32.xlu2 %v4886_v56, %s5465_s24 }
 0x5cb   : >> { %2259 = vrot.lane.b32.xlu1 %v4886_v56, %s5702_s28 }
 0x5cc   : >> { %2255 = vrot.lane.b32.xlu0 %v4884_v54, %s5702_s28  ;;  %2275 = vrot.lane.b32.xlu2 %v4884_v54, %s5472_s17 }
 0x5d3   : >> { %2361 = vrot.lane.b32.xlu1 %v4912_v25, %s5474_s27 }
 0x5d4   : >> { %2341 = vrot.lane.b32.xlu0 %v4912_v25, %s3477_s29  ;;  %2365 = vrot.lane.b32.xlu2 %v4914_v28, %s5474_s27  ;;  %s5741_s27 = smov 112  }
 0x5db   : >> { %2345 = vrot.lane.b32.xlu1 %v4914_v28, %s3477_s29 }
 0x5dc   : >> { %2301 = vrot.lane.b32.xlu0 %v4914_v28, %s5465_s24  ;;  %2325 = vrot.lane.b32.xlu2 %v4914_v28, %s3475_s19 }
 0x5e3   : >> { %2321 = vrot.lane.b32.xlu1 %v4912_v25, %s3475_s19 }
 0x5e4   : >> { %2277 = vrot.lane.b32.xlu0 %v4912_v25, %s5472_s17  ;;  %2297 = vrot.lane.b32.xlu2 %v4912_v25, %s5465_s24  ;;  %s5743_s24 = smov 1  }
 0x5eb   : >> { %2281 = vrot.lane.b32.xlu1 %v4914_v28, %s5472_s17  ;;  %s5742_s17 = smov 15  }
 0x5ec   : >> { %2241 = vrot.lane.b32.xlu0 %v4914_v28, %s5703_s23  ;;  %2261 = vrot.lane.b32.xlu2 %v4914_v28, %s5702_s28 }
 0x5f3   : >> { %2257 = vrot.lane.b32.xlu1 %v4912_v25, %s5702_s28 }
 0x5f4   : >> { %2381 = vrot.lane.b32.xlu0 %v4912_v25, %s5704_s25  ;;  %2237 = vrot.lane.b32.xlu2 %v4912_v25, %s5703_s23 }
 0x5fb   : >> { %2235 = vrot.lane.b32.xlu1 %v4884_v54, %s5703_s23 }
 0x5fc   : >> { %2383 = vrot.lane.b32.xlu0 %v4886_v56, %s5704_s25  ;;  %2239 = vrot.lane.b32.xlu2 %v4886_v56, %s5703_s23 }
 0x603   : >> { %2385 = vrot.lane.b32.xlu1 %v4914_v28, %s5704_s25 }
 0x604   : >> { %2379 = vrot.lane.b32.xlu2 %v4884_v54, %s5704_s25 }
 0x60c   : >> { %2443 = vperm.xlu2 %3239, %v2439_v17  }
 0x60e   : >> { %v2364_v27 = vpop.permute.xlu2 %2363 }
 0x616   : >> { %v2340_v23 = vpop.permute.xlu2 %2339 }
 0x61e   : >> { %v2300_v43 = vpop.permute.xlu2 %2299 }
 0x625   : >> { %v2360_v40 = vpop.permute.xlu1 %2359 }
 0x626   : >> { %v2344_v57 = vpop.permute.xlu0 %2343  ;;  %v2276_v8 = vpop.permute.xlu2 %2275  ;;  %v2367_v19 = vsel %vm5705_vm14, %v2360_v40, %v2364_v27  ;;  %v2369_v16 = vsel %vm5706_vm7, %v2364_v27, %v2360_v40 }
 0x62d   : >> { %v2324_v55 = vpop.permute.xlu1 %2323 }
 0x62e   : >> { %v2320_v60 = vpop.permute.xlu0 %2319  ;;  %v2366_v58 = vpop.permute.xlu2 %2365 }
 0x635   : >> { %v2296_v63 = vpop.permute.xlu1 %2295 }
 0x636   : >> { %v2280_v0 = vpop.permute.xlu0 %2279  ;;  %v2326_v31 = vpop.permute.xlu2 %2325 }
 0x63d   : >> { %v2260_v9 = vpop.permute.xlu1 %2259 }
 0x63e   : >> { %v2256_v12 = vpop.permute.xlu0 %2255  ;;  %v2298_v20 = vpop.permute.xlu2 %2297 }
 0x645   : >> { %v2362_v59 = vpop.permute.xlu1 %2361 }
 0x646   : >> { %v2368_v18 = vsel %vm5707_vm13, %v2362_v59, %v2366_v58  ;;  %v2370_v48 = vsel %vm5708_vm0, %v2366_v58, %v2362_v59  ;;  %v2342_v22 = vpop.permute.xlu0 %2341  ;;  %vm5709_vm13 = vcmp.lt.s32.totalorder %v3650_v24, 113  ;;  %v2262_v4 = vpop.permute.xlu2 %2261 }
 0x647   : >> { %3338 = vmatpush.msk.msra.mxu2 %vm3655_vm2, %v2368_v18  ;;  %3339 = vmatpush.msk.msra.mxu3 %vm5666_vm1, %v2370_v48  ;;  %v2347_v32 = vsel %vm5709_vm13, %v2340_v23, %v2344_v57  ;;  %vm5710_vm0 = vmmov %vm5709_vm13  ;;  %vm5714_vm13 = vcmp.lt.s32.totalorder %v3650_v24, 127 }
 0x648   : >> { %v2349_v35 = vsel %vm5710_vm0, %v2344_v57, %v2340_v23  ;;  %vm5711_vm14 = vmmov %vm5710_vm0  ;;  %v2327_v62 = vsel %vm5714_vm13, %v2320_v60, %v2324_v55 }
 0x649   : >> { %3340 = vmatpush.msk.msra.mxu2 %vm3655_vm2, %v2367_v19  ;;  %3341 = vmatpush.msk.msra.mxu3 %vm5666_vm1, %v2369_v16  ;;  %vm5712_vm7 = vmmov %vm5710_vm0  ;;  %vm5713_vm1 = vnez %v5493_v46 }
 0x64a   : >> { %vm5715_vm0 = vmmov %vm5714_vm13  ;;  %vm5718_vm13 = vcmp.lt.s32.totalorder %v3650_v24, 1 }
 0x64b   : >> { %v2329_v39 = vsel %vm5715_vm0, %v2324_v55, %v2320_v60 }
 0x64d   : >> { %v2346_v26 = vpop.permute.xlu1 %2345 }
 0x64e   : >> { %v2348_v33 = vsel %vm5711_vm14, %v2342_v22, %v2346_v26  ;;  %v2350_v36 = vsel %vm5712_vm7, %v2346_v26, %v2342_v22  ;;  %v2302_v42 = vpop.permute.xlu0 %2301  ;;  %vm5716_vm14 = vmmov %vm5715_vm0  ;;  %v2400_v26 = vld [vmem:[%s5388_s10 + $0x8] sm:$0xff] }
 0x64f   : >> { %3342 = vmatpush.msk.msra.mxu2 %vm3705_vm12, %v2348_v33  ;;  %3343 = vmatpush.msk.msra.mxu3 %vm5713_vm1, %v2350_v36  ;;  %vm5717_vm7 = vmmov %vm5715_vm0  ;;  %v2304_v61 = vsel %vm5718_vm13, %v2298_v20, %v2302_v42 }
 0x650   : >> { %vm5719_vm0 = vmmov %vm5718_vm13  ;;  %vm5722_vm13 = vcmp.lt.s32.totalorder %v3650_v24, 15 }
 0x651   : >> { %3344 = vmatpush.msk.msra.mxu2 %vm3705_vm12, %v2347_v32  ;;  %3345 = vmatpush.msk.msra.mxu3 %vm5713_vm1, %v2349_v35  ;;  %v2306_v52 = vsel %vm5719_vm0, %v2302_v42, %v2298_v20  ;;  %v2401_v20 = vld [vmem:[%s5388_s10 + $0x10] sm:$0xff]  ;;  %v2402_v32 = vld [vmem:[%s5388_s10 + $0x18] sm:$0xff] }
 0x655   : >> { %v2322_v7 = vpop.permute.xlu1 %2321 }
 0x656   : >> { %v2328_v50 = vsel %vm5716_vm14, %v2322_v7, %v2326_v31  ;;  %v2330_v3 = vsel %vm5717_vm7, %v2326_v31, %v2322_v7  ;;  %v2278_v34 = vpop.permute.xlu0 %2277  ;;  %vm5720_vm14 = vmmov %vm5719_vm0 }
 0x657   : >> { %3346 = vmatpush.msk.msra.mxu2 %vm5690_vm10, %v2328_v50  ;;  %3347 = vmatpush.msk.msra.mxu3 %vm5691_vm8, %v2330_v3  ;;  %v2303_v6 = vsel %vm5720_vm14, %v2296_v63, %v2300_v43  ;;  %vm5721_vm7 = vmmov %vm5719_vm0 }
 0x658   : >> { %v2305_v53 = vsel %vm5721_vm7, %v2300_v43, %v2296_v63  ;;  %vm5723_vm0 = vmmov %vm5722_vm13 }
 0x659   : >> { %3348 = vmatpush.msk.msra.mxu2 %vm5690_vm10, %v2327_v62  ;;  %3349 = vmatpush.msk.msra.mxu3 %vm5691_vm8, %v2329_v39  ;;  %vm5724_vm14 = vmmov %vm5723_vm0 }
 0x65a   : >> { %v2283_v17 = vsel %vm5724_vm14, %v2276_v8, %v2280_v0  ;;  %vm5725_vm7 = vmmov %vm5723_vm0 }
 0x65b   : >> { %2464 = vmatpush.msra.mxu2 %v4912_v25  ;;  %2510 = vmatpush.msra.mxu3 %v4914_v28  ;;  %v2238_v28 = vpop.permute.xlu2 %2237 }
 0x65d   : >> { %v2282_v38 = vpop.permute.xlu1 %2281  ;;  %2465 = vmatpush.msra.mxu2 %v4884_v54  ;;  %2511 = vmatpush.msra.mxu3 %v4886_v56  ;;  %v2285_v54 = vsel %vm5725_vm7, %v2280_v0, %v2276_v8  ;;  %v2440_v8 = vld [vmem:[%s5389_s11 + $0x8] sm:$0xff] }
 0x65e   : >> { %v2242_v13 = vpop.permute.xlu0 %2241  ;;  %v2284_v10 = vsel %vm5722_vm13, %v2278_v34, %v2282_v38  ;;  %v2286_v25 = vsel %vm5723_vm0, %v2282_v38, %v2278_v34  ;;  %vm5726_vm13 = vcmp.lt.s32.totalorder %v3650_v24, 16  ;;  %2448 = vperm.xlu1 %3241, %v2440_v8  }
 0x65f   : >> { %3350 = vmatpush.msk.msra.mxu2 %vm3679_vm6, %v2306_v52  ;;  %3351 = vmatpush.msk.msra.mxu3 %vm5683_vm5, %v2304_v61  ;;  %v2263_v56 = vsel %vm5726_vm13, %v2256_v12, %v2260_v9  ;;  %vm5727_vm0 = vmmov %vm5726_vm13 }
 0x660   : >> { %v2265_v23 = vsel %vm5727_vm0, %v2260_v9, %v2256_v12  ;;  %vm5728_vm14 = vmmov %vm5727_vm0  ;;  %v2399_v12 = vld [vmem:[%s5388_s10] sm:$0xff] }
 0x661   : >> { %3352 = vmatpush.msk.msra.mxu2 %vm3679_vm6, %v2305_v53  ;;  %3353 = vmatpush.msk.msra.mxu3 %vm5683_vm5, %v2303_v6  ;;  %vm5729_vm7 = vmmov %vm5727_vm0  ;;  %vm5730_vm5 = vcmp.lt.s32.totalorder %v3650_v24, 17 }
 0x662   : >> { %v2244_v57 = vsel %vm5730_vm5, %v2238_v28, %v2242_v13  ;;  %vm5731_vm13 = vmmov %vm5730_vm5  ;;  %vm5732_vm5 = vnez %v5509_v15 }
 0x663   : >> { %3354 = vmatpush.msk.msra.mxu2 %vm3826_vm3, %v2286_v25  ;;  %3355 = vmatpush.msk.msra.mxu3 %vm3818_vm15, %v2284_v10  ;;  %v2246_v55 = vsel %vm5731_vm13, %v2242_v13, %v2238_v28  ;;  %v2240_v63 = vpop.permute.xlu2 %2239  ;;  %vm5733_vm0 = vmmov %vm5731_vm13 }
 0x665   : >> { %v2258_v27 = vpop.permute.xlu1 %2257  ;;  %3356 = vmatpush.msk.msra.mxu2 %vm3826_vm3, %v2285_v54  ;;  %3357 = vmatpush.msk.msra.mxu3 %vm3818_vm15, %v2283_v17 }
 0x666   : >> { %v2264_v43 = vsel %vm5728_vm14, %v2258_v27, %v2262_v4  ;;  %v2266_v40 = vsel %vm5729_vm7, %v2262_v4, %v2258_v27  ;;  %v2382_v60 = vpop.permute.xlu0 %2381  ;;  %vm5734_vm14 = vmmov %vm5733_vm0  ;;  %vm5735_vm7 = vcmp.lt.s32.totalorder %v3650_v24, 111 }
 0x667   : >> { %3358 = vmatpush.msk.msra.mxu2 %vm5671_vm11, %v2266_v40  ;;  %3359 = vmatpush.msk.msra.mxu3 %vm5672_vm9, %v2264_v43  ;;  %vm5736_vm13 = vmmov %vm5735_vm7 }
 0x669   : >> { %3360 = vmatpush.msk.msra.mxu2 %vm5671_vm11, %v2265_v23  ;;  %3361 = vmatpush.msk.msra.mxu3 %vm5672_vm9, %v2263_v56  ;;  %v2755_v56 = vld [vmem:[%s5391_s13] sm:$0x7] }
 0x66b   : >> { %3362 = vmatpush.msk.msra.mxu2 %vm5700_vm4, %v2246_v55  ;;  %3363 = vmatpush.msk.msra.mxu3 %vm5732_vm5, %v2244_v57  ;;  %v2380_v59 = vpop.permute.xlu2 %2379 }
 0x66d   : >> { %v2236_v0 = vpop.permute.xlu1 %2235 }
 0x66e   : >> { %v2243_v58 = vsel %vm5733_vm0, %v2236_v0, %v2240_v63  ;;  %v2245_v9 = vsel %vm5734_vm14, %v2240_v63, %v2236_v0  ;;  %v2384_v31 = vpop.permute.xlu0 %2383  ;;  %vm5737_vm0 = vmmov %vm5735_vm7 }
 0x66f   : >> { %3364 = vmatpush.msk.msra.mxu2 %vm5700_vm4, %v2245_v9  ;;  %3365 = vmatpush.msk.msra.mxu3 %vm5732_vm5, %v2243_v58  ;;  %v2387_v16 = vsel %vm5735_vm7, %v2380_v59, %v2384_v31  ;;  %v2389_v18 = vsel %vm5736_vm13, %v2384_v31, %v2380_v59  ;;  %vm5738_vm14 = vmmov %vm5737_vm0  ;;  %vm5739_vm5 = vnez %v5503_v5  ;;  %vm5740_vm4 = vnez %v5501_v2 }
 0x670   : >> { %2474 = vmatmul.f32.vlgmr.msra.gmra.mxu2 %v2399_v12  ;;  %2520 = vmatmul.f32.vlgmr.msra.gmra.mxu3 %v2399_v12  ;;  %vm5476_vm7 = vcmask 130048   ;;  %vm5744_vm13 = vcmp.lt.s32.totalorder %v3650_v24, 112 }
 0x673   : >> { %v2444_v36 = vpop.permute.xlu2 %2443 }
 0x675   : >> { %v2386_v19 = vpop.permute.xlu1 %2385 }
 0x676   : >> { %v2388_v48 = vsel %vm5737_vm0, %v2382_v60, %v2386_v19  ;;  %v2390_v22 = vsel %vm5738_vm14, %v2386_v19, %v2382_v60  ;;  %vm5745_vm0 = vmmov %vm5744_vm13  ;;  %vm5746_vm14 = vcmp.lt.s32.totalorder %v3650_v24, 1 }
 0x677   : >> { %3366 = vmatpush.msk.msrb.mxu2 %vm5739_vm5, %v2388_v48  ;;  %3367 = vmatpush.msk.msrb.mxu0 %vm5740_vm4, %v2390_v22 }
 0x678   : >> { %2477 = vmatmul.f32.gmra.mxu2 %v2401_v20  ;;  %2523 = vmatmul.f32.gmra.mxu3 %v2401_v20 }
 0x679   : >> { %3368 = vmatpush.msk.msrb.mxu2 %vm5739_vm5, %v2387_v16  ;;  %3369 = vmatpush.msk.msrb.mxu0 %vm5740_vm4, %v2389_v18  ;;  %vm5750_vm4 = vcmp.lt.s32.totalorder %v3650_v24, 113 }
 0x67a   : >> { %3135 = vmatmul.msk.f32.vlgmr.msrb.gmra.mxu0 %vm5476_vm7, %v2400_v26 }
 0x680   : >> { %3133 = vmatmul.msk.f32.vlgmr.msrb.gmra.mxu2 %vm5476_vm7, %v2400_v26 }
 0x682   : >> { %3136 = vmatmul.msk.f32.gmra.mxu0 %vm5476_vm7, %v2402_v32 }
 0x688   : >> { %3134 = vmatmul.msk.f32.gmra.mxu2 %vm5476_vm7, %v2402_v32  ;;  %vm5747_vm7 = vmmov %vm5746_vm14 }
 0x6d0   : >> { %v2449_v39 = vpop.permute.xlu1 %2448 }
 0x6f3   : >> { %v2475_v35 = vpop.f32.mrf.mxu2  ;;  %v2521_v33 = vpop.f32.mrf.mxu3 }
 0x6f4   : >> { %v2522_v42 = vadd.f32 %v2521_v33, %v2444_v36  ;;  %v2476_v38 = vadd.f32 %v2475_v35, %v2444_v36 }
 0x6f7   : >> { %v2544_v7 = vpop.f32.mrf.mxu0 }
 0x6f8   : >> { %v2545_v62 = vadd.f32 %v2544_v7, %v2522_v42 }
 0x6fa   : >> { %v5110_v50 = vmax.f32 %v2545_v62, 0.0 }
 0x6fb   : >> { %v2478_v3 = vpop.f32.mrf.mxu2  ;;  %v2524_v34 = vpop.f32.mrf.mxu3 }
 0x6fc   : >> { %2642 = vrot.lane.b32.xlu2 %v5110_v50, %s3475_s19  ;;  %2662 = vrot.lane.b32.xlu1 %v5110_v50, %s3477_s29  ;;  %v2525_v4 = vadd.f32 %v2524_v34, %v2449_v39  ;;  %v2479_v25 = vadd.f32 %v2478_v3, %v2449_v39 }
 0x6fd   : >> { %2682 = vrot.lane.b32.xlu0 %v5110_v50, %s5741_s27 }
 0x6ff   : >> { %v2547_v61 = vpop.f32.mrf.mxu0 }
 0x700   : >> { %v2548_v52 = vadd.f32 %v2547_v61, %v2525_v4 }
 0x702   : >> { %v5118_v6 = vmax.f32 %v2548_v52, 0.0 }
 0x703   : >> { %v2498_v53 = vpop.f32.mrf.mxu2 }
 0x704   : >> { %v2499_v13 = vadd.f32 %v2498_v53, %v2476_v38  ;;  %2664 = vrot.lane.b32.xlu2 %v5118_v6, %s3477_s29  ;;  %2598 = vrot.lane.b32.xlu1 %v5110_v50, %s5742_s17  ;;  %v2718_v53 = vld [vmem:[%s5390_s12] sm:$0x77] }
 0x705   : >> { %2618 = vrot.lane.b32.xlu0 %v5110_v50, %s5743_s24  ;;  %2762 = vst [vmem:[#allocation1] ss:$2 sm:$0xff] %v2718_v53 }
 0x706   : >> { %v5126_v10 = vmax.f32 %v2499_v13, 0.0 }
 0x70b   : >> { %v2501_v28 = vpop.f32.mrf.mxu2 }
 0x70c   : >> { %2600 = vrot.lane.b32.xlu2 %v5118_v6, %s5742_s17  ;;  %2684 = vrot.lane.b32.xlu1 %v5118_v6, %s5741_s27  ;;  %v2502_v17 = vadd.f32 %v2501_v28, %v2479_v25 }
 0x70d   : >> { %2644 = vrot.lane.b32.xlu0 %v5118_v6, %s3475_s19 }
 0x70e   : >> { %v5134_v54 = vmax.f32 %v2502_v17, 0.0 }
 0x714   : >> { %2678 = vrot.lane.b32.xlu2 %v5126_v10, %s5741_s27  ;;  %2620 = vrot.lane.b32.xlu1 %v5118_v6, %s5743_s24 }
 0x715   : >> { %2658 = vrot.lane.b32.xlu0 %v5126_v10, %s3477_s29 }
 0x71c   : >> { %2614 = vrot.lane.b32.xlu2 %v5126_v10, %s5743_s24  ;;  %2638 = vrot.lane.b32.xlu1 %v5126_v10, %s3475_s19 }
 0x71d   : >> { %2594 = vrot.lane.b32.xlu0 %v5126_v10, %s5742_s17 }
 0x724   : >> { %2578 = vrot.lane.b32.xlu2 %v5110_v50, %s5702_s28  ;;  %2574 = vrot.lane.b32.xlu1 %v5126_v10, %s5702_s28 }
 0x725   : >> { %2680 = vrot.lane.b32.xlu0 %v5134_v54, %s5741_s27 }
 0x72c   : >> { %2640 = vrot.lane.b32.xlu2 %v5134_v54, %s3475_s19  ;;  %2660 = vrot.lane.b32.xlu1 %v5134_v54, %s3477_s29 }
 0x72d   : >> { %2580 = vrot.lane.b32.xlu0 %v5118_v6, %s5702_s28 }
 0x734   : >> { %2554 = vrot.lane.b32.xlu2 %v5126_v10, %s5703_s23  ;;  %2560 = vrot.lane.b32.xlu1 %v5118_v6, %s5703_s23 }
 0x735   : >> { %2616 = vrot.lane.b32.xlu0 %v5134_v54, %s5743_s24 }
 0x73c   : >> { %2576 = vrot.lane.b32.xlu2 %v5134_v54, %s5702_s28  ;;  %2596 = vrot.lane.b32.xlu1 %v5134_v54, %s5742_s17 }
 0x73d   : >> { %2558 = vrot.lane.b32.xlu0 %v5110_v50, %s5703_s23 }
 0x744   : >> { %2704 = vrot.lane.b32.xlu2 %v5118_v6, %s5704_s25  ;;  %2700 = vrot.lane.b32.xlu1 %v5134_v54, %s5704_s25 }
 0x745   : >> { %2556 = vrot.lane.b32.xlu0 %v5134_v54, %s5703_s23 }
 0x74c   : >> { %2758 = vperm.xlu2 %3239, %v2755_v56   ;;  %2702 = vrot.lane.b32.xlu1 %v5110_v50, %s5704_s25 }
 0x74d   : >> { %2698 = vrot.lane.b32.xlu0 %v5126_v10, %s5704_s25  ;;  %s3149_s25 = sshll.u32 %s3464_s16, 3  ;;  %s1858_s16 = sadd.s32 1, %s3464_s16  }
 0x74e   : >> { %s2864_s20 = scalar_lea.vmem %s4664_s30, %s3149_s25 [#allocation4]  ;;  %s2872_s27 = scalar_lea.vmem %s4668_s18, %s3149_s25 [#allocation5] }
 0x74f   : >> { %p1855_p8 = scmp.ge.s32.totalorder %s1858_s16, 5  }
 0x756   : >> { %v2643_v27 = vpop.permute.xlu2 %2642 }
 0x75e   : >> { %v2665_v23 = vpop.permute.xlu2 %2664 }
 0x766   : >> { %v5185_v43 = vpop.permute.xlu2 %2600 }
 0x76e   : >> { %v2679_v40 = vpop.permute.xlu2 %2678  ;;  %v2663_v57 = vpop.permute.xlu1 %2662 }
 0x76f   : >> { %v2683_v55 = vpop.permute.xlu0 %2682 }
 0x770   : >> { %v2686_v60 = vsel %vm5744_vm13, %v2679_v40, %v2683_v55  ;;  %v2688_v8 = vsel %vm5745_vm0, %v2683_v55, %v2679_v40  ;;  %vm5748_vm13 = vcmp.lt.s32.totalorder %v3650_v24, 127 }
 0x771   : >> { %vm5749_vm0 = vmmov %vm5748_vm13 }
 0x772   : >> { %vm5753_vm5 = vmmov %vm5749_vm0 }
 0x776   : >> { %v2615_v63 = vpop.permute.xlu2 %2614  ;;  %v2599_v0 = vpop.permute.xlu1 %2598 }
 0x777   : >> { %v2619_v58 = vpop.permute.xlu0 %2618 }
 0x778   : >> { %v5193_v9 = vsel %vm5746_vm14, %v2615_v63, %v2619_v58  ;;  %v2624_v12 = vsel %vm5747_vm7, %v2619_v58, %v2615_v63  ;;  %vm5751_vm14 = vmmov %vm5750_vm4 }
 0x779   : >> { %vm5752_vm7 = vmmov %vm5749_vm0 }
 0x77e   : >> { %v2579_v31 = vpop.permute.xlu2 %2578  ;;  %v2685_v59 = vpop.permute.xlu1 %2684 }
 0x77f   : >> { %v2645_v19 = vpop.permute.xlu0 %2644 }
 0x786   : >> { %v2641_v16 = vpop.permute.xlu2 %2640  ;;  %v2621_v18 = vpop.permute.xlu1 %2620 }
 0x787   : >> { %v2647_v48 = vsel %vm5748_vm13, %v2641_v16, %v2645_v19  ;;  %v2649_v22 = vsel %vm5749_vm0, %v2645_v19, %v2641_v16  ;;  %v2659_v20 = vpop.permute.xlu0 %2658  ;;  %vm5754_vm13 = vcmp.lt.s32.totalorder %v3650_v24, 15 }
 0x788   : >> { %v2666_v26 = vsel %vm5750_vm4, %v2659_v20, %v2663_v57  ;;  %v2668_v32 = vsel %vm5751_vm14, %v2663_v57, %v2659_v20  ;;  %vm5755_vm0 = vmmov %vm5754_vm13  ;;  %vm5756_vm4 = vcmp.lt.s32.totalorder %v3650_v24, 16  ;;  %v2764_v57 = vld.sshfl [vmem:[#allocation1 + $0x8] sm:$0xff pattern:$0x75316420] }
 0x789   : >> { %vm5757_vm14 = vmmov %vm5756_vm4 }
 0x78e   : >> { %v2639_v35 = vpop.permute.xlu1 %2638  ;;  %v2555_v39 = vpop.permute.xlu2 %2554 }
 0x78f   : >> { %v2646_v33 = vsel %vm5752_vm7, %v2639_v35, %v2643_v27  ;;  %v2648_v36 = vsel %vm5753_vm5, %v2643_v27, %v2639_v35  ;;  %v2595_v42 = vpop.permute.xlu0 %2594  ;;  %vm5758_vm7 = vcmp.lt.s32.totalorder %v3650_v24, 112 }
 0x790   : >> { %v2602_v7 = vsel %vm5754_vm13, %v2595_v42, %v2599_v0  ;;  %v2604_v62 = vsel %vm5755_vm0, %v2599_v0, %v2595_v42  ;;  %vm5759_vm5 = vmmov %vm5758_vm7  ;;  %vm5760_vm13 = vnez %v5487_v30  ;;  %vm5761_vm0 = vcmp.lt.s32.totalorder %v3650_v24, 113 }
 0x796   : >> { %v2575_v3 = vpop.permute.xlu1 %2574  ;;  %v2577_v25 = vpop.permute.xlu2 %2576 }
 0x797   : >> { %v2582_v34 = vsel %vm5756_vm4, %v2575_v3, %v2579_v31  ;;  %v2584_v4 = vsel %vm5757_vm14, %v2579_v31, %v2575_v3  ;;  %v2681_v61 = vpop.permute.xlu0 %2680  ;;  %vm5762_vm4 = vmmov %vm5761_vm0 }
 0x798   : >> { %v2687_v52 = vsel %vm5758_vm7, %v2681_v61, %v2685_v59  ;;  %v2689_v38 = vsel %vm5759_vm5, %v2685_v59, %v2681_v61  ;;  %vm5763_vm7 = vmmov %vm5757_vm14 }
 0x799   : >> { %3370 = vmatpush.msk.msrb.mxu1 %vm3655_vm2, %v2687_v52  ;;  %3371 = vmatpush.msk.msrb.mxu3 %vm5760_vm13, %v2689_v38 }
 0x79b   : >> { %3372 = vmatpush.msk.msrb.mxu1 %vm3655_vm2, %v2686_v60  ;;  %3373 = vmatpush.msk.msrb.mxu3 %vm5760_vm13, %v2688_v8 }
 0x79e   : >> { %v2661_v13 = vpop.permute.xlu1 %2660 }
 0x79f   : >> { %v2667_v28 = vsel %vm5761_vm0, %v2661_v13, %v2665_v23  ;;  %v2669_v17 = vsel %vm5762_vm4, %v2665_v23, %v2661_v13  ;;  %v2581_v56 = vpop.permute.xlu0 %2580  ;;  %v2763_v23 = vld.sshfl [vmem:[#allocation1] sm:$0xff pattern:$0x75316420]  ;;  %vm5769_vm0 = vcmp.lt.s32.totalorder %v3650_v24, 17 }
 0x7a0   : >> { %v2583_v27 = vsel %vm5757_vm14, %v2577_v25, %v2581_v56  ;;  %v2585_v40 = vsel %vm5763_vm7, %v2581_v56, %v2577_v25  ;;  %3374 = vmatpush.msk.msrb.mxu1 %vm3705_vm12, %v2667_v28  ;;  %3375 = vmatpush.msk.msrb.mxu3 %vm5713_vm1, %v2669_v17  ;;  %2850 = vst [vmem:[#allocation1] ss:$2 sm:$0xff] %v3601_v1  ;;  %vm5770_vm4 = vmmov %vm5769_vm0  ;;  %vm5771_vm14 = vcmp.lt.s32.totalorder %v3650_v24, 111 }
 0x7a1   : >> { %vm5772_vm7 = vmmov %vm5771_vm14 }
 0x7a2   : >> { %3376 = vmatpush.msk.msrb.mxu1 %vm3705_vm12, %v2666_v26  ;;  %3377 = vmatpush.msk.msrb.mxu3 %vm5713_vm1, %v2668_v32  ;;  %vm5764_vm1 = vcmp.lt.s32.totalorder %v3650_v24, 1 }
 0x7a3   : >> { %vm5765_vm5 = vmmov %vm5764_vm1 }
 0x7a4   : >> { %3378 = vmatpush.msk.msrb.mxu1 %vm5690_vm10, %v2647_v48  ;;  %3379 = vmatpush.msk.msrb.mxu3 %vm5691_vm8, %v2649_v22 }
 0x7a6   : >> { %v2561_v55 = vpop.permute.xlu1 %2560  ;;  %3380 = vmatpush.msk.msrb.mxu1 %vm5690_vm10, %v2646_v33  ;;  %3381 = vmatpush.msk.msrb.mxu3 %vm5691_vm8, %v2648_v36  ;;  %vm5766_vm10 = vnez %v5489_v44  ;;  %vm5767_vm8 = vcmp.lt.s32.totalorder %v3650_v24, 15 }
 0x7a7   : >> { %v2617_v60 = vpop.permute.xlu0 %2616  ;;  %vm5768_vm13 = vmmov %vm5767_vm8  ;;  %v2852_v42 = vld.sshfl [vmem:[#allocation1 + $0x8] sm:$0xff pattern:$0x75316420] }
 0x7a8   : >> { %v2623_v8 = vsel %vm5764_vm1, %v2617_v60, %v2621_v18  ;;  %v2625_v63 = vsel %vm5765_vm5, %v2621_v18, %v2617_v60  ;;  %2774 = vmatpush.msrb.mxu1 %v5134_v54  ;;  %2814 = vmatpush.msrb.mxu3 %v5118_v6  ;;  %vm5773_vm1 = vmmov %vm5769_vm0 }
 0x7a9   : >> { %vm5774_vm5 = vmmov %vm5769_vm0 }
 0x7aa   : >> { %2775 = vmatpush.msrb.mxu1 %v5126_v10  ;;  %2815 = vmatpush.msrb.mxu3 %v5110_v50 }
 0x7ac   : >> { %3382 = vmatpush.msk.msrb.mxu1 %vm3679_vm6, %v2625_v63  ;;  %3383 = vmatpush.msk.msrb.mxu3 %vm5766_vm10, %v2623_v8 }
 0x7ae   : >> { %v2597_v0 = vpop.permute.xlu1 %2596  ;;  %3384 = vmatpush.msk.msrb.mxu1 %vm3679_vm6, %v2624_v12  ;;  %3385 = vmatpush.msk.msrb.mxu3 %vm5766_vm10, %v5193_v9  ;;  %vm5775_vm10 = vnez %v5503_v5 }
 0x7af   : >> { %v2603_v58 = vsel %vm5767_vm8, %v2597_v0, %v5185_v43  ;;  %v2605_v54 = vsel %vm5768_vm13, %v5185_v43, %v2597_v0  ;;  %v2559_v6 = vpop.permute.xlu0 %2558  ;;  %v2705_v43 = vpop.permute.xlu2 %2704  ;;  %vm5776_vm8 = vnez %v5501_v2  ;;  %vm5777_vm13 = vnez %v5511_v21 }
 0x7b0   : >> { %v2562_v50 = vsel %vm5769_vm0, %v2555_v39, %v2559_v6  ;;  %v2564_v10 = vsel %vm5770_vm4, %v2559_v6, %v2555_v39  ;;  %3386 = vmatpush.msk.msrb.mxu1 %vm3826_vm3, %v2605_v54  ;;  %3387 = vmatpush.msk.msrb.mxu3 %vm3818_vm15, %v2603_v58  ;;  %vm5780_vm0 = vmmov %vm5772_vm7  ;;  %vm5781_vm4 = vcmask 130048  }
 0x7b2   : >> { %3388 = vmatpush.msk.msrb.mxu1 %vm3826_vm3, %v2604_v62  ;;  %3389 = vmatpush.msk.msrb.mxu3 %vm3818_vm15, %v2602_v7 }
 0x7b4   : >> { %3390 = vmatpush.msk.msrb.mxu1 %vm5671_vm11, %v2585_v40  ;;  %3391 = vmatpush.msk.msrb.mxu3 %vm5672_vm9, %v2583_v27 }
 0x7b6   : >> { %v2701_v9 = vpop.permute.xlu1 %2700  ;;  %3392 = vmatpush.msk.msrb.mxu1 %vm5671_vm11, %v2584_v4  ;;  %3393 = vmatpush.msk.msrb.mxu3 %vm5672_vm9, %v2582_v34  ;;  %vm5778_vm11 = vnez %v5509_v15  ;;  %vm5779_vm9 = vmmov %vm5772_vm7  ;;  %v2851_v34 = vld.sshfl [vmem:[#allocation1] sm:$0xff pattern:$0x75316420] }
 0x7b7   : >> { %v2707_v12 = vsel %vm5771_vm14, %v2701_v9, %v2705_v43  ;;  %v2709_v31 = vsel %vm5772_vm7, %v2705_v43, %v2701_v9  ;;  %v2557_v59 = vpop.permute.xlu0 %2556  ;;  %vm5782_vm14 = vmmov %vm5781_vm4  ;;  %v2759_v26 = vpop.permute.xlu2 %2758  ;;  %vm5783_vm7 = vcmask 1043456  }
 0x7b8   : >> { %v2563_v19 = vsel %vm5773_vm1, %v2557_v59, %v2561_v55  ;;  %v2565_v16 = vsel %vm5774_vm5, %v2561_v55, %v2557_v59  ;;  %3394 = vmatpush.msk.msra.mxu2 %vm5775_vm10, %v2707_v12  ;;  %3395 = vmatpush.msk.msra.mxu0 %vm5776_vm8, %v2709_v31  ;;  %vm5784_vm1 = vmmov %vm5783_vm7 }
 0x7b9   : >> { %3396 = vmatpush.msk.msrb.mxu1 %vm5777_vm13, %v2565_v16  ;;  %3397 = vmatpush.msk.msrb.mxu3 %vm5778_vm11, %v2563_v19 }
 0x7bb   : >> { %3398 = vmatpush.msk.msrb.mxu1 %vm5777_vm13, %v2564_v10  ;;  %3399 = vmatpush.msk.msrb.mxu3 %vm5778_vm11, %v2562_v50 }
 0x7bc   : >> { %2784 = vmatmul.f32.vlgmr.msrb.gmra.mxu1 %v2763_v23  ;;  %2824 = vmatmul.f32.vlgmr.msrb.gmra.mxu3 %v2763_v23 }
 0x7be   : >> { %v2703_v18 = vpop.permute.xlu1 %2702 }
 0x7bf   : >> { %v2699_v48 = vpop.permute.xlu0 %2698 }
 0x7c0   : >> { %v2706_v22 = vsel %vm5779_vm9, %v2699_v48, %v2703_v18  ;;  %v2708_v20 = vsel %vm5780_vm0, %v2703_v18, %v2699_v48 }
 0x7c1   : >> { %3400 = vmatpush.msk.msra.mxu2 %vm5775_vm10, %v2706_v22  ;;  %3401 = vmatpush.msk.msra.mxu0 %vm5776_vm8, %v2708_v20 }
 0x7c2   : >> { %3137 = vmatmul.msk.f32.vlgmr.msra.gmra.mxu2 %vm5781_vm4, %v2764_v57  ;;  %3138 = vmatmul.msk.f32.vlgmr.msra.gmra.mxu0 %vm5782_vm14, %v2764_v57 }
 0x839   : >> { %v2785_v36 = vpop.f32.mrf.mxu1 }
 0x83a   : >> { %v2786_v7 = vadd.f32 %v2785_v36, %v2759_v26 }
 0x83f   : >> { %v2825_v32 = vpop.f32.mrf.mxu3  ;;  %v2845_v35 = vpop.f32.mrf.mxu0 }
 0x840   : >> { %v2826_v33 = vadd.f32 %v2825_v32, %v2759_v26 }
 0x842   : >> { %v2846_v0 = vadd.f32 %v2845_v35, %v2826_v33  }
 0x844   : >> { %v2849_v62 = vadd.f32 1.0, %v2846_v0  ;;  %v2859_v3 = vrot.slane %v2846_v0, 4 }
 0x845   : >> { %v2805_v39 = vpop.f32.mrf.mxu2 }
 0x846   : >> { %v2856_v43 = vmul.f32 %v2852_v42, %v2849_v62   ;;  %v2806_v63 = vadd.f32 %v2805_v39, %v2786_v7  }
 0x848   : >> { %v2848_v4 = vadd.f32 1.0, %v2806_v63  ;;  %v2860_v61 = vsel %vm5783_vm7, %v2806_v63, %v2859_v3  ;;  %v2868_v52 = vrot.slane %v2856_v43, 4 }
 0x849   : >> { %2865 = vst [vmem:[%s2864_s20] sm:$0x77] %v2860_v61  ;;  %1857 = sbr.rel (!%p1855_p8) target bundleno = 1112 (0x458), region = 216 }
 0x84a   : >> { %v2855_v58 = vmul.f32 %v2851_v34, %v2848_v4  }
 0x84c   : >> { %v2869_v38 = vsel %vm5784_vm1, %v2855_v58, %v2868_v52 }
 0x84d   : >> { %2873 = vst [vmem:[%s2872_s27] sm:$0x77] %v2869_v38 }
 0x84e   : > { %2884 = sbr.rel (!%p3589_p4) target bundleno = 2134 (0x856), region = 87  ;;  %s3151_s17 = sshll.u32 (%p3589_p4), %s3577_s21, 3 }
 0x84f   : > { %s2887_s29 = scalar_lea.vmem (%p3589_p4), %s5392_s14, %s3151_s17 }
 0x850   : > { %v2924_v53 = vld [vmem:[%s4664_s30] sm:$0xff] (%p3589_p4)  ;;  %v2926_v13 = vld [vmem:[%s4664_s30 + $0x8] sm:$0xff] (%p3589_p4)  ;;  %v2928_v25 = vld [vmem:[%s4664_s30 + $0x10] sm:$0xff] (%p3589_p4) }
 0x851   : > { %2925 = vst [vmem:[%s2887_s29] sm:$0xff] (%p3589_p4), %v2924_v53  ;;  %v2930_v28 = vld [vmem:[%s4664_s30 + $0x18] sm:$0xff] (%p3589_p4)  ;;  %v2932_v1 = vld [vmem:[%s4664_s30 + $0x20] sm:$0xff] (%p3589_p4) }
 0x852   : > { %2927 = vst [vmem:[%s2887_s29 + $0x10] sm:$0xff] (%p3589_p4), %v2926_v13 }
 0x853   : > { %2929 = vst [vmem:[%s2887_s29 + $0x20] sm:$0xff] %v2928_v25 }
 0x854   : > { %2931 = vst [vmem:[%s2887_s29 + $0x30] sm:$0xff] %v2930_v28 }
 0x855   : > { %2933 = vst [vmem:[%s2887_s29 + $0x40] sm:$0xff] %v2932_v1 }
 0x856 PF: > { %2939 = sbr.rel (!%p3589_p4) target bundleno = 2141 (0x85d), region = 125  ;;  %s3152_s16 = sshll.u32 (%p3589_p4), %s3577_s21, 3 }
 0x857   : > { %v2979_v24 = vld [vmem:[%s4668_s18] sm:$0xff] (%p3589_p4)  ;;  %v2981_v29 = vld [vmem:[%s4668_s18 + $0x8] sm:$0xff] (%p3589_p4)  ;;  %s2942_s30 = scalar_lea.vmem (%p3589_p4), %s5393_s15, %s3152_s16  ;;  %v2983_v30 = vld [vmem:[%s4668_s18 + $0x10] sm:$0xff] (%p3589_p4) }
 0x858   : > { %2980 = vst [vmem:[%s2942_s30] sm:$0xff] (%p3589_p4), %v2979_v24  ;;  %v2985_v44 = vld [vmem:[%s4668_s18 + $0x18] sm:$0xff] (%p3589_p4)  ;;  %v2987_v45 = vld [vmem:[%s4668_s18 + $0x20] sm:$0xff] (%p3589_p4) }
 0x859   : > { %2982 = vst [vmem:[%s2942_s30 + $0x10] sm:$0xff] (%p3589_p4), %v2981_v29 }
 0x85a   : > { %2984 = vst [vmem:[%s2942_s30 + $0x20] sm:$0xff] (%p3589_p4), %v2983_v30 }
 0x85b   : > { %2986 = vst [vmem:[%s2942_s30 + $0x30] sm:$0xff] %v2985_v44 }
 0x85c   : > { %2988 = vst [vmem:[%s2942_s30 + $0x40] sm:$0xff] %v2987_v45 }
 0x85d PF: > { %s5785_s18 = sld [smem:[#allocation6_spill]]  ;;  %p23_p9 = scmp.ge.s32.totalorder %s3579_s22, 4  }
 0x85e   : > { %s5786_s19 = sld [smem:[#allocation7_spill]]  ;;  %s5787_s20 = smov %s3579_s22 }
 0x85f   :  { %25 = sbr.rel (!%p23_p9) target bundleno = 2 (0x2), region = 227 }

</bundles_post_ra>
